<compile_context>
chip_gen: v6e
topology: v6e:2x2x1
jax: 0.10.0
libtpu: 0.0.40
codegen_flags: <defaults>
</compile_context>

<pallas_src>
import functools

import jax
import jax.numpy as jnp
from jax.experimental import pallas as pl
from jax.experimental.pallas import tpu as pltpu


# -----------------------------------------------------------------------------
# Fused kernel: embedding + L bidirectional LSTM layers + hidden2tag + log_softmax
# -----------------------------------------------------------------------------
def _fused_tagger_kernel(*refs, B, T, Bp, E, C, H, L):
    """refs = (sent, cb, emb, [wih, whh, b]*L, w_tag, b_tag, out,
               x_sc, gx_sc, seq0_sc, seq1_sc).

    sent   : SMEM (B, T) int32        token ids
    cb     : VMEM (B, T, C) int32     extra case-base features
    emb    : VMEM (V+1, 1, E) f32     embedding table (pad row is zero)
    wih_l  : (Dp_l, 8H) f32           packed input weights (gate blocks [i,f,o,g],
                                      each 2H wide = [fwd | bwd]); rows >= Din are 0
    whh_l  : (2H, 8H) bf16            packed block-diagonal recurrent weights
    b_l    : (1, 8H) f32              packed b_ih + b_hh
    w_tag  : (2H, Kp) f32             tag head weights, Kp lane-padded to 128
    b_tag  : (1, Kp) f32              tag head bias, huge-negative on pad columns
    out    : (B, T, Kp) f32           log-softmax scores (batch-major)
    x_sc   : (T*Bp, Dp0) f32          in-kernel built time-major padded input
    gx_sc  : (T*Bp, 8H) f32           hoisted input-projection scratch
    seq*_sc: (T*Bp, 2H) f32           per-layer [h_fwd | h_bwd] sequence outputs
    """
    sent_ref, cb_ref, emb_ref = refs[0], refs[1], refs[2]
    layer_refs = refs[3:3 + 3 * L]
    wtag_ref = refs[3 + 3 * L]
    btag_ref = refs[4 + 3 * L]
    out_ref = refs[5 + 3 * L]
    x_sc = refs[6 + 3 * L]
    gx_sc = refs[7 + 3 * L]
    seq_sc = (refs[8 + 3 * L], refs[9 + 3 * L])

    H2, H4, H6, H8 = 2 * H, 4 * H, 6 * H, 8 * H

    # --- hoisted lane masks / constants (JAX does not CSE broadcasts) --------
    lane8 = jax.lax.broadcasted_iota(jnp.int32, (Bp, H8), 1)
    fwd_mask8 = (lane8 % H2) < H          # fwd-direction lanes inside each gate block
    ifo_mask = lane8 < H6                 # sigmoid gates (i, f, o); remainder is g
    pre_scale = jnp.where(ifo_mask, 0.5, 1.0).astype(jnp.float32)
    post_shift = jnp.where(ifo_mask, 0.5, 0.0).astype(jnp.float32)
    lane2 = jax.lax.broadcasted_iota(jnp.int32, (Bp, H2), 1)
    fwd_mask2 = lane2 < H

    # --- build the time-major, batch-padded input inside the kernel ----------
    x_sc[...] = jnp.zeros_like(x_sc)      # zero feature-pad cols & batch-pad rows
    for t in range(T):
        for b in range(B):
            row = t * Bp + b
            tok = sent_ref[b, t]                                  # SMEM scalar
            x_sc[row:row + 1, 0:E] = emb_ref[tok]                 # (1, E) gather
            x_sc[row:row + 1, E:E + C] = (
                cb_ref[b, t:t + 1, :].astype(jnp.float32))        # (1, C)

    def run_layer(in_ref, wih_ref, whh_ref, b_ref, out_sc):
        # Hoisted input projection for ALL timesteps (off the serial chain).
        gx_sc[...] = (jnp.dot(in_ref[...], wih_ref[...],
                              preferred_element_type=jnp.float32) + b_ref[...])

        # Time-reverse the backward-direction lanes of the precomputed gates.
        for s in range(T // 2):
            r = T - 1 - s
            blk_a = gx_sc[s * Bp:(s + 1) * Bp, :]
            blk_b = gx_sc[r * Bp:(r + 1) * Bp, :]
            gx_sc[s * Bp:(s + 1) * Bp, :] = jnp.where(fwd_mask8, blk_a, blk_b)
            gx_sc[r * Bp:(r + 1) * Bp, :] = jnp.where(fwd_mask8, blk_b, blk_a)

        whh = whh_ref[...]                                   # bf16 (2H, 8H)
        h = jnp.zeros((Bp, H2), jnp.float32)                 # [h_fwd | h_bwd]
        c = jnp.zeros((Bp, H2), jnp.float32)

        # Statically unrolled recurrence: only h @ W_hh sits on the serial chain.
        for t in range(T):
            gates = (jnp.dot(h.astype(jnp.bfloat16), whh,
                             preferred_element_type=jnp.float32)
                     + gx_sc[t * Bp:(t + 1) * Bp, :])        # (Bp, 8H) f32
            # One EUP pass: sigmoid(x)=0.5*tanh(0.5x)+0.5 on i/f/o lanes, tanh on g.
            act = jnp.tanh(gates * pre_scale) * pre_scale + post_shift
            i_g = act[:, 0:H2]
            f_g = act[:, H2:H4]
            o_g = act[:, H4:H6]
            g_g = act[:, H6:H8]
            c = f_g * c + i_g * g_g                          # (Bp, 2H), f32
            h = o_g * jnp.tanh(c)
            out_sc[t * Bp:(t + 1) * Bp, :] = h               # single full-width store

        # Move the backward-half time reversal out of the serial loop.
        for s in range(T // 2):
            r = T - 1 - s
            blk_a = out_sc[s * Bp:(s + 1) * Bp, :]
            blk_b = out_sc[r * Bp:(r + 1) * Bp, :]
            out_sc[s * Bp:(s + 1) * Bp, :] = jnp.where(fwd_mask2, blk_a, blk_b)
            out_sc[r * Bp:(r + 1) * Bp, :] = jnp.where(fwd_mask2, blk_b, blk_a)

    # TODO(synk): inter-layer dropout(p=0.2) skipped (inference semantics).
    cur_in = x_sc
    for li in range(L):
        wih_ref, whh_ref, b_ref = layer_refs[3 * li:3 * li + 3]
        out_sc = seq_sc[li % 2]
        run_layer(cur_in, wih_ref, whh_ref, b_ref, out_sc)
        cur_in = out_sc

    # --- hidden2tag + log_softmax, lane-dense (Kp = 128) --------------------
    logits = (jnp.dot(cur_in[...], wtag_ref[...],
                      preferred_element_type=jnp.float32) + btag_ref[...])
    m = jnp.max(logits, axis=-1, keepdims=True)
    shifted = logits - m
    lse = jnp.log(jnp.sum(jnp.exp(shifted), axis=-1, keepdims=True))
    scores = shifted - lse                                   # (T*Bp, Kp)

    # Scatter only the real (b, t) rows, batch-major -> the wrapper needs one slice.
    for t in range(T):
        for b in range(B):
            r = t * Bp + b
            out_ref[b, t:t + 1, :] = scores[r:r + 1, :]


# -----------------------------------------------------------------------------
# Parameter packing: PyTorch LSTM layout -> fused bidirectional layout
# -----------------------------------------------------------------------------
def _pack_bidir_layer(fwd, bwd, H, din_pad):
    """fwd / bwd = (w_ih (4H,Din), w_hh (4H,H), b_ih (4H,), b_hh (4H,)) in
    PyTorch layout (gate order i, f, g, o).  Returns packed
    (w_ih_p (din_pad, 8H) f32, w_hh_p (2H, 8H) bf16, b_p (1, 8H) f32) with gate
    blocks ordered [i, f, o, g], each 2H wide = [fwd | bwd] halves."""
    din = fwd[0].shape[1]
    perm = (0, 1, 3, 2)  # target order i, f, o, g  <- PyTorch i, f, g, o
    w_ih_p = jnp.zeros((din_pad, 8 * H), jnp.float32)
    w_hh_p = jnp.zeros((2 * H, 8 * H), jnp.float32)
    b_p = jnp.zeros((1, 8 * H), jnp.float32)
    for gi, k in enumerate(perm):
        for d, (w_ih, w_hh, b_ih, b_hh) in enumerate((fwd, bwd)):
            c0 = gi * 2 * H + d * H
            w_ih_p = w_ih_p.at[:din, c0:c0 + H].set(w_ih[k * H:(k + 1) * H, :].T)
            w_hh_p = w_hh_p.at[d * H:(d + 1) * H, c0:c0 + H].set(
                w_hh[k * H:(k + 1) * H, :].T)
            b_p = b_p.at[0, c0:c0 + H].set(
                b_ih[k * H:(k + 1) * H] + b_hh[k * H:(k + 1) * H])
    # Recurrent weights in bf16: native single-pass MXU path on the serial chain.
    return w_ih_p, w_hh_p.astype(jnp.bfloat16), b_p


def init_params(key, embedding_dim, hidden_dim, vocab_size, tagset_size,
                num_of_layers=2):
    """Returns (packed params for the kernel, raw PyTorch-layout params)."""
    H = hidden_dim
    keys = iter(jax.random.split(key, 1 + 8 * num_of_layers + 2))

    emb = jax.random.normal(next(keys), (vocab_size + 1, embedding_dim),
                            jnp.float32)
    emb = emb.at[vocab_size].set(0.0)          # padding_idx row is zero

    bound = 1.0 / (H ** 0.5)
    raw_layers, packed_layers = [], []
    for layer in range(num_of_layers):
        in_dim = (embedding_dim + 3) if layer == 0 else 2 * H
        din_pad = ((in_dim + 7) // 8) * 8      # sublane-align the projection K dim
        dirs = []
        for _d in range(2):  # forward, backward
            w_ih = jax.random.uniform(next(keys), (4 * H, in_dim), jnp.float32,
                                      -bound, bound)
            w_hh = jax.random.uniform(next(keys), (4 * H, H), jnp.float32,
                                      -bound, bound)
            b_ih = jax.random.uniform(next(keys), (4 * H,), jnp.float32,
                                      -bound, bound)
            b_hh = jax.random.uniform(next(keys), (4 * H,), jnp.float32,
                                      -bound, bound)
            dirs.append((w_ih, w_hh, b_ih, b_hh))
        raw_layers.append(tuple(dirs))
        packed_layers.append(_pack_bidir_layer(dirs[0], dirs[1], H, din_pad))

    lin_bound = 1.0 / ((2 * H) ** 0.5)
    w_tag = jax.random.uniform(next(keys), (tagset_size, 2 * H), jnp.float32,
                               -lin_bound, lin_bound)
    b_tag = jax.random.uniform(next(keys), (tagset_size,), jnp.float32,
                               -lin_bound, lin_bound)

    Kp = max(128, ((tagset_size + 127) // 128) * 128)   # lane-dense output
    w_tag_p = jnp.zeros((2 * H, Kp), jnp.float32).at[:, :tagset_size].set(
        w_tag.T)
    neg = jnp.finfo(jnp.float32).min / 2                # safe "minus infinity"
    b_tag_p = jnp.full((1, Kp), neg, jnp.float32).at[0, :tagset_size].set(b_tag)

    packed = {
        # (V+1, 1, E): leading (untiled) vocab dim -> cheap dynamic row gather.
        "embedding": emb.reshape(vocab_size + 1, 1, embedding_dim),
        "layers": packed_layers, "w_tag": w_tag_p, "b_tag": b_tag_p,
    }
    raw = {"embedding": emb, "layers": raw_layers,
           "w_tag": w_tag, "b_tag": b_tag}
    return packed, raw


# -----------------------------------------------------------------------------
# Forward pass (wrapper)
# -----------------------------------------------------------------------------
@functools.partial(jax.jit, static_argnames=("tagset_size",))
def lstm_tagger_forward(params, sentence, cb, *, tagset_size):
    """sentence: (B, T) int32, cb: (B, T, 3) int32 -> (B, T, tagset) log-probs."""
    B, T = sentence.shape
    C = cb.shape[-1]
    emb = params["embedding"]                       # (V+1, 1, E)
    E = emb.shape[-1]
    H = params["layers"][0][1].shape[0] // 2        # whh: (2H, 8H)
    L = len(params["layers"])
    Kp = params["w_tag"].shape[1]
    Dp0 = params["layers"][0][0].shape[0]           # padded layer-0 input dim
    Bp = ((B + 7) // 8) * 8                         # sublane pad

    sent_i32 = sentence if sentence.dtype == jnp.int32 else sentence.astype(jnp.int32)
    cb_i32 = cb if cb.dtype == jnp.int32 else cb.astype(jnp.int32)

    flat_weights = []
    for (wih_p, whh_p, b_p) in params["layers"]:
        flat_weights += [wih_p, whh_p, b_p]

    vmem = pl.BlockSpec(memory_space=pltpu.MemorySpace.VMEM)
    smem = pl.BlockSpec(memory_space=pltpu.MemorySpace.SMEM)
    kernel = functools.partial(_fused_tagger_kernel,
                               B=B, T=T, Bp=Bp, E=E, C=C, H=H, L=L)

    out = pl.pallas_call(
        kernel,
        out_shape=jax.ShapeDtypeStruct((B, T, Kp), jnp.float32),
        in_specs=[smem, vmem, vmem] + [vmem] * (3 * L) + [vmem, vmem],
        out_specs=vmem,
        scratch_shapes=[
            pltpu.VMEM((T * Bp, Dp0), jnp.float32),     # in-kernel built input
            pltpu.VMEM((T * Bp, 8 * H), jnp.float32),   # hoisted gate projection
            pltpu.VMEM((T * Bp, 2 * H), jnp.float32),   # layer output ping
            pltpu.VMEM((T * Bp, 2 * H), jnp.float32),   # layer output pong
        ],
    )(sent_i32, cb_i32, emb, *flat_weights, params["w_tag"], params["b_tag"])

    return out[:, :, :tagset_size]                       # single post-op


# -----------------------------------------------------------------------------
# Pure-JAX reference (PyTorch semantics) for correctness checking
# -----------------------------------------------------------------------------
def reference_forward(raw, sentence, cb):
    hp = jax.lax.Precision.HIGHEST
    emb = jnp.take(raw["embedding"], sentence, axis=0)
    x = jnp.concatenate([emb, cb.astype(jnp.float32)], axis=-1)   # (B, T, D)
    xt = jnp.transpose(x, (1, 0, 2))                              # (T, B, D)
    H = raw["layers"][0][0][1].shape[1]

    def run_dir(x_seq, w_ih, w_hh, b_ih, b_hh):
        Bn = x_seq.shape[1]

        def step(carry, x_t):
            h, c = carry
            gates = (jnp.dot(x_t, w_ih.T, precision=hp)
                     + jnp.dot(h, w_hh.T, precision=hp) + b_ih + b_hh)
            i = jax.nn.sigmoid(gates[:, 0:H])
            f = jax.nn.sigmoid(gates[:, H:2 * H])
            g = jnp.tanh(gates[:, 2 * H:3 * H])
            o = jax.nn.sigmoid(gates[:, 3 * H:4 * H])
            c = f * c + i * g
            h = o * jnp.tanh(c)
            return (h, c), h

        init = (jnp.zeros((Bn, H), jnp.float32),
                jnp.zeros((Bn, H), jnp.float32))
        _, hs = jax.lax.scan(step, init, x_seq)
        return hs

    for (fwd, bwd) in raw["layers"]:
        hf = run_dir(xt, *fwd)
        hb = run_dir(xt[::-1], *bwd)[::-1]
        xt = jnp.concatenate([hf, hb], axis=-1)

    h = jnp.transpose(xt, (1, 0, 2))                              # (B, T, 2H)
    logits = jnp.dot(h, raw["w_tag"].T, precision=hp) + raw["b_tag"]
    return jax.nn.log_softmax(logits, axis=-1)


# -----------------------------------------------------------------------------
if __name__ == "__main__":
    embedding_dim = 16
    hidden_dim = 32
    vocab_size = 50
    tagset_size = 10
    num_of_layers = 2
    batch = 2
    seq = 8

    key = jax.random.PRNGKey(0)
    k_param, k_sent, k_cb = jax.random.split(key, 3)

    params, raw = init_params(k_param, embedding_dim, hidden_dim, vocab_size,
                              tagset_size, num_of_layers)

    sentence = jax.random.randint(k_sent, (batch, seq), 0, vocab_size + 1,
                                  dtype=jnp.int32)
    cb = jax.random.randint(k_cb, (batch, seq, 3), 0, 2, dtype=jnp.int32)

    out = lstm_tagger_forward(params, sentence, cb, tagset_size=tagset_size)
    out = jax.block_until_ready(out)

    assert out.shape == (batch, seq, tagset_size)
    assert bool(jnp.all(jnp.isfinite(out)))
    # log_softmax rows should exp-sum to ~1
    assert bool(jnp.allclose(jnp.sum(jnp.exp(out), axis=-1), 1.0, atol=1e-4))

    # Match the pure-JAX (PyTorch-semantics) reference.
    ref = reference_forward(raw, sentence, cb)
    assert bool(jnp.allclose(out, ref, atol=1e-2, rtol=1e-2)), (
        float(jnp.max(jnp.abs(out - ref))))

    print("KERNEL_OK")
</pallas_src>

<mosaic_0001>
module attributes {stable_mosaic.version = 11 : i64} {
  func.func @_fused_tagger_kernel(%arg0: memref<2x8xi32, #tpu.memory_space<smem>>, %arg1: memref<2x8x3xi32, #tpu.memory_space<vmem>>, %arg2: memref<51x1x16xf32, #tpu.memory_space<vmem>>, %arg3: memref<24x256xf32, #tpu.memory_space<vmem>>, %arg4: memref<64x256xbf16, #tpu.memory_space<vmem>>, %arg5: memref<1x256xf32, #tpu.memory_space<vmem>>, %arg6: memref<64x256xf32, #tpu.memory_space<vmem>>, %arg7: memref<64x256xbf16, #tpu.memory_space<vmem>>, %arg8: memref<1x256xf32, #tpu.memory_space<vmem>>, %arg9: memref<64x128xf32, #tpu.memory_space<vmem>>, %arg10: memref<1x128xf32, #tpu.memory_space<vmem>>, %arg11: memref<2x8x128xf32, #tpu.memory_space<vmem>>, %arg12: memref<64x24xf32, #tpu.memory_space<vmem>>, %arg13: memref<64x256xf32, #tpu.memory_space<vmem>>, %arg14: memref<64x64xf32, #tpu.memory_space<vmem>>, %arg15: memref<64x64xf32, #tpu.memory_space<vmem>>) attributes {dimension_semantics = [], scalar_prefetch = 0 : i64, scratch_operands = 4 : i64, tpu.core_type = #tpu.core_type<tc>} {
    %0 = tpu.iota {dimensions = array<i32: 1>} : vector<8x256xi32>
    %c64_i32 = arith.constant 64 : i32
    %c0_i32 = arith.constant 0 : i32
    %1 = arith.cmpi eq, %c64_i32, %c0_i32 : i32
    %c1_i32 = arith.constant 1 : i32
    %2 = arith.select %1, %c1_i32, %c64_i32 : i32
    %3 = vector.broadcast %2 : i32 to vector<8x256xi32>
    %4 = arith.remsi %0, %3 : vector<8x256xi32>
    %c0_i32_0 = arith.constant 0 : i32
    %5 = vector.broadcast %c0_i32_0 : i32 to vector<8x256xi32>
    %6 = arith.cmpi ne, %4, %5 : vector<8x256xi32>
    %c0_i32_1 = arith.constant 0 : i32
    %7 = vector.broadcast %c0_i32_1 : i32 to vector<8x256xi32>
    %8 = arith.cmpi slt, %4, %7 : vector<8x256xi32>
    %c0_i32_2 = arith.constant 0 : i32
    %9 = arith.cmpi slt, %2, %c0_i32_2 : i32
    %10 = vector.broadcast %9 : i1 to vector<8x256xi1>
    %11 = vector.broadcast %10 : vector<8x256xi1> to vector<8x256xi1>
    %12 = arith.xori %8, %11 : vector<8x256xi1>
    %13 = arith.andi %12, %6 : vector<8x256xi1>
    %14 = vector.broadcast %2 : i32 to vector<8x256xi32>
    %15 = arith.addi %4, %14 : vector<8x256xi32>
    %16 = arith.select %13, %15, %4 : vector<8x256xi1>, vector<8x256xi32>
    %c32_i32 = arith.constant 32 : i32
    %17 = vector.broadcast %c32_i32 : i32 to vector<8x256xi32>
    %18 = arith.cmpi slt, %16, %17 : vector<8x256xi32>
    %c192_i32 = arith.constant 192 : i32
    %19 = vector.broadcast %c192_i32 : i32 to vector<8x256xi32>
    %20 = arith.cmpi slt, %0, %19 : vector<8x256xi32>
    %cst = arith.constant 5.000000e-01 : f32
    %cst_3 = arith.constant 1.000000e+00 : f32
    %21 = vector.broadcast %cst : f32 to vector<8x256xf32>
    %22 = vector.broadcast %cst_3 : f32 to vector<8x256xf32>
    %23 = arith.select %20, %21, %22 : vector<8x256xi1>, vector<8x256xf32>
    %cst_4 = arith.constant 5.000000e-01 : f32
    %cst_5 = arith.constant 0.000000e+00 : f32
    %24 = vector.broadcast %cst_4 : f32 to vector<8x256xf32>
    %25 = vector.broadcast %cst_5 : f32 to vector<8x256xf32>
    %26 = arith.select %20, %24, %25 : vector<8x256xi1>, vector<8x256xf32>
    %27 = tpu.iota {dimensions = array<i32: 1>} : vector<8x64xi32>
    %c32_i32_6 = arith.constant 32 : i32
    %28 = vector.broadcast %c32_i32_6 : i32 to vector<8x64xi32>
    %29 = arith.cmpi slt, %27, %28 : vector<8x64xi32>
    %cst_7 = arith.constant 0.000000e+00 : f32
    %30 = vector.broadcast %cst_7 : f32 to vector<64x24xf32>
    %c0 = arith.constant 0 : index
    %c0_8 = arith.constant 0 : index
    %31 = vector.load %arg12[%c0, %c0_8] : memref<64x24xf32, #tpu.memory_space<vmem>>, vector<64x24xf32>
    tpu.vector_store %arg12[%c0, %c0_8], %30 {strides = array<i32>} : memref<64x24xf32, #tpu.memory_space<vmem>>, vector<64x24xf32>,
    %c0_9 = arith.constant 0 : index
    %c0_10 = arith.constant 0 : index
    %32 = memref.load %arg0[%c0_9, %c0_10] : memref<2x8xi32, #tpu.memory_space<smem>>
    %33 = arith.index_cast %32 : i32 to index
    %c0_11 = arith.constant 0 : index
    %c0_12 = arith.constant 0 : index
    %34 = vector.load %arg2[%33, %c0_11, %c0_12] : memref<51x1x16xf32, #tpu.memory_space<vmem>>, vector<1x1x16xf32>
    %35 = vector.shape_cast %34 : vector<1x1x16xf32> to vector<1x16xf32>
    %c0_13 = arith.constant 0 : index
    %c0_14 = arith.constant 0 : index
    %36 = vector.load %arg12[%c0_13, %c0_14] : memref<64x24xf32, #tpu.memory_space<vmem>>, vector<1x16xf32>
    tpu.vector_store %arg12[%c0_13, %c0_14], %35 {strides = array<i32>} : memref<64x24xf32, #tpu.memory_space<vmem>>, vector<1x16xf32>,
    %c0_15 = arith.constant 0 : index
    %c0_16 = arith.constant 0 : index
    %c0_17 = arith.constant 0 : index
    %37 = vector.load %arg1[%c0_15, %c0_16, %c0_17] : memref<2x8x3xi32, #tpu.memory_space<vmem>>, vector<1x1x3xi32>
    %38 = vector.shape_cast %37 : vector<1x1x3xi32> to vector<1x3xi32>
    %39 = arith.sitofp %38 : vector<1x3xi32> to vector<1x3xf32>
    %c0_18 = arith.constant 0 : index
    %c16 = arith.constant 16 : index
    %40 = vector.load %arg12[%c0_18, %c16] : memref<64x24xf32, #tpu.memory_space<vmem>>, vector<1x3xf32>
    tpu.vector_store %arg12[%c0_18, %c16], %39 {strides = array<i32>} : memref<64x24xf32, #tpu.memory_space<vmem>>, vector<1x3xf32>,
    %c1 = arith.constant 1 : index
    %c0_19 = arith.constant 0 : index
    %41 = memref.load %arg0[%c1, %c0_19] : memref<2x8xi32, #tpu.memory_space<smem>>
    %42 = arith.index_cast %41 : i32 to index
    %c0_20 = arith.constant 0 : index
    %c0_21 = arith.constant 0 : index
    %43 = vector.load %arg2[%42, %c0_20, %c0_21] : memref<51x1x16xf32, #tpu.memory_space<vmem>>, vector<1x1x16xf32>
    %44 = vector.shape_cast %43 : vector<1x1x16xf32> to vector<1x16xf32>
    %c1_22 = arith.constant 1 : index
    %c0_23 = arith.constant 0 : index
    %45 = vector.load %arg12[%c1_22, %c0_23] : memref<64x24xf32, #tpu.memory_space<vmem>>, vector<1x16xf32>
    tpu.vector_store %arg12[%c1_22, %c0_23], %44 {strides = array<i32>} : memref<64x24xf32, #tpu.memory_space<vmem>>, vector<1x16xf32>,
    %c1_24 = arith.constant 1 : index
    %c0_25 = arith.constant 0 : index
    %c0_26 = arith.constant 0 : index
    %46 = vector.load %arg1[%c1_24, %c0_25, %c0_26] : memref<2x8x3xi32, #tpu.memory_space<vmem>>, vector<1x1x3xi32>
    %47 = vector.shape_cast %46 : vector<1x1x3xi32> to vector<1x3xi32>
    %48 = arith.sitofp %47 : vector<1x3xi32> to vector<1x3xf32>
    %c1_27 = arith.constant 1 : index
    %c16_28 = arith.constant 16 : index
    %49 = vector.load %arg12[%c1_27, %c16_28] : memref<64x24xf32, #tpu.memory_space<vmem>>, vector<1x3xf32>
    tpu.vector_store %arg12[%c1_27, %c16_28], %48 {strides = array<i32>} : memref<64x24xf32, #tpu.memory_space<vmem>>, vector<1x3xf32>,
    %c0_29 = arith.constant 0 : index
    %c1_30 = arith.constant 1 : index
    %50 = memref.load %arg0[%c0_29, %c1_30] : memref<2x8xi32, #tpu.memory_space<smem>>
    %51 = arith.index_cast %50 : i32 to index
    %c0_31 = arith.constant 0 : index
    %c0_32 = arith.constant 0 : index
    %52 = vector.load %arg2[%51, %c0_31, %c0_32] : memref<51x1x16xf32, #tpu.memory_space<vmem>>, vector<1x1x16xf32>
    %53 = vector.shape_cast %52 : vector<1x1x16xf32> to vector<1x16xf32>
    %c8 = arith.constant 8 : index
    %c0_33 = arith.constant 0 : index
    %54 = vector.load %arg12[%c8, %c0_33] : memref<64x24xf32, #tpu.memory_space<vmem>>, vector<1x16xf32>
    tpu.vector_store %arg12[%c8, %c0_33], %53 {strides = array<i32>} : memref<64x24xf32, #tpu.memory_space<vmem>>, vector<1x16xf32>,
    %c0_34 = arith.constant 0 : index
    %c1_35 = arith.constant 1 : index
    %c0_36 = arith.constant 0 : index
    %55 = vector.load %arg1[%c0_34, %c1_35, %c0_36] : memref<2x8x3xi32, #tpu.memory_space<vmem>>, vector<1x1x3xi32>
    %56 = vector.shape_cast %55 : vector<1x1x3xi32> to vector<1x3xi32>
    %57 = arith.sitofp %56 : vector<1x3xi32> to vector<1x3xf32>
    %c8_37 = arith.constant 8 : index
    %c16_38 = arith.constant 16 : index
    %58 = vector.load %arg12[%c8_37, %c16_38] : memref<64x24xf32, #tpu.memory_space<vmem>>, vector<1x3xf32>
    tpu.vector_store %arg12[%c8_37, %c16_38], %57 {strides = array<i32>} : memref<64x24xf32, #tpu.memory_space<vmem>>, vector<1x3xf32>,
    %c1_39 = arith.constant 1 : index
    %c1_40 = arith.constant 1 : index
    %59 = memref.load %arg0[%c1_39, %c1_40] : memref<2x8xi32, #tpu.memory_space<smem>>
    %60 = arith.index_cast %59 : i32 to index
    %c0_41 = arith.constant 0 : index
    %c0_42 = arith.constant 0 : index
    %61 = vector.load %arg2[%60, %c0_41, %c0_42] : memref<51x1x16xf32, #tpu.memory_space<vmem>>, vector<1x1x16xf32>
    %62 = vector.shape_cast %61 : vector<1x1x16xf32> to vector<1x16xf32>
    %c9 = arith.constant 9 : index
    %c0_43 = arith.constant 0 : index
    %63 = vector.load %arg12[%c9, %c0_43] : memref<64x24xf32, #tpu.memory_space<vmem>>, vector<1x16xf32>
    tpu.vector_store %arg12[%c9, %c0_43], %62 {strides = array<i32>} : memref<64x24xf32, #tpu.memory_space<vmem>>, vector<1x16xf32>,
    %c1_44 = arith.constant 1 : index
    %c1_45 = arith.constant 1 : index
    %c0_46 = arith.constant 0 : index
    %64 = vector.load %arg1[%c1_44, %c1_45, %c0_46] : memref<2x8x3xi32, #tpu.memory_space<vmem>>, vector<1x1x3xi32>
    %65 = vector.shape_cast %64 : vector<1x1x3xi32> to vector<1x3xi32>
    %66 = arith.sitofp %65 : vector<1x3xi32> to vector<1x3xf32>
    %c9_47 = arith.constant 9 : index
    %c16_48 = arith.constant 16 : index
    %67 = vector.load %arg12[%c9_47, %c16_48] : memref<64x24xf32, #tpu.memory_space<vmem>>, vector<1x3xf32>
    tpu.vector_store %arg12[%c9_47, %c16_48], %66 {strides = array<i32>} : memref<64x24xf32, #tpu.memory_space<vmem>>, vector<1x3xf32>,
    %c0_49 = arith.constant 0 : index
    %c2 = arith.constant 2 : index
    %68 = memref.load %arg0[%c0_49, %c2] : memref<2x8xi32, #tpu.memory_space<smem>>
    %69 = arith.index_cast %68 : i32 to index
    %c0_50 = arith.constant 0 : index
    %c0_51 = arith.constant 0 : index
    %70 = vector.load %arg2[%69, %c0_50, %c0_51] : memref<51x1x16xf32, #tpu.memory_space<vmem>>, vector<1x1x16xf32>
    %71 = vector.shape_cast %70 : vector<1x1x16xf32> to vector<1x16xf32>
    %c16_52 = arith.constant 16 : index
    %c0_53 = arith.constant 0 : index
    %72 = vector.load %arg12[%c16_52, %c0_53] : memref<64x24xf32, #tpu.memory_space<vmem>>, vector<1x16xf32>
    tpu.vector_store %arg12[%c16_52, %c0_53], %71 {strides = array<i32>} : memref<64x24xf32, #tpu.memory_space<vmem>>, vector<1x16xf32>,
    %c0_54 = arith.constant 0 : index
    %c2_55 = arith.constant 2 : index
    %c0_56 = arith.constant 0 : index
    %73 = vector.load %arg1[%c0_54, %c2_55, %c0_56] : memref<2x8x3xi32, #tpu.memory_space<vmem>>, vector<1x1x3xi32>
    %74 = vector.shape_cast %73 : vector<1x1x3xi32> to vector<1x3xi32>
    %75 = arith.sitofp %74 : vector<1x3xi32> to vector<1x3xf32>
    %c16_57 = arith.constant 16 : index
    %c16_58 = arith.constant 16 : index
    %76 = vector.load %arg12[%c16_57, %c16_58] : memref<64x24xf32, #tpu.memory_space<vmem>>, vector<1x3xf32>
    tpu.vector_store %arg12[%c16_57, %c16_58], %75 {strides = array<i32>} : memref<64x24xf32, #tpu.memory_space<vmem>>, vector<1x3xf32>,
    %c1_59 = arith.constant 1 : index
    %c2_60 = arith.constant 2 : index
    %77 = memref.load %arg0[%c1_59, %c2_60] : memref<2x8xi32, #tpu.memory_space<smem>>
    %78 = arith.index_cast %77 : i32 to index
    %c0_61 = arith.constant 0 : index
    %c0_62 = arith.constant 0 : index
    %79 = vector.load %arg2[%78, %c0_61, %c0_62] : memref<51x1x16xf32, #tpu.memory_space<vmem>>, vector<1x1x16xf32>
    %80 = vector.shape_cast %79 : vector<1x1x16xf32> to vector<1x16xf32>
    %c17 = arith.constant 17 : index
    %c0_63 = arith.constant 0 : index
    %81 = vector.load %arg12[%c17, %c0_63] : memref<64x24xf32, #tpu.memory_space<vmem>>, vector<1x16xf32>
    tpu.vector_store %arg12[%c17, %c0_63], %80 {strides = array<i32>} : memref<64x24xf32, #tpu.memory_space<vmem>>, vector<1x16xf32>,
    %c1_64 = arith.constant 1 : index
    %c2_65 = arith.constant 2 : index
    %c0_66 = arith.constant 0 : index
    %82 = vector.load %arg1[%c1_64, %c2_65, %c0_66] : memref<2x8x3xi32, #tpu.memory_space<vmem>>, vector<1x1x3xi32>
    %83 = vector.shape_cast %82 : vector<1x1x3xi32> to vector<1x3xi32>
    %84 = arith.sitofp %83 : vector<1x3xi32> to vector<1x3xf32>
    %c17_67 = arith.constant 17 : index
    %c16_68 = arith.constant 16 : index
    %85 = vector.load %arg12[%c17_67, %c16_68] : memref<64x24xf32, #tpu.memory_space<vmem>>, vector<1x3xf32>
    tpu.vector_store %arg12[%c17_67, %c16_68], %84 {strides = array<i32>} : memref<64x24xf32, #tpu.memory_space<vmem>>, vector<1x3xf32>,
    %c0_69 = arith.constant 0 : index
    %c3 = arith.constant 3 : index
    %86 = memref.load %arg0[%c0_69, %c3] : memref<2x8xi32, #tpu.memory_space<smem>>
    %87 = arith.index_cast %86 : i32 to index
    %c0_70 = arith.constant 0 : index
    %c0_71 = arith.constant 0 : index
    %88 = vector.load %arg2[%87, %c0_70, %c0_71] : memref<51x1x16xf32, #tpu.memory_space<vmem>>, vector<1x1x16xf32>
    %89 = vector.shape_cast %88 : vector<1x1x16xf32> to vector<1x16xf32>
    %c24 = arith.constant 24 : index
    %c0_72 = arith.constant 0 : index
    %90 = vector.load %arg12[%c24, %c0_72] : memref<64x24xf32, #tpu.memory_space<vmem>>, vector<1x16xf32>
    tpu.vector_store %arg12[%c24, %c0_72], %89 {strides = array<i32>} : memref<64x24xf32, #tpu.memory_space<vmem>>, vector<1x16xf32>,
    %c0_73 = arith.constant 0 : index
    %c3_74 = arith.constant 3 : index
    %c0_75 = arith.constant 0 : index
    %91 = vector.load %arg1[%c0_73, %c3_74, %c0_75] : memref<2x8x3xi32, #tpu.memory_space<vmem>>, vector<1x1x3xi32>
    %92 = vector.shape_cast %91 : vector<1x1x3xi32> to vector<1x3xi32>
    %93 = arith.sitofp %92 : vector<1x3xi32> to vector<1x3xf32>
    %c24_76 = arith.constant 24 : index
    %c16_77 = arith.constant 16 : index
    %94 = vector.load %arg12[%c24_76, %c16_77] : memref<64x24xf32, #tpu.memory_space<vmem>>, vector<1x3xf32>
    tpu.vector_store %arg12[%c24_76, %c16_77], %93 {strides = array<i32>} : memref<64x24xf32, #tpu.memory_space<vmem>>, vector<1x3xf32>,
    %c1_78 = arith.constant 1 : index
    %c3_79 = arith.constant 3 : index
    %95 = memref.load %arg0[%c1_78, %c3_79] : memref<2x8xi32, #tpu.memory_space<smem>>
    %96 = arith.index_cast %95 : i32 to index
    %c0_80 = arith.constant 0 : index
    %c0_81 = arith.constant 0 : index
    %97 = vector.load %arg2[%96, %c0_80, %c0_81] : memref<51x1x16xf32, #tpu.memory_space<vmem>>, vector<1x1x16xf32>
    %98 = vector.shape_cast %97 : vector<1x1x16xf32> to vector<1x16xf32>
    %c25 = arith.constant 25 : index
    %c0_82 = arith.constant 0 : index
    %99 = vector.load %arg12[%c25, %c0_82] : memref<64x24xf32, #tpu.memory_space<vmem>>, vector<1x16xf32>
    tpu.vector_store %arg12[%c25, %c0_82], %98 {strides = array<i32>} : memref<64x24xf32, #tpu.memory_space<vmem>>, vector<1x16xf32>,
    %c1_83 = arith.constant 1 : index
    %c3_84 = arith.constant 3 : index
    %c0_85 = arith.constant 0 : index
    %100 = vector.load %arg1[%c1_83, %c3_84, %c0_85] : memref<2x8x3xi32, #tpu.memory_space<vmem>>, vector<1x1x3xi32>
    %101 = vector.shape_cast %100 : vector<1x1x3xi32> to vector<1x3xi32>
    %102 = arith.sitofp %101 : vector<1x3xi32> to vector<1x3xf32>
    %c25_86 = arith.constant 25 : index
    %c16_87 = arith.constant 16 : index
    %103 = vector.load %arg12[%c25_86, %c16_87] : memref<64x24xf32, #tpu.memory_space<vmem>>, vector<1x3xf32>
    tpu.vector_store %arg12[%c25_86, %c16_87], %102 {strides = array<i32>} : memref<64x24xf32, #tpu.memory_space<vmem>>, vector<1x3xf32>,
    %c0_88 = arith.constant 0 : index
    %c4 = arith.constant 4 : index
    %104 = memref.load %arg0[%c0_88, %c4] : memref<2x8xi32, #tpu.memory_space<smem>>
    %105 = arith.index_cast %104 : i32 to index
    %c0_89 = arith.constant 0 : index
    %c0_90 = arith.constant 0 : index
    %106 = vector.load %arg2[%105, %c0_89, %c0_90] : memref<51x1x16xf32, #tpu.memory_space<vmem>>, vector<1x1x16xf32>
    %107 = vector.shape_cast %106 : vector<1x1x16xf32> to vector<1x16xf32>
    %c32 = arith.constant 32 : index
    %c0_91 = arith.constant 0 : index
    %108 = vector.load %arg12[%c32, %c0_91] : memref<64x24xf32, #tpu.memory_space<vmem>>, vector<1x16xf32>
    tpu.vector_store %arg12[%c32, %c0_91], %107 {strides = array<i32>} : memref<64x24xf32, #tpu.memory_space<vmem>>, vector<1x16xf32>,
    %c0_92 = arith.constant 0 : index
    %c4_93 = arith.constant 4 : index
    %c0_94 = arith.constant 0 : index
    %109 = vector.load %arg1[%c0_92, %c4_93, %c0_94] : memref<2x8x3xi32, #tpu.memory_space<vmem>>, vector<1x1x3xi32>
    %110 = vector.shape_cast %109 : vector<1x1x3xi32> to vector<1x3xi32>
    %111 = arith.sitofp %110 : vector<1x3xi32> to vector<1x3xf32>
    %c32_95 = arith.constant 32 : index
    %c16_96 = arith.constant 16 : index
    %112 = vector.load %arg12[%c32_95, %c16_96] : memref<64x24xf32, #tpu.memory_space<vmem>>, vector<1x3xf32>
    tpu.vector_store %arg12[%c32_95, %c16_96], %111 {strides = array<i32>} : memref<64x24xf32, #tpu.memory_space<vmem>>, vector<1x3xf32>,
    %c1_97 = arith.constant 1 : index
    %c4_98 = arith.constant 4 : index
    %113 = memref.load %arg0[%c1_97, %c4_98] : memref<2x8xi32, #tpu.memory_space<smem>>
    %114 = arith.index_cast %113 : i32 to index
    %c0_99 = arith.constant 0 : index
    %c0_100 = arith.constant 0 : index
    %115 = vector.load %arg2[%114, %c0_99, %c0_100] : memref<51x1x16xf32, #tpu.memory_space<vmem>>, vector<1x1x16xf32>
    %116 = vector.shape_cast %115 : vector<1x1x16xf32> to vector<1x16xf32>
    %c33 = arith.constant 33 : index
    %c0_101 = arith.constant 0 : index
    %117 = vector.load %arg12[%c33, %c0_101] : memref<64x24xf32, #tpu.memory_space<vmem>>, vector<1x16xf32>
    tpu.vector_store %arg12[%c33, %c0_101], %116 {strides = array<i32>} : memref<64x24xf32, #tpu.memory_space<vmem>>, vector<1x16xf32>,
    %c1_102 = arith.constant 1 : index
    %c4_103 = arith.constant 4 : index
    %c0_104 = arith.constant 0 : index
    %118 = vector.load %arg1[%c1_102, %c4_103, %c0_104] : memref<2x8x3xi32, #tpu.memory_space<vmem>>, vector<1x1x3xi32>
    %119 = vector.shape_cast %118 : vector<1x1x3xi32> to vector<1x3xi32>
    %120 = arith.sitofp %119 : vector<1x3xi32> to vector<1x3xf32>
    %c33_105 = arith.constant 33 : index
    %c16_106 = arith.constant 16 : index
    %121 = vector.load %arg12[%c33_105, %c16_106] : memref<64x24xf32, #tpu.memory_space<vmem>>, vector<1x3xf32>
    tpu.vector_store %arg12[%c33_105, %c16_106], %120 {strides = array<i32>} : memref<64x24xf32, #tpu.memory_space<vmem>>, vector<1x3xf32>,
    %c0_107 = arith.constant 0 : index
    %c5 = arith.constant 5 : index
    %122 = memref.load %arg0[%c0_107, %c5] : memref<2x8xi32, #tpu.memory_space<smem>>
    %123 = arith.index_cast %122 : i32 to index
    %c0_108 = arith.constant 0 : index
    %c0_109 = arith.constant 0 : index
    %124 = vector.load %arg2[%123, %c0_108, %c0_109] : memref<51x1x16xf32, #tpu.memory_space<vmem>>, vector<1x1x16xf32>
    %125 = vector.shape_cast %124 : vector<1x1x16xf32> to vector<1x16xf32>
    %c40 = arith.constant 40 : index
    %c0_110 = arith.constant 0 : index
    %126 = vector.load %arg12[%c40, %c0_110] : memref<64x24xf32, #tpu.memory_space<vmem>>, vector<1x16xf32>
    tpu.vector_store %arg12[%c40, %c0_110], %125 {strides = array<i32>} : memref<64x24xf32, #tpu.memory_space<vmem>>, vector<1x16xf32>,
    %c0_111 = arith.constant 0 : index
    %c5_112 = arith.constant 5 : index
    %c0_113 = arith.constant 0 : index
    %127 = vector.load %arg1[%c0_111, %c5_112, %c0_113] : memref<2x8x3xi32, #tpu.memory_space<vmem>>, vector<1x1x3xi32>
    %128 = vector.shape_cast %127 : vector<1x1x3xi32> to vector<1x3xi32>
    %129 = arith.sitofp %128 : vector<1x3xi32> to vector<1x3xf32>
    %c40_114 = arith.constant 40 : index
    %c16_115 = arith.constant 16 : index
    %130 = vector.load %arg12[%c40_114, %c16_115] : memref<64x24xf32, #tpu.memory_space<vmem>>, vector<1x3xf32>
    tpu.vector_store %arg12[%c40_114, %c16_115], %129 {strides = array<i32>} : memref<64x24xf32, #tpu.memory_space<vmem>>, vector<1x3xf32>,
    %c1_116 = arith.constant 1 : index
    %c5_117 = arith.constant 5 : index
    %131 = memref.load %arg0[%c1_116, %c5_117] : memref<2x8xi32, #tpu.memory_space<smem>>
    %132 = arith.index_cast %131 : i32 to index
    %c0_118 = arith.constant 0 : index
    %c0_119 = arith.constant 0 : index
    %133 = vector.load %arg2[%132, %c0_118, %c0_119] : memref<51x1x16xf32, #tpu.memory_space<vmem>>, vector<1x1x16xf32>
    %134 = vector.shape_cast %133 : vector<1x1x16xf32> to vector<1x16xf32>
    %c41 = arith.constant 41 : index
    %c0_120 = arith.constant 0 : index
    %135 = vector.load %arg12[%c41, %c0_120] : memref<64x24xf32, #tpu.memory_space<vmem>>, vector<1x16xf32>
    tpu.vector_store %arg12[%c41, %c0_120], %134 {strides = array<i32>} : memref<64x24xf32, #tpu.memory_space<vmem>>, vector<1x16xf32>,
    %c1_121 = arith.constant 1 : index
    %c5_122 = arith.constant 5 : index
    %c0_123 = arith.constant 0 : index
    %136 = vector.load %arg1[%c1_121, %c5_122, %c0_123] : memref<2x8x3xi32, #tpu.memory_space<vmem>>, vector<1x1x3xi32>
    %137 = vector.shape_cast %136 : vector<1x1x3xi32> to vector<1x3xi32>
    %138 = arith.sitofp %137 : vector<1x3xi32> to vector<1x3xf32>
    %c41_124 = arith.constant 41 : index
    %c16_125 = arith.constant 16 : index
    %139 = vector.load %arg12[%c41_124, %c16_125] : memref<64x24xf32, #tpu.memory_space<vmem>>, vector<1x3xf32>
    tpu.vector_store %arg12[%c41_124, %c16_125], %138 {strides = array<i32>} : memref<64x24xf32, #tpu.memory_space<vmem>>, vector<1x3xf32>,
    %c0_126 = arith.constant 0 : index
    %c6 = arith.constant 6 : index
    %140 = memref.load %arg0[%c0_126, %c6] : memref<2x8xi32, #tpu.memory_space<smem>>
    %141 = arith.index_cast %140 : i32 to index
    %c0_127 = arith.constant 0 : index
    %c0_128 = arith.constant 0 : index
    %142 = vector.load %arg2[%141, %c0_127, %c0_128] : memref<51x1x16xf32, #tpu.memory_space<vmem>>, vector<1x1x16xf32>
    %143 = vector.shape_cast %142 : vector<1x1x16xf32> to vector<1x16xf32>
    %c48 = arith.constant 48 : index
    %c0_129 = arith.constant 0 : index
    %144 = vector.load %arg12[%c48, %c0_129] : memref<64x24xf32, #tpu.memory_space<vmem>>, vector<1x16xf32>
    tpu.vector_store %arg12[%c48, %c0_129], %143 {strides = array<i32>} : memref<64x24xf32, #tpu.memory_space<vmem>>, vector<1x16xf32>,
    %c0_130 = arith.constant 0 : index
    %c6_131 = arith.constant 6 : index
    %c0_132 = arith.constant 0 : index
    %145 = vector.load %arg1[%c0_130, %c6_131, %c0_132] : memref<2x8x3xi32, #tpu.memory_space<vmem>>, vector<1x1x3xi32>
    %146 = vector.shape_cast %145 : vector<1x1x3xi32> to vector<1x3xi32>
    %147 = arith.sitofp %146 : vector<1x3xi32> to vector<1x3xf32>
    %c48_133 = arith.constant 48 : index
    %c16_134 = arith.constant 16 : index
    %148 = vector.load %arg12[%c48_133, %c16_134] : memref<64x24xf32, #tpu.memory_space<vmem>>, vector<1x3xf32>
    tpu.vector_store %arg12[%c48_133, %c16_134], %147 {strides = array<i32>} : memref<64x24xf32, #tpu.memory_space<vmem>>, vector<1x3xf32>,
    %c1_135 = arith.constant 1 : index
    %c6_136 = arith.constant 6 : index
    %149 = memref.load %arg0[%c1_135, %c6_136] : memref<2x8xi32, #tpu.memory_space<smem>>
    %150 = arith.index_cast %149 : i32 to index
    %c0_137 = arith.constant 0 : index
    %c0_138 = arith.constant 0 : index
    %151 = vector.load %arg2[%150, %c0_137, %c0_138] : memref<51x1x16xf32, #tpu.memory_space<vmem>>, vector<1x1x16xf32>
    %152 = vector.shape_cast %151 : vector<1x1x16xf32> to vector<1x16xf32>
    %c49 = arith.constant 49 : index
    %c0_139 = arith.constant 0 : index
    %153 = vector.load %arg12[%c49, %c0_139] : memref<64x24xf32, #tpu.memory_space<vmem>>, vector<1x16xf32>
    tpu.vector_store %arg12[%c49, %c0_139], %152 {strides = array<i32>} : memref<64x24xf32, #tpu.memory_space<vmem>>, vector<1x16xf32>,
    %c1_140 = arith.constant 1 : index
    %c6_141 = arith.constant 6 : index
    %c0_142 = arith.constant 0 : index
    %154 = vector.load %arg1[%c1_140, %c6_141, %c0_142] : memref<2x8x3xi32, #tpu.memory_space<vmem>>, vector<1x1x3xi32>
    %155 = vector.shape_cast %154 : vector<1x1x3xi32> to vector<1x3xi32>
    %156 = arith.sitofp %155 : vector<1x3xi32> to vector<1x3xf32>
    %c49_143 = arith.constant 49 : index
    %c16_144 = arith.constant 16 : index
    %157 = vector.load %arg12[%c49_143, %c16_144] : memref<64x24xf32, #tpu.memory_space<vmem>>, vector<1x3xf32>
    tpu.vector_store %arg12[%c49_143, %c16_144], %156 {strides = array<i32>} : memref<64x24xf32, #tpu.memory_space<vmem>>, vector<1x3xf32>,
    %c0_145 = arith.constant 0 : index
    %c7 = arith.constant 7 : index
    %158 = memref.load %arg0[%c0_145, %c7] : memref<2x8xi32, #tpu.memory_space<smem>>
    %159 = arith.index_cast %158 : i32 to index
    %c0_146 = arith.constant 0 : index
    %c0_147 = arith.constant 0 : index
    %160 = vector.load %arg2[%159, %c0_146, %c0_147] : memref<51x1x16xf32, #tpu.memory_space<vmem>>, vector<1x1x16xf32>
    %161 = vector.shape_cast %160 : vector<1x1x16xf32> to vector<1x16xf32>
    %c56 = arith.constant 56 : index
    %c0_148 = arith.constant 0 : index
    %162 = vector.load %arg12[%c56, %c0_148] : memref<64x24xf32, #tpu.memory_space<vmem>>, vector<1x16xf32>
    tpu.vector_store %arg12[%c56, %c0_148], %161 {strides = array<i32>} : memref<64x24xf32, #tpu.memory_space<vmem>>, vector<1x16xf32>,
    %c0_149 = arith.constant 0 : index
    %c7_150 = arith.constant 7 : index
    %c0_151 = arith.constant 0 : index
    %163 = vector.load %arg1[%c0_149, %c7_150, %c0_151] : memref<2x8x3xi32, #tpu.memory_space<vmem>>, vector<1x1x3xi32>
    %164 = vector.shape_cast %163 : vector<1x1x3xi32> to vector<1x3xi32>
    %165 = arith.sitofp %164 : vector<1x3xi32> to vector<1x3xf32>
    %c56_152 = arith.constant 56 : index
    %c16_153 = arith.constant 16 : index
    %166 = vector.load %arg12[%c56_152, %c16_153] : memref<64x24xf32, #tpu.memory_space<vmem>>, vector<1x3xf32>
    tpu.vector_store %arg12[%c56_152, %c16_153], %165 {strides = array<i32>} : memref<64x24xf32, #tpu.memory_space<vmem>>, vector<1x3xf32>,
    %c1_154 = arith.constant 1 : index
    %c7_155 = arith.constant 7 : index
    %167 = memref.load %arg0[%c1_154, %c7_155] : memref<2x8xi32, #tpu.memory_space<smem>>
    %168 = arith.index_cast %167 : i32 to index
    %c0_156 = arith.constant 0 : index
    %c0_157 = arith.constant 0 : index
    %169 = vector.load %arg2[%168, %c0_156, %c0_157] : memref<51x1x16xf32, #tpu.memory_space<vmem>>, vector<1x1x16xf32>
    %170 = vector.shape_cast %169 : vector<1x1x16xf32> to vector<1x16xf32>
    %c57 = arith.constant 57 : index
    %c0_158 = arith.constant 0 : index
    %171 = vector.load %arg12[%c57, %c0_158] : memref<64x24xf32, #tpu.memory_space<vmem>>, vector<1x16xf32>
    tpu.vector_store %arg12[%c57, %c0_158], %170 {strides = array<i32>} : memref<64x24xf32, #tpu.memory_space<vmem>>, vector<1x16xf32>,
    %c1_159 = arith.constant 1 : index
    %c7_160 = arith.constant 7 : index
    %c0_161 = arith.constant 0 : index
    %172 = vector.load %arg1[%c1_159, %c7_160, %c0_161] : memref<2x8x3xi32, #tpu.memory_space<vmem>>, vector<1x1x3xi32>
    %173 = vector.shape_cast %172 : vector<1x1x3xi32> to vector<1x3xi32>
    %174 = arith.sitofp %173 : vector<1x3xi32> to vector<1x3xf32>
    %c57_162 = arith.constant 57 : index
    %c16_163 = arith.constant 16 : index
    %175 = vector.load %arg12[%c57_162, %c16_163] : memref<64x24xf32, #tpu.memory_space<vmem>>, vector<1x3xf32>
    tpu.vector_store %arg12[%c57_162, %c16_163], %174 {strides = array<i32>} : memref<64x24xf32, #tpu.memory_space<vmem>>, vector<1x3xf32>,
    %c0_164 = arith.constant 0 : index
    %c0_165 = arith.constant 0 : index
    %176 = vector.load %arg12[%c0_164, %c0_165] : memref<64x24xf32, #tpu.memory_space<vmem>>, vector<64x24xf32>
    %c0_166 = arith.constant 0 : index
    %c0_167 = arith.constant 0 : index
    %177 = vector.load %arg3[%c0_166, %c0_167] : memref<24x256xf32, #tpu.memory_space<vmem>>, vector<24x256xf32>
    %cst_168 = arith.constant dense<0.000000e+00> : vector<64x256xf32>
    %178 = tpu.matmul %176, %177, %cst_168 {dimension_numbers = #tpu.dot_dimension_numbers<[1], [0], [0], [1], [0, 0, 1, 1], [], []>} : vector<64x24xf32>, vector<24x256xf32>, vector<64x256xf32> -> vector<64x256xf32>
    %c0_169 = arith.constant 0 : index
    %c0_170 = arith.constant 0 : index
    %179 = vector.load %arg5[%c0_169, %c0_170] : memref<1x256xf32, #tpu.memory_space<vmem>>, vector<1x256xf32>
    %180 = vector.broadcast %179 : vector<1x256xf32> to vector<64x256xf32>
    %181 = arith.addf %178, %180 : vector<64x256xf32>
    %c0_171 = arith.constant 0 : index
    %c0_172 = arith.constant 0 : index
    %182 = vector.load %arg13[%c0_171, %c0_172] : memref<64x256xf32, #tpu.memory_space<vmem>>, vector<64x256xf32>
    tpu.vector_store %arg13[%c0_171, %c0_172], %181 {strides = array<i32>} : memref<64x256xf32, #tpu.memory_space<vmem>>, vector<64x256xf32>,
    %c0_173 = arith.constant 0 : index
    %c0_174 = arith.constant 0 : index
    %183 = vector.load %arg13[%c0_173, %c0_174] : memref<64x256xf32, #tpu.memory_space<vmem>>, vector<8x256xf32>
    %c56_175 = arith.constant 56 : index
    %c0_176 = arith.constant 0 : index
    %184 = vector.load %arg13[%c56_175, %c0_176] : memref<64x256xf32, #tpu.memory_space<vmem>>, vector<8x256xf32>
    %185 = arith.select %18, %183, %184 : vector<8x256xi1>, vector<8x256xf32>
    %c0_177 = arith.constant 0 : index
    %c0_178 = arith.constant 0 : index
    %186 = vector.load %arg13[%c0_177, %c0_178] : memref<64x256xf32, #tpu.memory_space<vmem>>, vector<8x256xf32>
    tpu.vector_store %arg13[%c0_177, %c0_178], %185 {strides = array<i32>} : memref<64x256xf32, #tpu.memory_space<vmem>>, vector<8x256xf32>,
    %187 = arith.select %18, %184, %183 : vector<8x256xi1>, vector<8x256xf32>
    %c56_179 = arith.constant 56 : index
    %c0_180 = arith.constant 0 : index
    %188 = vector.load %arg13[%c56_179, %c0_180] : memref<64x256xf32, #tpu.memory_space<vmem>>, vector<8x256xf32>
    tpu.vector_store %arg13[%c56_179, %c0_180], %187 {strides = array<i32>} : memref<64x256xf32, #tpu.memory_space<vmem>>, vector<8x256xf32>,
    %c8_181 = arith.constant 8 : index
    %c0_182 = arith.constant 0 : index
    %189 = vector.load %arg13[%c8_181, %c0_182] : memref<64x256xf32, #tpu.memory_space<vmem>>, vector<8x256xf32>
    %c48_183 = arith.constant 48 : index
    %c0_184 = arith.constant 0 : index
    %190 = vector.load %arg13[%c48_183, %c0_184] : memref<64x256xf32, #tpu.memory_space<vmem>>, vector<8x256xf32>
    %191 = arith.select %18, %189, %190 : vector<8x256xi1>, vector<8x256xf32>
    %c8_185 = arith.constant 8 : index
    %c0_186 = arith.constant 0 : index
    %192 = vector.load %arg13[%c8_185, %c0_186] : memref<64x256xf32, #tpu.memory_space<vmem>>, vector<8x256xf32>
    tpu.vector_store %arg13[%c8_185, %c0_186], %191 {strides = array<i32>} : memref<64x256xf32, #tpu.memory_space<vmem>>, vector<8x256xf32>,
    %193 = arith.select %18, %190, %189 : vector<8x256xi1>, vector<8x256xf32>
    %c48_187 = arith.constant 48 : index
    %c0_188 = arith.constant 0 : index
    %194 = vector.load %arg13[%c48_187, %c0_188] : memref<64x256xf32, #tpu.memory_space<vmem>>, vector<8x256xf32>
    tpu.vector_store %arg13[%c48_187, %c0_188], %193 {strides = array<i32>} : memref<64x256xf32, #tpu.memory_space<vmem>>, vector<8x256xf32>,
    %c16_189 = arith.constant 16 : index
    %c0_190 = arith.constant 0 : index
    %195 = vector.load %arg13[%c16_189, %c0_190] : memref<64x256xf32, #tpu.memory_space<vmem>>, vector<8x256xf32>
    %c40_191 = arith.constant 40 : index
    %c0_192 = arith.constant 0 : index
    %196 = vector.load %arg13[%c40_191, %c0_192] : memref<64x256xf32, #tpu.memory_space<vmem>>, vector<8x256xf32>
    %197 = arith.select %18, %195, %196 : vector<8x256xi1>, vector<8x256xf32>
    %c16_193 = arith.constant 16 : index
    %c0_194 = arith.constant 0 : index
    %198 = vector.load %arg13[%c16_193, %c0_194] : memref<64x256xf32, #tpu.memory_space<vmem>>, vector<8x256xf32>
    tpu.vector_store %arg13[%c16_193, %c0_194], %197 {strides = array<i32>} : memref<64x256xf32, #tpu.memory_space<vmem>>, vector<8x256xf32>,
    %199 = arith.select %18, %196, %195 : vector<8x256xi1>, vector<8x256xf32>
    %c40_195 = arith.constant 40 : index
    %c0_196 = arith.constant 0 : index
    %200 = vector.load %arg13[%c40_195, %c0_196] : memref<64x256xf32, #tpu.memory_space<vmem>>, vector<8x256xf32>
    tpu.vector_store %arg13[%c40_195, %c0_196], %199 {strides = array<i32>} : memref<64x256xf32, #tpu.memory_space<vmem>>, vector<8x256xf32>,
    %c24_197 = arith.constant 24 : index
    %c0_198 = arith.constant 0 : index
    %201 = vector.load %arg13[%c24_197, %c0_198] : memref<64x256xf32, #tpu.memory_space<vmem>>, vector<8x256xf32>
    %c32_199 = arith.constant 32 : index
    %c0_200 = arith.constant 0 : index
    %202 = vector.load %arg13[%c32_199, %c0_200] : memref<64x256xf32, #tpu.memory_space<vmem>>, vector<8x256xf32>
    %203 = arith.select %18, %201, %202 : vector<8x256xi1>, vector<8x256xf32>
    %c24_201 = arith.constant 24 : index
    %c0_202 = arith.constant 0 : index
    %204 = vector.load %arg13[%c24_201, %c0_202] : memref<64x256xf32, #tpu.memory_space<vmem>>, vector<8x256xf32>
    tpu.vector_store %arg13[%c24_201, %c0_202], %203 {strides = array<i32>} : memref<64x256xf32, #tpu.memory_space<vmem>>, vector<8x256xf32>,
    %205 = arith.select %18, %202, %201 : vector<8x256xi1>, vector<8x256xf32>
    %c32_203 = arith.constant 32 : index
    %c0_204 = arith.constant 0 : index
    %206 = vector.load %arg13[%c32_203, %c0_204] : memref<64x256xf32, #tpu.memory_space<vmem>>, vector<8x256xf32>
    tpu.vector_store %arg13[%c32_203, %c0_204], %205 {strides = array<i32>} : memref<64x256xf32, #tpu.memory_space<vmem>>, vector<8x256xf32>,
    %c0_205 = arith.constant 0 : index
    %c0_206 = arith.constant 0 : index
    %207 = vector.load %arg4[%c0_205, %c0_206] : memref<64x256xbf16, #tpu.memory_space<vmem>>, vector<64x256xbf16>
    %cst_207 = arith.constant 0.000000e+00 : f32
    %208 = vector.broadcast %cst_207 : f32 to vector<8x64xf32>
    %cst_208 = arith.constant 0.000000e+00 : f32
    %209 = vector.broadcast %cst_208 : f32 to vector<8x64xf32>
    %210 = arith.truncf %208 : vector<8x64xf32> to vector<8x64xbf16>
    %cst_209 = arith.constant dense<0.000000e+00> : vector<8x256xf32>
    %211 = tpu.matmul %210, %207, %cst_209 {dimension_numbers = #tpu.dot_dimension_numbers<[1], [0], [0], [1], [0, 0, 1, 1], [], []>} : vector<8x64xbf16>, vector<64x256xbf16>, vector<8x256xf32> -> vector<8x256xf32>
    %c0_210 = arith.constant 0 : index
    %c0_211 = arith.constant 0 : index
    %212 = vector.load %arg13[%c0_210, %c0_211] : memref<64x256xf32, #tpu.memory_space<vmem>>, vector<8x256xf32>
    %213 = arith.addf %211, %212 : vector<8x256xf32>
    %214 = arith.mulf %213, %23 : vector<8x256xf32>
    %215 = math.tanh %214 : vector<8x256xf32>
    %216 = arith.mulf %215, %23 : vector<8x256xf32>
    %217 = arith.addf %216, %26 : vector<8x256xf32>
    %218 = vector.extract_strided_slice %217 {offsets = [0, 0], sizes = [8, 64], strides = [1, 1]} : vector<8x256xf32> to vector<8x64xf32>
    %219 = vector.extract_strided_slice %217 {offsets = [0, 64], sizes = [8, 64], strides = [1, 1]} : vector<8x256xf32> to vector<8x64xf32>
    %220 = vector.extract_strided_slice %217 {offsets = [0, 128], sizes = [8, 64], strides = [1, 1]} : vector<8x256xf32> to vector<8x64xf32>
    %221 = vector.extract_strided_slice %217 {offsets = [0, 192], sizes = [8, 64], strides = [1, 1]} : vector<8x256xf32> to vector<8x64xf32>
    %222 = arith.mulf %219, %209 : vector<8x64xf32>
    %223 = arith.mulf %218, %221 : vector<8x64xf32>
    %224 = arith.addf %222, %223 : vector<8x64xf32>
    %225 = math.tanh %224 : vector<8x64xf32>
    %226 = arith.mulf %220, %225 : vector<8x64xf32>
    %c0_212 = arith.constant 0 : index
    %c0_213 = arith.constant 0 : index
    %227 = vector.load %arg14[%c0_212, %c0_213] : memref<64x64xf32, #tpu.memory_space<vmem>>, vector<8x64xf32>
    tpu.vector_store %arg14[%c0_212, %c0_213], %226 {strides = array<i32>} : memref<64x64xf32, #tpu.memory_space<vmem>>, vector<8x64xf32>,
    %228 = arith.truncf %226 : vector<8x64xf32> to vector<8x64xbf16>
    %cst_214 = arith.constant dense<0.000000e+00> : vector<8x256xf32>
    %229 = tpu.matmul %228, %207, %cst_214 {dimension_numbers = #tpu.dot_dimension_numbers<[1], [0], [0], [1], [0, 0, 1, 1], [], []>} : vector<8x64xbf16>, vector<64x256xbf16>, vector<8x256xf32> -> vector<8x256xf32>
    %c8_215 = arith.constant 8 : index
    %c0_216 = arith.constant 0 : index
    %230 = vector.load %arg13[%c8_215, %c0_216] : memref<64x256xf32, #tpu.memory_space<vmem>>, vector<8x256xf32>
    %231 = arith.addf %229, %230 : vector<8x256xf32>
    %232 = arith.mulf %231, %23 : vector<8x256xf32>
    %233 = math.tanh %232 : vector<8x256xf32>
    %234 = arith.mulf %233, %23 : vector<8x256xf32>
    %235 = arith.addf %234, %26 : vector<8x256xf32>
    %236 = vector.extract_strided_slice %235 {offsets = [0, 0], sizes = [8, 64], strides = [1, 1]} : vector<8x256xf32> to vector<8x64xf32>
    %237 = vector.extract_strided_slice %235 {offsets = [0, 64], sizes = [8, 64], strides = [1, 1]} : vector<8x256xf32> to vector<8x64xf32>
    %238 = vector.extract_strided_slice %235 {offsets = [0, 128], sizes = [8, 64], strides = [1, 1]} : vector<8x256xf32> to vector<8x64xf32>
    %239 = vector.extract_strided_slice %235 {offsets = [0, 192], sizes = [8, 64], strides = [1, 1]} : vector<8x256xf32> to vector<8x64xf32>
    %240 = arith.mulf %237, %224 : vector<8x64xf32>
    %241 = arith.mulf %236, %239 : vector<8x64xf32>
    %242 = arith.addf %240, %241 : vector<8x64xf32>
    %243 = math.tanh %242 : vector<8x64xf32>
    %244 = arith.mulf %238, %243 : vector<8x64xf32>
    %c8_217 = arith.constant 8 : index
    %c0_218 = arith.constant 0 : index
    %245 = vector.load %arg14[%c8_217, %c0_218] : memref<64x64xf32, #tpu.memory_space<vmem>>, vector<8x64xf32>
    tpu.vector_store %arg14[%c8_217, %c0_218], %244 {strides = array<i32>} : memref<64x64xf32, #tpu.memory_space<vmem>>, vector<8x64xf32>,
    %246 = arith.truncf %244 : vector<8x64xf32> to vector<8x64xbf16>
    %cst_219 = arith.constant dense<0.000000e+00> : vector<8x256xf32>
    %247 = tpu.matmul %246, %207, %cst_219 {dimension_numbers = #tpu.dot_dimension_numbers<[1], [0], [0], [1], [0, 0, 1, 1], [], []>} : vector<8x64xbf16>, vector<64x256xbf16>, vector<8x256xf32> -> vector<8x256xf32>
    %c16_220 = arith.constant 16 : index
    %c0_221 = arith.constant 0 : index
    %248 = vector.load %arg13[%c16_220, %c0_221] : memref<64x256xf32, #tpu.memory_space<vmem>>, vector<8x256xf32>
    %249 = arith.addf %247, %248 : vector<8x256xf32>
    %250 = arith.mulf %249, %23 : vector<8x256xf32>
    %251 = math.tanh %250 : vector<8x256xf32>
    %252 = arith.mulf %251, %23 : vector<8x256xf32>
    %253 = arith.addf %252, %26 : vector<8x256xf32>
    %254 = vector.extract_strided_slice %253 {offsets = [0, 0], sizes = [8, 64], strides = [1, 1]} : vector<8x256xf32> to vector<8x64xf32>
    %255 = vector.extract_strided_slice %253 {offsets = [0, 64], sizes = [8, 64], strides = [1, 1]} : vector<8x256xf32> to vector<8x64xf32>
    %256 = vector.extract_strided_slice %253 {offsets = [0, 128], sizes = [8, 64], strides = [1, 1]} : vector<8x256xf32> to vector<8x64xf32>
    %257 = vector.extract_strided_slice %253 {offsets = [0, 192], sizes = [8, 64], strides = [1, 1]} : vector<8x256xf32> to vector<8x64xf32>
    %258 = arith.mulf %255, %242 : vector<8x64xf32>
    %259 = arith.mulf %254, %257 : vector<8x64xf32>
    %260 = arith.addf %258, %259 : vector<8x64xf32>
    %261 = math.tanh %260 : vector<8x64xf32>
    %262 = arith.mulf %256, %261 : vector<8x64xf32>
    %c16_222 = arith.constant 16 : index
    %c0_223 = arith.constant 0 : index
    %263 = vector.load %arg14[%c16_222, %c0_223] : memref<64x64xf32, #tpu.memory_space<vmem>>, vector<8x64xf32>
    tpu.vector_store %arg14[%c16_222, %c0_223], %262 {strides = array<i32>} : memref<64x64xf32, #tpu.memory_space<vmem>>, vector<8x64xf32>,
    %264 = arith.truncf %262 : vector<8x64xf32> to vector<8x64xbf16>
    %cst_224 = arith.constant dense<0.000000e+00> : vector<8x256xf32>
    %265 = tpu.matmul %264, %207, %cst_224 {dimension_numbers = #tpu.dot_dimension_numbers<[1], [0], [0], [1], [0, 0, 1, 1], [], []>} : vector<8x64xbf16>, vector<64x256xbf16>, vector<8x256xf32> -> vector<8x256xf32>
    %c24_225 = arith.constant 24 : index
    %c0_226 = arith.constant 0 : index
    %266 = vector.load %arg13[%c24_225, %c0_226] : memref<64x256xf32, #tpu.memory_space<vmem>>, vector<8x256xf32>
    %267 = arith.addf %265, %266 : vector<8x256xf32>
    %268 = arith.mulf %267, %23 : vector<8x256xf32>
    %269 = math.tanh %268 : vector<8x256xf32>
    %270 = arith.mulf %269, %23 : vector<8x256xf32>
    %271 = arith.addf %270, %26 : vector<8x256xf32>
    %272 = vector.extract_strided_slice %271 {offsets = [0, 0], sizes = [8, 64], strides = [1, 1]} : vector<8x256xf32> to vector<8x64xf32>
    %273 = vector.extract_strided_slice %271 {offsets = [0, 64], sizes = [8, 64], strides = [1, 1]} : vector<8x256xf32> to vector<8x64xf32>
    %274 = vector.extract_strided_slice %271 {offsets = [0, 128], sizes = [8, 64], strides = [1, 1]} : vector<8x256xf32> to vector<8x64xf32>
    %275 = vector.extract_strided_slice %271 {offsets = [0, 192], sizes = [8, 64], strides = [1, 1]} : vector<8x256xf32> to vector<8x64xf32>
    %276 = arith.mulf %273, %260 : vector<8x64xf32>
    %277 = arith.mulf %272, %275 : vector<8x64xf32>
    %278 = arith.addf %276, %277 : vector<8x64xf32>
    %279 = math.tanh %278 : vector<8x64xf32>
    %280 = arith.mulf %274, %279 : vector<8x64xf32>
    %c24_227 = arith.constant 24 : index
    %c0_228 = arith.constant 0 : index
    %281 = vector.load %arg14[%c24_227, %c0_228] : memref<64x64xf32, #tpu.memory_space<vmem>>, vector<8x64xf32>
    tpu.vector_store %arg14[%c24_227, %c0_228], %280 {strides = array<i32>} : memref<64x64xf32, #tpu.memory_space<vmem>>, vector<8x64xf32>,
    %282 = arith.truncf %280 : vector<8x64xf32> to vector<8x64xbf16>
    %cst_229 = arith.constant dense<0.000000e+00> : vector<8x256xf32>
    %283 = tpu.matmul %282, %207, %cst_229 {dimension_numbers = #tpu.dot_dimension_numbers<[1], [0], [0], [1], [0, 0, 1, 1], [], []>} : vector<8x64xbf16>, vector<64x256xbf16>, vector<8x256xf32> -> vector<8x256xf32>
    %c32_230 = arith.constant 32 : index
    %c0_231 = arith.constant 0 : index
    %284 = vector.load %arg13[%c32_230, %c0_231] : memref<64x256xf32, #tpu.memory_space<vmem>>, vector<8x256xf32>
    %285 = arith.addf %283, %284 : vector<8x256xf32>
    %286 = arith.mulf %285, %23 : vector<8x256xf32>
    %287 = math.tanh %286 : vector<8x256xf32>
    %288 = arith.mulf %287, %23 : vector<8x256xf32>
    %289 = arith.addf %288, %26 : vector<8x256xf32>
    %290 = vector.extract_strided_slice %289 {offsets = [0, 0], sizes = [8, 64], strides = [1, 1]} : vector<8x256xf32> to vector<8x64xf32>
    %291 = vector.extract_strided_slice %289 {offsets = [0, 64], sizes = [8, 64], strides = [1, 1]} : vector<8x256xf32> to vector<8x64xf32>
    %292 = vector.extract_strided_slice %289 {offsets = [0, 128], sizes = [8, 64], strides = [1, 1]} : vector<8x256xf32> to vector<8x64xf32>
    %293 = vector.extract_strided_slice %289 {offsets = [0, 192], sizes = [8, 64], strides = [1, 1]} : vector<8x256xf32> to vector<8x64xf32>
    %294 = arith.mulf %291, %278 : vector<8x64xf32>
    %295 = arith.mulf %290, %293 : vector<8x64xf32>
    %296 = arith.addf %294, %295 : vector<8x64xf32>
    %297 = math.tanh %296 : vector<8x64xf32>
    %298 = arith.mulf %292, %297 : vector<8x64xf32>
    %c32_232 = arith.constant 32 : index
    %c0_233 = arith.constant 0 : index
    %299 = vector.load %arg14[%c32_232, %c0_233] : memref<64x64xf32, #tpu.memory_space<vmem>>, vector<8x64xf32>
    tpu.vector_store %arg14[%c32_232, %c0_233], %298 {strides = array<i32>} : memref<64x64xf32, #tpu.memory_space<vmem>>, vector<8x64xf32>,
    %300 = arith.truncf %298 : vector<8x64xf32> to vector<8x64xbf16>
    %cst_234 = arith.constant dense<0.000000e+00> : vector<8x256xf32>
    %301 = tpu.matmul %300, %207, %cst_234 {dimension_numbers = #tpu.dot_dimension_numbers<[1], [0], [0], [1], [0, 0, 1, 1], [], []>} : vector<8x64xbf16>, vector<64x256xbf16>, vector<8x256xf32> -> vector<8x256xf32>
    %c40_235 = arith.constant 40 : index
    %c0_236 = arith.constant 0 : index
    %302 = vector.load %arg13[%c40_235, %c0_236] : memref<64x256xf32, #tpu.memory_space<vmem>>, vector<8x256xf32>
    %303 = arith.addf %301, %302 : vector<8x256xf32>
    %304 = arith.mulf %303, %23 : vector<8x256xf32>
    %305 = math.tanh %304 : vector<8x256xf32>
    %306 = arith.mulf %305, %23 : vector<8x256xf32>
    %307 = arith.addf %306, %26 : vector<8x256xf32>
    %308 = vector.extract_strided_slice %307 {offsets = [0, 0], sizes = [8, 64], strides = [1, 1]} : vector<8x256xf32> to vector<8x64xf32>
    %309 = vector.extract_strided_slice %307 {offsets = [0, 64], sizes = [8, 64], strides = [1, 1]} : vector<8x256xf32> to vector<8x64xf32>
    %310 = vector.extract_strided_slice %307 {offsets = [0, 128], sizes = [8, 64], strides = [1, 1]} : vector<8x256xf32> to vector<8x64xf32>
    %311 = vector.extract_strided_slice %307 {offsets = [0, 192], sizes = [8, 64], strides = [1, 1]} : vector<8x256xf32> to vector<8x64xf32>
    %312 = arith.mulf %309, %296 : vector<8x64xf32>
    %313 = arith.mulf %308, %311 : vector<8x64xf32>
    %314 = arith.addf %312, %313 : vector<8x64xf32>
    %315 = math.tanh %314 : vector<8x64xf32>
    %316 = arith.mulf %310, %315 : vector<8x64xf32>
    %c40_237 = arith.constant 40 : index
    %c0_238 = arith.constant 0 : index
    %317 = vector.load %arg14[%c40_237, %c0_238] : memref<64x64xf32, #tpu.memory_space<vmem>>, vector<8x64xf32>
    tpu.vector_store %arg14[%c40_237, %c0_238], %316 {strides = array<i32>} : memref<64x64xf32, #tpu.memory_space<vmem>>, vector<8x64xf32>,
    %318 = arith.truncf %316 : vector<8x64xf32> to vector<8x64xbf16>
    %cst_239 = arith.constant dense<0.000000e+00> : vector<8x256xf32>
    %319 = tpu.matmul %318, %207, %cst_239 {dimension_numbers = #tpu.dot_dimension_numbers<[1], [0], [0], [1], [0, 0, 1, 1], [], []>} : vector<8x64xbf16>, vector<64x256xbf16>, vector<8x256xf32> -> vector<8x256xf32>
    %c48_240 = arith.constant 48 : index
    %c0_241 = arith.constant 0 : index
    %320 = vector.load %arg13[%c48_240, %c0_241] : memref<64x256xf32, #tpu.memory_space<vmem>>, vector<8x256xf32>
    %321 = arith.addf %319, %320 : vector<8x256xf32>
    %322 = arith.mulf %321, %23 : vector<8x256xf32>
    %323 = math.tanh %322 : vector<8x256xf32>
    %324 = arith.mulf %323, %23 : vector<8x256xf32>
    %325 = arith.addf %324, %26 : vector<8x256xf32>
    %326 = vector.extract_strided_slice %325 {offsets = [0, 0], sizes = [8, 64], strides = [1, 1]} : vector<8x256xf32> to vector<8x64xf32>
    %327 = vector.extract_strided_slice %325 {offsets = [0, 64], sizes = [8, 64], strides = [1, 1]} : vector<8x256xf32> to vector<8x64xf32>
    %328 = vector.extract_strided_slice %325 {offsets = [0, 128], sizes = [8, 64], strides = [1, 1]} : vector<8x256xf32> to vector<8x64xf32>
    %329 = vector.extract_strided_slice %325 {offsets = [0, 192], sizes = [8, 64], strides = [1, 1]} : vector<8x256xf32> to vector<8x64xf32>
    %330 = arith.mulf %327, %314 : vector<8x64xf32>
    %331 = arith.mulf %326, %329 : vector<8x64xf32>
    %332 = arith.addf %330, %331 : vector<8x64xf32>
    %333 = math.tanh %332 : vector<8x64xf32>
    %334 = arith.mulf %328, %333 : vector<8x64xf32>
    %c48_242 = arith.constant 48 : index
    %c0_243 = arith.constant 0 : index
    %335 = vector.load %arg14[%c48_242, %c0_243] : memref<64x64xf32, #tpu.memory_space<vmem>>, vector<8x64xf32>
    tpu.vector_store %arg14[%c48_242, %c0_243], %334 {strides = array<i32>} : memref<64x64xf32, #tpu.memory_space<vmem>>, vector<8x64xf32>,
    %336 = arith.truncf %334 : vector<8x64xf32> to vector<8x64xbf16>
    %cst_244 = arith.constant dense<0.000000e+00> : vector<8x256xf32>
    %337 = tpu.matmul %336, %207, %cst_244 {dimension_numbers = #tpu.dot_dimension_numbers<[1], [0], [0], [1], [0, 0, 1, 1], [], []>} : vector<8x64xbf16>, vector<64x256xbf16>, vector<8x256xf32> -> vector<8x256xf32>
    %c56_245 = arith.constant 56 : index
    %c0_246 = arith.constant 0 : index
    %338 = vector.load %arg13[%c56_245, %c0_246] : memref<64x256xf32, #tpu.memory_space<vmem>>, vector<8x256xf32>
    %339 = arith.addf %337, %338 : vector<8x256xf32>
    %340 = arith.mulf %339, %23 : vector<8x256xf32>
    %341 = math.tanh %340 : vector<8x256xf32>
    %342 = arith.mulf %341, %23 : vector<8x256xf32>
    %343 = arith.addf %342, %26 : vector<8x256xf32>
    %344 = vector.extract_strided_slice %343 {offsets = [0, 0], sizes = [8, 64], strides = [1, 1]} : vector<8x256xf32> to vector<8x64xf32>
    %345 = vector.extract_strided_slice %343 {offsets = [0, 64], sizes = [8, 64], strides = [1, 1]} : vector<8x256xf32> to vector<8x64xf32>
    %346 = vector.extract_strided_slice %343 {offsets = [0, 128], sizes = [8, 64], strides = [1, 1]} : vector<8x256xf32> to vector<8x64xf32>
    %347 = vector.extract_strided_slice %343 {offsets = [0, 192], sizes = [8, 64], strides = [1, 1]} : vector<8x256xf32> to vector<8x64xf32>
    %348 = arith.mulf %345, %332 : vector<8x64xf32>
    %349 = arith.mulf %344, %347 : vector<8x64xf32>
    %350 = arith.addf %348, %349 : vector<8x64xf32>
    %351 = math.tanh %350 : vector<8x64xf32>
    %352 = arith.mulf %346, %351 : vector<8x64xf32>
    %c56_247 = arith.constant 56 : index
    %c0_248 = arith.constant 0 : index
    %353 = vector.load %arg14[%c56_247, %c0_248] : memref<64x64xf32, #tpu.memory_space<vmem>>, vector<8x64xf32>
    tpu.vector_store %arg14[%c56_247, %c0_248], %352 {strides = array<i32>} : memref<64x64xf32, #tpu.memory_space<vmem>>, vector<8x64xf32>,
    %c0_249 = arith.constant 0 : index
    %c0_250 = arith.constant 0 : index
    %354 = vector.load %arg14[%c0_249, %c0_250] : memref<64x64xf32, #tpu.memory_space<vmem>>, vector<8x64xf32>
    %c56_251 = arith.constant 56 : index
    %c0_252 = arith.constant 0 : index
    %355 = vector.load %arg14[%c56_251, %c0_252] : memref<64x64xf32, #tpu.memory_space<vmem>>, vector<8x64xf32>
    %356 = arith.select %29, %354, %355 : vector<8x64xi1>, vector<8x64xf32>
    %c0_253 = arith.constant 0 : index
    %c0_254 = arith.constant 0 : index
    %357 = vector.load %arg14[%c0_253, %c0_254] : memref<64x64xf32, #tpu.memory_space<vmem>>, vector<8x64xf32>
    tpu.vector_store %arg14[%c0_253, %c0_254], %356 {strides = array<i32>} : memref<64x64xf32, #tpu.memory_space<vmem>>, vector<8x64xf32>,
    %358 = arith.select %29, %355, %354 : vector<8x64xi1>, vector<8x64xf32>
    %c56_255 = arith.constant 56 : index
    %c0_256 = arith.constant 0 : index
    %359 = vector.load %arg14[%c56_255, %c0_256] : memref<64x64xf32, #tpu.memory_space<vmem>>, vector<8x64xf32>
    tpu.vector_store %arg14[%c56_255, %c0_256], %358 {strides = array<i32>} : memref<64x64xf32, #tpu.memory_space<vmem>>, vector<8x64xf32>,
    %c8_257 = arith.constant 8 : index
    %c0_258 = arith.constant 0 : index
    %360 = vector.load %arg14[%c8_257, %c0_258] : memref<64x64xf32, #tpu.memory_space<vmem>>, vector<8x64xf32>
    %c48_259 = arith.constant 48 : index
    %c0_260 = arith.constant 0 : index
    %361 = vector.load %arg14[%c48_259, %c0_260] : memref<64x64xf32, #tpu.memory_space<vmem>>, vector<8x64xf32>
    %362 = arith.select %29, %360, %361 : vector<8x64xi1>, vector<8x64xf32>
    %c8_261 = arith.constant 8 : index
    %c0_262 = arith.constant 0 : index
    %363 = vector.load %arg14[%c8_261, %c0_262] : memref<64x64xf32, #tpu.memory_space<vmem>>, vector<8x64xf32>
    tpu.vector_store %arg14[%c8_261, %c0_262], %362 {strides = array<i32>} : memref<64x64xf32, #tpu.memory_space<vmem>>, vector<8x64xf32>,
    %364 = arith.select %29, %361, %360 : vector<8x64xi1>, vector<8x64xf32>
    %c48_263 = arith.constant 48 : index
    %c0_264 = arith.constant 0 : index
    %365 = vector.load %arg14[%c48_263, %c0_264] : memref<64x64xf32, #tpu.memory_space<vmem>>, vector<8x64xf32>
    tpu.vector_store %arg14[%c48_263, %c0_264], %364 {strides = array<i32>} : memref<64x64xf32, #tpu.memory_space<vmem>>, vector<8x64xf32>,
    %c16_265 = arith.constant 16 : index
    %c0_266 = arith.constant 0 : index
    %366 = vector.load %arg14[%c16_265, %c0_266] : memref<64x64xf32, #tpu.memory_space<vmem>>, vector<8x64xf32>
    %c40_267 = arith.constant 40 : index
    %c0_268 = arith.constant 0 : index
    %367 = vector.load %arg14[%c40_267, %c0_268] : memref<64x64xf32, #tpu.memory_space<vmem>>, vector<8x64xf32>
    %368 = arith.select %29, %366, %367 : vector<8x64xi1>, vector<8x64xf32>
    %c16_269 = arith.constant 16 : index
    %c0_270 = arith.constant 0 : index
    %369 = vector.load %arg14[%c16_269, %c0_270] : memref<64x64xf32, #tpu.memory_space<vmem>>, vector<8x64xf32>
    tpu.vector_store %arg14[%c16_269, %c0_270], %368 {strides = array<i32>} : memref<64x64xf32, #tpu.memory_space<vmem>>, vector<8x64xf32>,
    %370 = arith.select %29, %367, %366 : vector<8x64xi1>, vector<8x64xf32>
    %c40_271 = arith.constant 40 : index
    %c0_272 = arith.constant 0 : index
    %371 = vector.load %arg14[%c40_271, %c0_272] : memref<64x64xf32, #tpu.memory_space<vmem>>, vector<8x64xf32>
    tpu.vector_store %arg14[%c40_271, %c0_272], %370 {strides = array<i32>} : memref<64x64xf32, #tpu.memory_space<vmem>>, vector<8x64xf32>,
    %c24_273 = arith.constant 24 : index
    %c0_274 = arith.constant 0 : index
    %372 = vector.load %arg14[%c24_273, %c0_274] : memref<64x64xf32, #tpu.memory_space<vmem>>, vector<8x64xf32>
    %c32_275 = arith.constant 32 : index
    %c0_276 = arith.constant 0 : index
    %373 = vector.load %arg14[%c32_275, %c0_276] : memref<64x64xf32, #tpu.memory_space<vmem>>, vector<8x64xf32>
    %374 = arith.select %29, %372, %373 : vector<8x64xi1>, vector<8x64xf32>
    %c24_277 = arith.constant 24 : index
    %c0_278 = arith.constant 0 : index
    %375 = vector.load %arg14[%c24_277, %c0_278] : memref<64x64xf32, #tpu.memory_space<vmem>>, vector<8x64xf32>
    tpu.vector_store %arg14[%c24_277, %c0_278], %374 {strides = array<i32>} : memref<64x64xf32, #tpu.memory_space<vmem>>, vector<8x64xf32>,
    %376 = arith.select %29, %373, %372 : vector<8x64xi1>, vector<8x64xf32>
    %c32_279 = arith.constant 32 : index
    %c0_280 = arith.constant 0 : index
    %377 = vector.load %arg14[%c32_279, %c0_280] : memref<64x64xf32, #tpu.memory_space<vmem>>, vector<8x64xf32>
    tpu.vector_store %arg14[%c32_279, %c0_280], %376 {strides = array<i32>} : memref<64x64xf32, #tpu.memory_space<vmem>>, vector<8x64xf32>,
    %c0_281 = arith.constant 0 : index
    %c0_282 = arith.constant 0 : index
    %378 = vector.load %arg14[%c0_281, %c0_282] : memref<64x64xf32, #tpu.memory_space<vmem>>, vector<64x64xf32>
    %c0_283 = arith.constant 0 : index
    %c0_284 = arith.constant 0 : index
    %379 = vector.load %arg6[%c0_283, %c0_284] : memref<64x256xf32, #tpu.memory_space<vmem>>, vector<64x256xf32>
    %cst_285 = arith.constant dense<0.000000e+00> : vector<64x256xf32>
    %380 = tpu.matmul %378, %379, %cst_285 {dimension_numbers = #tpu.dot_dimension_numbers<[1], [0], [0], [1], [0, 0, 1, 1], [], []>} : vector<64x64xf32>, vector<64x256xf32>, vector<64x256xf32> -> vector<64x256xf32>
    %c0_286 = arith.constant 0 : index
    %c0_287 = arith.constant 0 : index
    %381 = vector.load %arg8[%c0_286, %c0_287] : memref<1x256xf32, #tpu.memory_space<vmem>>, vector<1x256xf32>
    %382 = vector.broadcast %381 : vector<1x256xf32> to vector<64x256xf32>
    %383 = arith.addf %380, %382 : vector<64x256xf32>
    %c0_288 = arith.constant 0 : index
    %c0_289 = arith.constant 0 : index
    %384 = vector.load %arg13[%c0_288, %c0_289] : memref<64x256xf32, #tpu.memory_space<vmem>>, vector<64x256xf32>
    tpu.vector_store %arg13[%c0_288, %c0_289], %383 {strides = array<i32>} : memref<64x256xf32, #tpu.memory_space<vmem>>, vector<64x256xf32>,
    %c0_290 = arith.constant 0 : index
    %c0_291 = arith.constant 0 : index
    %385 = vector.load %arg13[%c0_290, %c0_291] : memref<64x256xf32, #tpu.memory_space<vmem>>, vector<8x256xf32>
    %c56_292 = arith.constant 56 : index
    %c0_293 = arith.constant 0 : index
    %386 = vector.load %arg13[%c56_292, %c0_293] : memref<64x256xf32, #tpu.memory_space<vmem>>, vector<8x256xf32>
    %387 = arith.select %18, %385, %386 : vector<8x256xi1>, vector<8x256xf32>
    %c0_294 = arith.constant 0 : index
    %c0_295 = arith.constant 0 : index
    %388 = vector.load %arg13[%c0_294, %c0_295] : memref<64x256xf32, #tpu.memory_space<vmem>>, vector<8x256xf32>
    tpu.vector_store %arg13[%c0_294, %c0_295], %387 {strides = array<i32>} : memref<64x256xf32, #tpu.memory_space<vmem>>, vector<8x256xf32>,
    %389 = arith.select %18, %386, %385 : vector<8x256xi1>, vector<8x256xf32>
    %c56_296 = arith.constant 56 : index
    %c0_297 = arith.constant 0 : index
    %390 = vector.load %arg13[%c56_296, %c0_297] : memref<64x256xf32, #tpu.memory_space<vmem>>, vector<8x256xf32>
    tpu.vector_store %arg13[%c56_296, %c0_297], %389 {strides = array<i32>} : memref<64x256xf32, #tpu.memory_space<vmem>>, vector<8x256xf32>,
    %c8_298 = arith.constant 8 : index
    %c0_299 = arith.constant 0 : index
    %391 = vector.load %arg13[%c8_298, %c0_299] : memref<64x256xf32, #tpu.memory_space<vmem>>, vector<8x256xf32>
    %c48_300 = arith.constant 48 : index
    %c0_301 = arith.constant 0 : index
    %392 = vector.load %arg13[%c48_300, %c0_301] : memref<64x256xf32, #tpu.memory_space<vmem>>, vector<8x256xf32>
    %393 = arith.select %18, %391, %392 : vector<8x256xi1>, vector<8x256xf32>
    %c8_302 = arith.constant 8 : index
    %c0_303 = arith.constant 0 : index
    %394 = vector.load %arg13[%c8_302, %c0_303] : memref<64x256xf32, #tpu.memory_space<vmem>>, vector<8x256xf32>
    tpu.vector_store %arg13[%c8_302, %c0_303], %393 {strides = array<i32>} : memref<64x256xf32, #tpu.memory_space<vmem>>, vector<8x256xf32>,
    %395 = arith.select %18, %392, %391 : vector<8x256xi1>, vector<8x256xf32>
    %c48_304 = arith.constant 48 : index
    %c0_305 = arith.constant 0 : index
    %396 = vector.load %arg13[%c48_304, %c0_305] : memref<64x256xf32, #tpu.memory_space<vmem>>, vector<8x256xf32>
    tpu.vector_store %arg13[%c48_304, %c0_305], %395 {strides = array<i32>} : memref<64x256xf32, #tpu.memory_space<vmem>>, vector<8x256xf32>,
    %c16_306 = arith.constant 16 : index
    %c0_307 = arith.constant 0 : index
    %397 = vector.load %arg13[%c16_306, %c0_307] : memref<64x256xf32, #tpu.memory_space<vmem>>, vector<8x256xf32>
    %c40_308 = arith.constant 40 : index
    %c0_309 = arith.constant 0 : index
    %398 = vector.load %arg13[%c40_308, %c0_309] : memref<64x256xf32, #tpu.memory_space<vmem>>, vector<8x256xf32>
    %399 = arith.select %18, %397, %398 : vector<8x256xi1>, vector<8x256xf32>
    %c16_310 = arith.constant 16 : index
    %c0_311 = arith.constant 0 : index
    %400 = vector.load %arg13[%c16_310, %c0_311] : memref<64x256xf32, #tpu.memory_space<vmem>>, vector<8x256xf32>
    tpu.vector_store %arg13[%c16_310, %c0_311], %399 {strides = array<i32>} : memref<64x256xf32, #tpu.memory_space<vmem>>, vector<8x256xf32>,
    %401 = arith.select %18, %398, %397 : vector<8x256xi1>, vector<8x256xf32>
    %c40_312 = arith.constant 40 : index
    %c0_313 = arith.constant 0 : index
    %402 = vector.load %arg13[%c40_312, %c0_313] : memref<64x256xf32, #tpu.memory_space<vmem>>, vector<8x256xf32>
    tpu.vector_store %arg13[%c40_312, %c0_313], %401 {strides = array<i32>} : memref<64x256xf32, #tpu.memory_space<vmem>>, vector<8x256xf32>,
    %c24_314 = arith.constant 24 : index
    %c0_315 = arith.constant 0 : index
    %403 = vector.load %arg13[%c24_314, %c0_315] : memref<64x256xf32, #tpu.memory_space<vmem>>, vector<8x256xf32>
    %c32_316 = arith.constant 32 : index
    %c0_317 = arith.constant 0 : index
    %404 = vector.load %arg13[%c32_316, %c0_317] : memref<64x256xf32, #tpu.memory_space<vmem>>, vector<8x256xf32>
    %405 = arith.select %18, %403, %404 : vector<8x256xi1>, vector<8x256xf32>
    %c24_318 = arith.constant 24 : index
    %c0_319 = arith.constant 0 : index
    %406 = vector.load %arg13[%c24_318, %c0_319] : memref<64x256xf32, #tpu.memory_space<vmem>>, vector<8x256xf32>
    tpu.vector_store %arg13[%c24_318, %c0_319], %405 {strides = array<i32>} : memref<64x256xf32, #tpu.memory_space<vmem>>, vector<8x256xf32>,
    %407 = arith.select %18, %404, %403 : vector<8x256xi1>, vector<8x256xf32>
    %c32_320 = arith.constant 32 : index
    %c0_321 = arith.constant 0 : index
    %408 = vector.load %arg13[%c32_320, %c0_321] : memref<64x256xf32, #tpu.memory_space<vmem>>, vector<8x256xf32>
    tpu.vector_store %arg13[%c32_320, %c0_321], %407 {strides = array<i32>} : memref<64x256xf32, #tpu.memory_space<vmem>>, vector<8x256xf32>,
    %c0_322 = arith.constant 0 : index
    %c0_323 = arith.constant 0 : index
    %409 = vector.load %arg7[%c0_322, %c0_323] : memref<64x256xbf16, #tpu.memory_space<vmem>>, vector<64x256xbf16>
    %cst_324 = arith.constant 0.000000e+00 : f32
    %410 = vector.broadcast %cst_324 : f32 to vector<8x64xf32>
    %cst_325 = arith.constant 0.000000e+00 : f32
    %411 = vector.broadcast %cst_325 : f32 to vector<8x64xf32>
    %412 = arith.truncf %410 : vector<8x64xf32> to vector<8x64xbf16>
    %cst_326 = arith.constant dense<0.000000e+00> : vector<8x256xf32>
    %413 = tpu.matmul %412, %409, %cst_326 {dimension_numbers = #tpu.dot_dimension_numbers<[1], [0], [0], [1], [0, 0, 1, 1], [], []>} : vector<8x64xbf16>, vector<64x256xbf16>, vector<8x256xf32> -> vector<8x256xf32>
    %c0_327 = arith.constant 0 : index
    %c0_328 = arith.constant 0 : index
    %414 = vector.load %arg13[%c0_327, %c0_328] : memref<64x256xf32, #tpu.memory_space<vmem>>, vector<8x256xf32>
    %415 = arith.addf %413, %414 : vector<8x256xf32>
    %416 = arith.mulf %415, %23 : vector<8x256xf32>
    %417 = math.tanh %416 : vector<8x256xf32>
    %418 = arith.mulf %417, %23 : vector<8x256xf32>
    %419 = arith.addf %418, %26 : vector<8x256xf32>
    %420 = vector.extract_strided_slice %419 {offsets = [0, 0], sizes = [8, 64], strides = [1, 1]} : vector<8x256xf32> to vector<8x64xf32>
    %421 = vector.extract_strided_slice %419 {offsets = [0, 64], sizes = [8, 64], strides = [1, 1]} : vector<8x256xf32> to vector<8x64xf32>
    %422 = vector.extract_strided_slice %419 {offsets = [0, 128], sizes = [8, 64], strides = [1, 1]} : vector<8x256xf32> to vector<8x64xf32>
    %423 = vector.extract_strided_slice %419 {offsets = [0, 192], sizes = [8, 64], strides = [1, 1]} : vector<8x256xf32> to vector<8x64xf32>
    %424 = arith.mulf %421, %411 : vector<8x64xf32>
    %425 = arith.mulf %420, %423 : vector<8x64xf32>
    %426 = arith.addf %424, %425 : vector<8x64xf32>
    %427 = math.tanh %426 : vector<8x64xf32>
    %428 = arith.mulf %422, %427 : vector<8x64xf32>
    %c0_329 = arith.constant 0 : index
    %c0_330 = arith.constant 0 : index
    %429 = vector.load %arg15[%c0_329, %c0_330] : memref<64x64xf32, #tpu.memory_space<vmem>>, vector<8x64xf32>
    tpu.vector_store %arg15[%c0_329, %c0_330], %428 {strides = array<i32>} : memref<64x64xf32, #tpu.memory_space<vmem>>, vector<8x64xf32>,
    %430 = arith.truncf %428 : vector<8x64xf32> to vector<8x64xbf16>
    %cst_331 = arith.constant dense<0.000000e+00> : vector<8x256xf32>
    %431 = tpu.matmul %430, %409, %cst_331 {dimension_numbers = #tpu.dot_dimension_numbers<[1], [0], [0], [1], [0, 0, 1, 1], [], []>} : vector<8x64xbf16>, vector<64x256xbf16>, vector<8x256xf32> -> vector<8x256xf32>
    %c8_332 = arith.constant 8 : index
    %c0_333 = arith.constant 0 : index
    %432 = vector.load %arg13[%c8_332, %c0_333] : memref<64x256xf32, #tpu.memory_space<vmem>>, vector<8x256xf32>
    %433 = arith.addf %431, %432 : vector<8x256xf32>
    %434 = arith.mulf %433, %23 : vector<8x256xf32>
    %435 = math.tanh %434 : vector<8x256xf32>
    %436 = arith.mulf %435, %23 : vector<8x256xf32>
    %437 = arith.addf %436, %26 : vector<8x256xf32>
    %438 = vector.extract_strided_slice %437 {offsets = [0, 0], sizes = [8, 64], strides = [1, 1]} : vector<8x256xf32> to vector<8x64xf32>
    %439 = vector.extract_strided_slice %437 {offsets = [0, 64], sizes = [8, 64], strides = [1, 1]} : vector<8x256xf32> to vector<8x64xf32>
    %440 = vector.extract_strided_slice %437 {offsets = [0, 128], sizes = [8, 64], strides = [1, 1]} : vector<8x256xf32> to vector<8x64xf32>
    %441 = vector.extract_strided_slice %437 {offsets = [0, 192], sizes = [8, 64], strides = [1, 1]} : vector<8x256xf32> to vector<8x64xf32>
    %442 = arith.mulf %439, %426 : vector<8x64xf32>
    %443 = arith.mulf %438, %441 : vector<8x64xf32>
    %444 = arith.addf %442, %443 : vector<8x64xf32>
    %445 = math.tanh %444 : vector<8x64xf32>
    %446 = arith.mulf %440, %445 : vector<8x64xf32>
    %c8_334 = arith.constant 8 : index
    %c0_335 = arith.constant 0 : index
    %447 = vector.load %arg15[%c8_334, %c0_335] : memref<64x64xf32, #tpu.memory_space<vmem>>, vector<8x64xf32>
    tpu.vector_store %arg15[%c8_334, %c0_335], %446 {strides = array<i32>} : memref<64x64xf32, #tpu.memory_space<vmem>>, vector<8x64xf32>,
    %448 = arith.truncf %446 : vector<8x64xf32> to vector<8x64xbf16>
    %cst_336 = arith.constant dense<0.000000e+00> : vector<8x256xf32>
    %449 = tpu.matmul %448, %409, %cst_336 {dimension_numbers = #tpu.dot_dimension_numbers<[1], [0], [0], [1], [0, 0, 1, 1], [], []>} : vector<8x64xbf16>, vector<64x256xbf16>, vector<8x256xf32> -> vector<8x256xf32>
    %c16_337 = arith.constant 16 : index
    %c0_338 = arith.constant 0 : index
    %450 = vector.load %arg13[%c16_337, %c0_338] : memref<64x256xf32, #tpu.memory_space<vmem>>, vector<8x256xf32>
    %451 = arith.addf %449, %450 : vector<8x256xf32>
    %452 = arith.mulf %451, %23 : vector<8x256xf32>
    %453 = math.tanh %452 : vector<8x256xf32>
    %454 = arith.mulf %453, %23 : vector<8x256xf32>
    %455 = arith.addf %454, %26 : vector<8x256xf32>
    %456 = vector.extract_strided_slice %455 {offsets = [0, 0], sizes = [8, 64], strides = [1, 1]} : vector<8x256xf32> to vector<8x64xf32>
    %457 = vector.extract_strided_slice %455 {offsets = [0, 64], sizes = [8, 64], strides = [1, 1]} : vector<8x256xf32> to vector<8x64xf32>
    %458 = vector.extract_strided_slice %455 {offsets = [0, 128], sizes = [8, 64], strides = [1, 1]} : vector<8x256xf32> to vector<8x64xf32>
    %459 = vector.extract_strided_slice %455 {offsets = [0, 192], sizes = [8, 64], strides = [1, 1]} : vector<8x256xf32> to vector<8x64xf32>
    %460 = arith.mulf %457, %444 : vector<8x64xf32>
    %461 = arith.mulf %456, %459 : vector<8x64xf32>
    %462 = arith.addf %460, %461 : vector<8x64xf32>
    %463 = math.tanh %462 : vector<8x64xf32>
    %464 = arith.mulf %458, %463 : vector<8x64xf32>
    %c16_339 = arith.constant 16 : index
    %c0_340 = arith.constant 0 : index
    %465 = vector.load %arg15[%c16_339, %c0_340] : memref<64x64xf32, #tpu.memory_space<vmem>>, vector<8x64xf32>
    tpu.vector_store %arg15[%c16_339, %c0_340], %464 {strides = array<i32>} : memref<64x64xf32, #tpu.memory_space<vmem>>, vector<8x64xf32>,
    %466 = arith.truncf %464 : vector<8x64xf32> to vector<8x64xbf16>
    %cst_341 = arith.constant dense<0.000000e+00> : vector<8x256xf32>
    %467 = tpu.matmul %466, %409, %cst_341 {dimension_numbers = #tpu.dot_dimension_numbers<[1], [0], [0], [1], [0, 0, 1, 1], [], []>} : vector<8x64xbf16>, vector<64x256xbf16>, vector<8x256xf32> -> vector<8x256xf32>
    %c24_342 = arith.constant 24 : index
    %c0_343 = arith.constant 0 : index
    %468 = vector.load %arg13[%c24_342, %c0_343] : memref<64x256xf32, #tpu.memory_space<vmem>>, vector<8x256xf32>
    %469 = arith.addf %467, %468 : vector<8x256xf32>
    %470 = arith.mulf %469, %23 : vector<8x256xf32>
    %471 = math.tanh %470 : vector<8x256xf32>
    %472 = arith.mulf %471, %23 : vector<8x256xf32>
    %473 = arith.addf %472, %26 : vector<8x256xf32>
    %474 = vector.extract_strided_slice %473 {offsets = [0, 0], sizes = [8, 64], strides = [1, 1]} : vector<8x256xf32> to vector<8x64xf32>
    %475 = vector.extract_strided_slice %473 {offsets = [0, 64], sizes = [8, 64], strides = [1, 1]} : vector<8x256xf32> to vector<8x64xf32>
    %476 = vector.extract_strided_slice %473 {offsets = [0, 128], sizes = [8, 64], strides = [1, 1]} : vector<8x256xf32> to vector<8x64xf32>
    %477 = vector.extract_strided_slice %473 {offsets = [0, 192], sizes = [8, 64], strides = [1, 1]} : vector<8x256xf32> to vector<8x64xf32>
    %478 = arith.mulf %475, %462 : vector<8x64xf32>
    %479 = arith.mulf %474, %477 : vector<8x64xf32>
    %480 = arith.addf %478, %479 : vector<8x64xf32>
    %481 = math.tanh %480 : vector<8x64xf32>
    %482 = arith.mulf %476, %481 : vector<8x64xf32>
    %c24_344 = arith.constant 24 : index
    %c0_345 = arith.constant 0 : index
    %483 = vector.load %arg15[%c24_344, %c0_345] : memref<64x64xf32, #tpu.memory_space<vmem>>, vector<8x64xf32>
    tpu.vector_store %arg15[%c24_344, %c0_345], %482 {strides = array<i32>} : memref<64x64xf32, #tpu.memory_space<vmem>>, vector<8x64xf32>,
    %484 = arith.truncf %482 : vector<8x64xf32> to vector<8x64xbf16>
    %cst_346 = arith.constant dense<0.000000e+00> : vector<8x256xf32>
    %485 = tpu.matmul %484, %409, %cst_346 {dimension_numbers = #tpu.dot_dimension_numbers<[1], [0], [0], [1], [0, 0, 1, 1], [], []>} : vector<8x64xbf16>, vector<64x256xbf16>, vector<8x256xf32> -> vector<8x256xf32>
    %c32_347 = arith.constant 32 : index
    %c0_348 = arith.constant 0 : index
    %486 = vector.load %arg13[%c32_347, %c0_348] : memref<64x256xf32, #tpu.memory_space<vmem>>, vector<8x256xf32>
    %487 = arith.addf %485, %486 : vector<8x256xf32>
    %488 = arith.mulf %487, %23 : vector<8x256xf32>
    %489 = math.tanh %488 : vector<8x256xf32>
    %490 = arith.mulf %489, %23 : vector<8x256xf32>
    %491 = arith.addf %490, %26 : vector<8x256xf32>
    %492 = vector.extract_strided_slice %491 {offsets = [0, 0], sizes = [8, 64], strides = [1, 1]} : vector<8x256xf32> to vector<8x64xf32>
    %493 = vector.extract_strided_slice %491 {offsets = [0, 64], sizes = [8, 64], strides = [1, 1]} : vector<8x256xf32> to vector<8x64xf32>
    %494 = vector.extract_strided_slice %491 {offsets = [0, 128], sizes = [8, 64], strides = [1, 1]} : vector<8x256xf32> to vector<8x64xf32>
    %495 = vector.extract_strided_slice %491 {offsets = [0, 192], sizes = [8, 64], strides = [1, 1]} : vector<8x256xf32> to vector<8x64xf32>
    %496 = arith.mulf %493, %480 : vector<8x64xf32>
    %497 = arith.mulf %492, %495 : vector<8x64xf32>
    %498 = arith.addf %496, %497 : vector<8x64xf32>
    %499 = math.tanh %498 : vector<8x64xf32>
    %500 = arith.mulf %494, %499 : vector<8x64xf32>
    %c32_349 = arith.constant 32 : index
    %c0_350 = arith.constant 0 : index
    %501 = vector.load %arg15[%c32_349, %c0_350] : memref<64x64xf32, #tpu.memory_space<vmem>>, vector<8x64xf32>
    tpu.vector_store %arg15[%c32_349, %c0_350], %500 {strides = array<i32>} : memref<64x64xf32, #tpu.memory_space<vmem>>, vector<8x64xf32>,
    %502 = arith.truncf %500 : vector<8x64xf32> to vector<8x64xbf16>
    %cst_351 = arith.constant dense<0.000000e+00> : vector<8x256xf32>
    %503 = tpu.matmul %502, %409, %cst_351 {dimension_numbers = #tpu.dot_dimension_numbers<[1], [0], [0], [1], [0, 0, 1, 1], [], []>} : vector<8x64xbf16>, vector<64x256xbf16>, vector<8x256xf32> -> vector<8x256xf32>
    %c40_352 = arith.constant 40 : index
    %c0_353 = arith.constant 0 : index
    %504 = vector.load %arg13[%c40_352, %c0_353] : memref<64x256xf32, #tpu.memory_space<vmem>>, vector<8x256xf32>
    %505 = arith.addf %503, %504 : vector<8x256xf32>
    %506 = arith.mulf %505, %23 : vector<8x256xf32>
    %507 = math.tanh %506 : vector<8x256xf32>
    %508 = arith.mulf %507, %23 : vector<8x256xf32>
    %509 = arith.addf %508, %26 : vector<8x256xf32>
    %510 = vector.extract_strided_slice %509 {offsets = [0, 0], sizes = [8, 64], strides = [1, 1]} : vector<8x256xf32> to vector<8x64xf32>
    %511 = vector.extract_strided_slice %509 {offsets = [0, 64], sizes = [8, 64], strides = [1, 1]} : vector<8x256xf32> to vector<8x64xf32>
    %512 = vector.extract_strided_slice %509 {offsets = [0, 128], sizes = [8, 64], strides = [1, 1]} : vector<8x256xf32> to vector<8x64xf32>
    %513 = vector.extract_strided_slice %509 {offsets = [0, 192], sizes = [8, 64], strides = [1, 1]} : vector<8x256xf32> to vector<8x64xf32>
    %514 = arith.mulf %511, %498 : vector<8x64xf32>
    %515 = arith.mulf %510, %513 : vector<8x64xf32>
    %516 = arith.addf %514, %515 : vector<8x64xf32>
    %517 = math.tanh %516 : vector<8x64xf32>
    %518 = arith.mulf %512, %517 : vector<8x64xf32>
    %c40_354 = arith.constant 40 : index
    %c0_355 = arith.constant 0 : index
    %519 = vector.load %arg15[%c40_354, %c0_355] : memref<64x64xf32, #tpu.memory_space<vmem>>, vector<8x64xf32>
    tpu.vector_store %arg15[%c40_354, %c0_355], %518 {strides = array<i32>} : memref<64x64xf32, #tpu.memory_space<vmem>>, vector<8x64xf32>,
    %520 = arith.truncf %518 : vector<8x64xf32> to vector<8x64xbf16>
    %cst_356 = arith.constant dense<0.000000e+00> : vector<8x256xf32>
    %521 = tpu.matmul %520, %409, %cst_356 {dimension_numbers = #tpu.dot_dimension_numbers<[1], [0], [0], [1], [0, 0, 1, 1], [], []>} : vector<8x64xbf16>, vector<64x256xbf16>, vector<8x256xf32> -> vector<8x256xf32>
    %c48_357 = arith.constant 48 : index
    %c0_358 = arith.constant 0 : index
    %522 = vector.load %arg13[%c48_357, %c0_358] : memref<64x256xf32, #tpu.memory_space<vmem>>, vector<8x256xf32>
    %523 = arith.addf %521, %522 : vector<8x256xf32>
    %524 = arith.mulf %523, %23 : vector<8x256xf32>
    %525 = math.tanh %524 : vector<8x256xf32>
    %526 = arith.mulf %525, %23 : vector<8x256xf32>
    %527 = arith.addf %526, %26 : vector<8x256xf32>
    %528 = vector.extract_strided_slice %527 {offsets = [0, 0], sizes = [8, 64], strides = [1, 1]} : vector<8x256xf32> to vector<8x64xf32>
    %529 = vector.extract_strided_slice %527 {offsets = [0, 64], sizes = [8, 64], strides = [1, 1]} : vector<8x256xf32> to vector<8x64xf32>
    %530 = vector.extract_strided_slice %527 {offsets = [0, 128], sizes = [8, 64], strides = [1, 1]} : vector<8x256xf32> to vector<8x64xf32>
    %531 = vector.extract_strided_slice %527 {offsets = [0, 192], sizes = [8, 64], strides = [1, 1]} : vector<8x256xf32> to vector<8x64xf32>
    %532 = arith.mulf %529, %516 : vector<8x64xf32>
    %533 = arith.mulf %528, %531 : vector<8x64xf32>
    %534 = arith.addf %532, %533 : vector<8x64xf32>
    %535 = math.tanh %534 : vector<8x64xf32>
    %536 = arith.mulf %530, %535 : vector<8x64xf32>
    %c48_359 = arith.constant 48 : index
    %c0_360 = arith.constant 0 : index
    %537 = vector.load %arg15[%c48_359, %c0_360] : memref<64x64xf32, #tpu.memory_space<vmem>>, vector<8x64xf32>
    tpu.vector_store %arg15[%c48_359, %c0_360], %536 {strides = array<i32>} : memref<64x64xf32, #tpu.memory_space<vmem>>, vector<8x64xf32>,
    %538 = arith.truncf %536 : vector<8x64xf32> to vector<8x64xbf16>
    %cst_361 = arith.constant dense<0.000000e+00> : vector<8x256xf32>
    %539 = tpu.matmul %538, %409, %cst_361 {dimension_numbers = #tpu.dot_dimension_numbers<[1], [0], [0], [1], [0, 0, 1, 1], [], []>} : vector<8x64xbf16>, vector<64x256xbf16>, vector<8x256xf32> -> vector<8x256xf32>
    %c56_362 = arith.constant 56 : index
    %c0_363 = arith.constant 0 : index
    %540 = vector.load %arg13[%c56_362, %c0_363] : memref<64x256xf32, #tpu.memory_space<vmem>>, vector<8x256xf32>
    %541 = arith.addf %539, %540 : vector<8x256xf32>
    %542 = arith.mulf %541, %23 : vector<8x256xf32>
    %543 = math.tanh %542 : vector<8x256xf32>
    %544 = arith.mulf %543, %23 : vector<8x256xf32>
    %545 = arith.addf %544, %26 : vector<8x256xf32>
    %546 = vector.extract_strided_slice %545 {offsets = [0, 0], sizes = [8, 64], strides = [1, 1]} : vector<8x256xf32> to vector<8x64xf32>
    %547 = vector.extract_strided_slice %545 {offsets = [0, 64], sizes = [8, 64], strides = [1, 1]} : vector<8x256xf32> to vector<8x64xf32>
    %548 = vector.extract_strided_slice %545 {offsets = [0, 128], sizes = [8, 64], strides = [1, 1]} : vector<8x256xf32> to vector<8x64xf32>
    %549 = vector.extract_strided_slice %545 {offsets = [0, 192], sizes = [8, 64], strides = [1, 1]} : vector<8x256xf32> to vector<8x64xf32>
    %550 = arith.mulf %547, %534 : vector<8x64xf32>
    %551 = arith.mulf %546, %549 : vector<8x64xf32>
    %552 = arith.addf %550, %551 : vector<8x64xf32>
    %553 = math.tanh %552 : vector<8x64xf32>
    %554 = arith.mulf %548, %553 : vector<8x64xf32>
    %c56_364 = arith.constant 56 : index
    %c0_365 = arith.constant 0 : index
    %555 = vector.load %arg15[%c56_364, %c0_365] : memref<64x64xf32, #tpu.memory_space<vmem>>, vector<8x64xf32>
    tpu.vector_store %arg15[%c56_364, %c0_365], %554 {strides = array<i32>} : memref<64x64xf32, #tpu.memory_space<vmem>>, vector<8x64xf32>,
    %c0_366 = arith.constant 0 : index
    %c0_367 = arith.constant 0 : index
    %556 = vector.load %arg15[%c0_366, %c0_367] : memref<64x64xf32, #tpu.memory_space<vmem>>, vector<8x64xf32>
    %c56_368 = arith.constant 56 : index
    %c0_369 = arith.constant 0 : index
    %557 = vector.load %arg15[%c56_368, %c0_369] : memref<64x64xf32, #tpu.memory_space<vmem>>, vector<8x64xf32>
    %558 = arith.select %29, %556, %557 : vector<8x64xi1>, vector<8x64xf32>
    %c0_370 = arith.constant 0 : index
    %c0_371 = arith.constant 0 : index
    %559 = vector.load %arg15[%c0_370, %c0_371] : memref<64x64xf32, #tpu.memory_space<vmem>>, vector<8x64xf32>
    tpu.vector_store %arg15[%c0_370, %c0_371], %558 {strides = array<i32>} : memref<64x64xf32, #tpu.memory_space<vmem>>, vector<8x64xf32>,
    %560 = arith.select %29, %557, %556 : vector<8x64xi1>, vector<8x64xf32>
    %c56_372 = arith.constant 56 : index
    %c0_373 = arith.constant 0 : index
    %561 = vector.load %arg15[%c56_372, %c0_373] : memref<64x64xf32, #tpu.memory_space<vmem>>, vector<8x64xf32>
    tpu.vector_store %arg15[%c56_372, %c0_373], %560 {strides = array<i32>} : memref<64x64xf32, #tpu.memory_space<vmem>>, vector<8x64xf32>,
    %c8_374 = arith.constant 8 : index
    %c0_375 = arith.constant 0 : index
    %562 = vector.load %arg15[%c8_374, %c0_375] : memref<64x64xf32, #tpu.memory_space<vmem>>, vector<8x64xf32>
    %c48_376 = arith.constant 48 : index
    %c0_377 = arith.constant 0 : index
    %563 = vector.load %arg15[%c48_376, %c0_377] : memref<64x64xf32, #tpu.memory_space<vmem>>, vector<8x64xf32>
    %564 = arith.select %29, %562, %563 : vector<8x64xi1>, vector<8x64xf32>
    %c8_378 = arith.constant 8 : index
    %c0_379 = arith.constant 0 : index
    %565 = vector.load %arg15[%c8_378, %c0_379] : memref<64x64xf32, #tpu.memory_space<vmem>>, vector<8x64xf32>
    tpu.vector_store %arg15[%c8_378, %c0_379], %564 {strides = array<i32>} : memref<64x64xf32, #tpu.memory_space<vmem>>, vector<8x64xf32>,
    %566 = arith.select %29, %563, %562 : vector<8x64xi1>, vector<8x64xf32>
    %c48_380 = arith.constant 48 : index
    %c0_381 = arith.constant 0 : index
    %567 = vector.load %arg15[%c48_380, %c0_381] : memref<64x64xf32, #tpu.memory_space<vmem>>, vector<8x64xf32>
    tpu.vector_store %arg15[%c48_380, %c0_381], %566 {strides = array<i32>} : memref<64x64xf32, #tpu.memory_space<vmem>>, vector<8x64xf32>,
    %c16_382 = arith.constant 16 : index
    %c0_383 = arith.constant 0 : index
    %568 = vector.load %arg15[%c16_382, %c0_383] : memref<64x64xf32, #tpu.memory_space<vmem>>, vector<8x64xf32>
    %c40_384 = arith.constant 40 : index
    %c0_385 = arith.constant 0 : index
    %569 = vector.load %arg15[%c40_384, %c0_385] : memref<64x64xf32, #tpu.memory_space<vmem>>, vector<8x64xf32>
    %570 = arith.select %29, %568, %569 : vector<8x64xi1>, vector<8x64xf32>
    %c16_386 = arith.constant 16 : index
    %c0_387 = arith.constant 0 : index
    %571 = vector.load %arg15[%c16_386, %c0_387] : memref<64x64xf32, #tpu.memory_space<vmem>>, vector<8x64xf32>
    tpu.vector_store %arg15[%c16_386, %c0_387], %570 {strides = array<i32>} : memref<64x64xf32, #tpu.memory_space<vmem>>, vector<8x64xf32>,
    %572 = arith.select %29, %569, %568 : vector<8x64xi1>, vector<8x64xf32>
    %c40_388 = arith.constant 40 : index
    %c0_389 = arith.constant 0 : index
    %573 = vector.load %arg15[%c40_388, %c0_389] : memref<64x64xf32, #tpu.memory_space<vmem>>, vector<8x64xf32>
    tpu.vector_store %arg15[%c40_388, %c0_389], %572 {strides = array<i32>} : memref<64x64xf32, #tpu.memory_space<vmem>>, vector<8x64xf32>,
    %c24_390 = arith.constant 24 : index
    %c0_391 = arith.constant 0 : index
    %574 = vector.load %arg15[%c24_390, %c0_391] : memref<64x64xf32, #tpu.memory_space<vmem>>, vector<8x64xf32>
    %c32_392 = arith.constant 32 : index
    %c0_393 = arith.constant 0 : index
    %575 = vector.load %arg15[%c32_392, %c0_393] : memref<64x64xf32, #tpu.memory_space<vmem>>, vector<8x64xf32>
    %576 = arith.select %29, %574, %575 : vector<8x64xi1>, vector<8x64xf32>
    %c24_394 = arith.constant 24 : index
    %c0_395 = arith.constant 0 : index
    %577 = vector.load %arg15[%c24_394, %c0_395] : memref<64x64xf32, #tpu.memory_space<vmem>>, vector<8x64xf32>
    tpu.vector_store %arg15[%c24_394, %c0_395], %576 {strides = array<i32>} : memref<64x64xf32, #tpu.memory_space<vmem>>, vector<8x64xf32>,
    %578 = arith.select %29, %575, %574 : vector<8x64xi1>, vector<8x64xf32>
    %c32_396 = arith.constant 32 : index
    %c0_397 = arith.constant 0 : index
    %579 = vector.load %arg15[%c32_396, %c0_397] : memref<64x64xf32, #tpu.memory_space<vmem>>, vector<8x64xf32>
    tpu.vector_store %arg15[%c32_396, %c0_397], %578 {strides = array<i32>} : memref<64x64xf32, #tpu.memory_space<vmem>>, vector<8x64xf32>,
    %c0_398 = arith.constant 0 : index
    %c0_399 = arith.constant 0 : index
    %580 = vector.load %arg15[%c0_398, %c0_399] : memref<64x64xf32, #tpu.memory_space<vmem>>, vector<64x64xf32>
    %c0_400 = arith.constant 0 : index
    %c0_401 = arith.constant 0 : index
    %581 = vector.load %arg9[%c0_400, %c0_401] : memref<64x128xf32, #tpu.memory_space<vmem>>, vector<64x128xf32>
    %cst_402 = arith.constant dense<0.000000e+00> : vector<64x128xf32>
    %582 = tpu.matmul %580, %581, %cst_402 {dimension_numbers = #tpu.dot_dimension_numbers<[1], [0], [0], [1], [0, 0, 1, 1], [], []>} : vector<64x64xf32>, vector<64x128xf32>, vector<64x128xf32> -> vector<64x128xf32>
    %c0_403 = arith.constant 0 : index
    %c0_404 = arith.constant 0 : index
    %583 = vector.load %arg10[%c0_403, %c0_404] : memref<1x128xf32, #tpu.memory_space<vmem>>, vector<1x128xf32>
    %584 = vector.broadcast %583 : vector<1x128xf32> to vector<64x128xf32>
    %585 = arith.addf %582, %584 : vector<64x128xf32>
    %cst_405 = arith.constant dense<0xFF800000> : vector<64xf32>
    %586 = vector.multi_reduction <maximumf>, %585, %cst_405 [1] : vector<64x128xf32> to vector<64xf32>
    %587 = vector.shape_cast %586 : vector<64xf32> to vector<64x1xf32>
    %588 = vector.broadcast %587 : vector<64x1xf32> to vector<64x128xf32>
    %589 = arith.subf %585, %588 : vector<64x128xf32>
    %590 = math.exp %589 : vector<64x128xf32>
    %cst_406 = arith.constant dense<0.000000e+00> : vector<64xf32>
    %591 = vector.multi_reduction <add>, %590, %cst_406 [1] : vector<64x128xf32> to vector<64xf32>
    %592 = vector.shape_cast %591 : vector<64xf32> to vector<64x1xf32>
    %593 = math.log %592 : vector<64x1xf32>
    %594 = vector.broadcast %593 : vector<64x1xf32> to vector<64x128xf32>
    %595 = arith.subf %589, %594 : vector<64x128xf32>
    %596 = vector.extract_strided_slice %595 {offsets = [0, 0], sizes = [1, 128], strides = [1, 1]} : vector<64x128xf32> to vector<1x128xf32>
    %c0_407 = arith.constant 0 : index
    %c0_408 = arith.constant 0 : index
    %c0_409 = arith.constant 0 : index
    %597 = vector.load %arg11[%c0_407, %c0_408, %c0_409] : memref<2x8x128xf32, #tpu.memory_space<vmem>>, vector<1x1x128xf32>
    %598 = vector.shape_cast %597 : vector<1x1x128xf32> to vector<1x128xf32>
    %599 = vector.shape_cast %596 : vector<1x128xf32> to vector<1x1x128xf32>
    tpu.vector_store %arg11[%c0_407, %c0_408, %c0_409], %599 {strides = array<i32>} : memref<2x8x128xf32, #tpu.memory_space<vmem>>, vector<1x1x128xf32>,
    %600 = vector.extract_strided_slice %595 {offsets = [1, 0], sizes = [1, 128], strides = [1, 1]} : vector<64x128xf32> to vector<1x128xf32>
    %c1_410 = arith.constant 1 : index
    %c0_411 = arith.constant 0 : index
    %c0_412 = arith.constant 0 : index
    %601 = vector.load %arg11[%c1_410, %c0_411, %c0_412] : memref<2x8x128xf32, #tpu.memory_space<vmem>>, vector<1x1x128xf32>
    %602 = vector.shape_cast %601 : vector<1x1x128xf32> to vector<1x128xf32>
    %603 = vector.shape_cast %600 : vector<1x128xf32> to vector<1x1x128xf32>
    tpu.vector_store %arg11[%c1_410, %c0_411, %c0_412], %603 {strides = array<i32>} : memref<2x8x128xf32, #tpu.memory_space<vmem>>, vector<1x1x128xf32>,
    %604 = vector.extract_strided_slice %595 {offsets = [8, 0], sizes = [1, 128], strides = [1, 1]} : vector<64x128xf32> to vector<1x128xf32>
    %c0_413 = arith.constant 0 : index
    %c1_414 = arith.constant 1 : index
    %c0_415 = arith.constant 0 : index
    %605 = vector.load %arg11[%c0_413, %c1_414, %c0_415] : memref<2x8x128xf32, #tpu.memory_space<vmem>>, vector<1x1x128xf32>
    %606 = vector.shape_cast %605 : vector<1x1x128xf32> to vector<1x128xf32>
    %607 = vector.shape_cast %604 : vector<1x128xf32> to vector<1x1x128xf32>
    tpu.vector_store %arg11[%c0_413, %c1_414, %c0_415], %607 {strides = array<i32>} : memref<2x8x128xf32, #tpu.memory_space<vmem>>, vector<1x1x128xf32>,
    %608 = vector.extract_strided_slice %595 {offsets = [9, 0], sizes = [1, 128], strides = [1, 1]} : vector<64x128xf32> to vector<1x128xf32>
    %c1_416 = arith.constant 1 : index
    %c1_417 = arith.constant 1 : index
    %c0_418 = arith.constant 0 : index
    %609 = vector.load %arg11[%c1_416, %c1_417, %c0_418] : memref<2x8x128xf32, #tpu.memory_space<vmem>>, vector<1x1x128xf32>
    %610 = vector.shape_cast %609 : vector<1x1x128xf32> to vector<1x128xf32>
    %611 = vector.shape_cast %608 : vector<1x128xf32> to vector<1x1x128xf32>
    tpu.vector_store %arg11[%c1_416, %c1_417, %c0_418], %611 {strides = array<i32>} : memref<2x8x128xf32, #tpu.memory_space<vmem>>, vector<1x1x128xf32>,
    %612 = vector.extract_strided_slice %595 {offsets = [16, 0], sizes = [1, 128], strides = [1, 1]} : vector<64x128xf32> to vector<1x128xf32>
    %c0_419 = arith.constant 0 : index
    %c2_420 = arith.constant 2 : index
    %c0_421 = arith.constant 0 : index
    %613 = vector.load %arg11[%c0_419, %c2_420, %c0_421] : memref<2x8x128xf32, #tpu.memory_space<vmem>>, vector<1x1x128xf32>
    %614 = vector.shape_cast %613 : vector<1x1x128xf32> to vector<1x128xf32>
    %615 = vector.shape_cast %612 : vector<1x128xf32> to vector<1x1x128xf32>
    tpu.vector_store %arg11[%c0_419, %c2_420, %c0_421], %615 {strides = array<i32>} : memref<2x8x128xf32, #tpu.memory_space<vmem>>, vector<1x1x128xf32>,
    %616 = vector.extract_strided_slice %595 {offsets = [17, 0], sizes = [1, 128], strides = [1, 1]} : vector<64x128xf32> to vector<1x128xf32>
    %c1_422 = arith.constant 1 : index
    %c2_423 = arith.constant 2 : index
    %c0_424 = arith.constant 0 : index
    %617 = vector.load %arg11[%c1_422, %c2_423, %c0_424] : memref<2x8x128xf32, #tpu.memory_space<vmem>>, vector<1x1x128xf32>
    %618 = vector.shape_cast %617 : vector<1x1x128xf32> to vector<1x128xf32>
    %619 = vector.shape_cast %616 : vector<1x128xf32> to vector<1x1x128xf32>
    tpu.vector_store %arg11[%c1_422, %c2_423, %c0_424], %619 {strides = array<i32>} : memref<2x8x128xf32, #tpu.memory_space<vmem>>, vector<1x1x128xf32>,
    %620 = vector.extract_strided_slice %595 {offsets = [24, 0], sizes = [1, 128], strides = [1, 1]} : vector<64x128xf32> to vector<1x128xf32>
    %c0_425 = arith.constant 0 : index
    %c3_426 = arith.constant 3 : index
    %c0_427 = arith.constant 0 : index
    %621 = vector.load %arg11[%c0_425, %c3_426, %c0_427] : memref<2x8x128xf32, #tpu.memory_space<vmem>>, vector<1x1x128xf32>
    %622 = vector.shape_cast %621 : vector<1x1x128xf32> to vector<1x128xf32>
    %623 = vector.shape_cast %620 : vector<1x128xf32> to vector<1x1x128xf32>
    tpu.vector_store %arg11[%c0_425, %c3_426, %c0_427], %623 {strides = array<i32>} : memref<2x8x128xf32, #tpu.memory_space<vmem>>, vector<1x1x128xf32>,
    %624 = vector.extract_strided_slice %595 {offsets = [25, 0], sizes = [1, 128], strides = [1, 1]} : vector<64x128xf32> to vector<1x128xf32>
    %c1_428 = arith.constant 1 : index
    %c3_429 = arith.constant 3 : index
    %c0_430 = arith.constant 0 : index
    %625 = vector.load %arg11[%c1_428, %c3_429, %c0_430] : memref<2x8x128xf32, #tpu.memory_space<vmem>>, vector<1x1x128xf32>
    %626 = vector.shape_cast %625 : vector<1x1x128xf32> to vector<1x128xf32>
    %627 = vector.shape_cast %624 : vector<1x128xf32> to vector<1x1x128xf32>
    tpu.vector_store %arg11[%c1_428, %c3_429, %c0_430], %627 {strides = array<i32>} : memref<2x8x128xf32, #tpu.memory_space<vmem>>, vector<1x1x128xf32>,
    %628 = vector.extract_strided_slice %595 {offsets = [32, 0], sizes = [1, 128], strides = [1, 1]} : vector<64x128xf32> to vector<1x128xf32>
    %c0_431 = arith.constant 0 : index
    %c4_432 = arith.constant 4 : index
    %c0_433 = arith.constant 0 : index
    %629 = vector.load %arg11[%c0_431, %c4_432, %c0_433] : memref<2x8x128xf32, #tpu.memory_space<vmem>>, vector<1x1x128xf32>
    %630 = vector.shape_cast %629 : vector<1x1x128xf32> to vector<1x128xf32>
    %631 = vector.shape_cast %628 : vector<1x128xf32> to vector<1x1x128xf32>
    tpu.vector_store %arg11[%c0_431, %c4_432, %c0_433], %631 {strides = array<i32>} : memref<2x8x128xf32, #tpu.memory_space<vmem>>, vector<1x1x128xf32>,
    %632 = vector.extract_strided_slice %595 {offsets = [33, 0], sizes = [1, 128], strides = [1, 1]} : vector<64x128xf32> to vector<1x128xf32>
    %c1_434 = arith.constant 1 : index
    %c4_435 = arith.constant 4 : index
    %c0_436 = arith.constant 0 : index
    %633 = vector.load %arg11[%c1_434, %c4_435, %c0_436] : memref<2x8x128xf32, #tpu.memory_space<vmem>>, vector<1x1x128xf32>
    %634 = vector.shape_cast %633 : vector<1x1x128xf32> to vector<1x128xf32>
    %635 = vector.shape_cast %632 : vector<1x128xf32> to vector<1x1x128xf32>
    tpu.vector_store %arg11[%c1_434, %c4_435, %c0_436], %635 {strides = array<i32>} : memref<2x8x128xf32, #tpu.memory_space<vmem>>, vector<1x1x128xf32>,
    %636 = vector.extract_strided_slice %595 {offsets = [40, 0], sizes = [1, 128], strides = [1, 1]} : vector<64x128xf32> to vector<1x128xf32>
    %c0_437 = arith.constant 0 : index
    %c5_438 = arith.constant 5 : index
    %c0_439 = arith.constant 0 : index
    %637 = vector.load %arg11[%c0_437, %c5_438, %c0_439] : memref<2x8x128xf32, #tpu.memory_space<vmem>>, vector<1x1x128xf32>
    %638 = vector.shape_cast %637 : vector<1x1x128xf32> to vector<1x128xf32>
    %639 = vector.shape_cast %636 : vector<1x128xf32> to vector<1x1x128xf32>
    tpu.vector_store %arg11[%c0_437, %c5_438, %c0_439], %639 {strides = array<i32>} : memref<2x8x128xf32, #tpu.memory_space<vmem>>, vector<1x1x128xf32>,
    %640 = vector.extract_strided_slice %595 {offsets = [41, 0], sizes = [1, 128], strides = [1, 1]} : vector<64x128xf32> to vector<1x128xf32>
    %c1_440 = arith.constant 1 : index
    %c5_441 = arith.constant 5 : index
    %c0_442 = arith.constant 0 : index
    %641 = vector.load %arg11[%c1_440, %c5_441, %c0_442] : memref<2x8x128xf32, #tpu.memory_space<vmem>>, vector<1x1x128xf32>
    %642 = vector.shape_cast %641 : vector<1x1x128xf32> to vector<1x128xf32>
    %643 = vector.shape_cast %640 : vector<1x128xf32> to vector<1x1x128xf32>
    tpu.vector_store %arg11[%c1_440, %c5_441, %c0_442], %643 {strides = array<i32>} : memref<2x8x128xf32, #tpu.memory_space<vmem>>, vector<1x1x128xf32>,
    %644 = vector.extract_strided_slice %595 {offsets = [48, 0], sizes = [1, 128], strides = [1, 1]} : vector<64x128xf32> to vector<1x128xf32>
    %c0_443 = arith.constant 0 : index
    %c6_444 = arith.constant 6 : index
    %c0_445 = arith.constant 0 : index
    %645 = vector.load %arg11[%c0_443, %c6_444, %c0_445] : memref<2x8x128xf32, #tpu.memory_space<vmem>>, vector<1x1x128xf32>
    %646 = vector.shape_cast %645 : vector<1x1x128xf32> to vector<1x128xf32>
    %647 = vector.shape_cast %644 : vector<1x128xf32> to vector<1x1x128xf32>
    tpu.vector_store %arg11[%c0_443, %c6_444, %c0_445], %647 {strides = array<i32>} : memref<2x8x128xf32, #tpu.memory_space<vmem>>, vector<1x1x128xf32>,
    %648 = vector.extract_strided_slice %595 {offsets = [49, 0], sizes = [1, 128], strides = [1, 1]} : vector<64x128xf32> to vector<1x128xf32>
    %c1_446 = arith.constant 1 : index
    %c6_447 = arith.constant 6 : index
    %c0_448 = arith.constant 0 : index
    %649 = vector.load %arg11[%c1_446, %c6_447, %c0_448] : memref<2x8x128xf32, #tpu.memory_space<vmem>>, vector<1x1x128xf32>
    %650 = vector.shape_cast %649 : vector<1x1x128xf32> to vector<1x128xf32>
    %651 = vector.shape_cast %648 : vector<1x128xf32> to vector<1x1x128xf32>
    tpu.vector_store %arg11[%c1_446, %c6_447, %c0_448], %651 {strides = array<i32>} : memref<2x8x128xf32, #tpu.memory_space<vmem>>, vector<1x1x128xf32>,
    %652 = vector.extract_strided_slice %595 {offsets = [56, 0], sizes = [1, 128], strides = [1, 1]} : vector<64x128xf32> to vector<1x128xf32>
    %c0_449 = arith.constant 0 : index
    %c7_450 = arith.constant 7 : index
    %c0_451 = arith.constant 0 : index
    %653 = vector.load %arg11[%c0_449, %c7_450, %c0_451] : memref<2x8x128xf32, #tpu.memory_space<vmem>>, vector<1x1x128xf32>
    %654 = vector.shape_cast %653 : vector<1x1x128xf32> to vector<1x128xf32>
    %655 = vector.shape_cast %652 : vector<1x128xf32> to vector<1x1x128xf32>
    tpu.vector_store %arg11[%c0_449, %c7_450, %c0_451], %655 {strides = array<i32>} : memref<2x8x128xf32, #tpu.memory_space<vmem>>, vector<1x1x128xf32>,
    %656 = vector.extract_strided_slice %595 {offsets = [57, 0], sizes = [1, 128], strides = [1, 1]} : vector<64x128xf32> to vector<1x128xf32>
    %c1_452 = arith.constant 1 : index
    %c7_453 = arith.constant 7 : index
    %c0_454 = arith.constant 0 : index
    %657 = vector.load %arg11[%c1_452, %c7_453, %c0_454] : memref<2x8x128xf32, #tpu.memory_space<vmem>>, vector<1x1x128xf32>
    %658 = vector.shape_cast %657 : vector<1x1x128xf32> to vector<1x128xf32>
    %659 = vector.shape_cast %656 : vector<1x128xf32> to vector<1x1x128xf32>
    tpu.vector_store %arg11[%c1_452, %c7_453, %c0_454], %659 {strides = array<i32>} : memref<2x8x128xf32, #tpu.memory_space<vmem>>, vector<1x1x128xf32>,
    return
  }
}

</mosaic_0001>

<bundles_post_ra>
// kernel: lstm_tagger_forward.1
= control target key start
LH: loop header
LB: loop body
LE: loop exit
PB: predicated region body
PF: predicated region fallthrough
CT: control target
= control target key end

     0   :  { %16 = vsyncpa [#allocation9], 0  ;;  %s3927_s0 = inlined_call_operand.vmem [shape: s32[2,8], index: 0, kind: input, shape index: {}]   ;;  %s3928_s1 = inlined_call_operand.vmem [shape: s32[2,8,3], index: 1, kind: input, shape index: {}]   ;;  %s3929_s2 = inlined_call_operand.vmem [shape: f32[51,1,16], index: 2, kind: input, shape index: {}]   ;;  %s3930_s3 = inlined_call_operand.hbm [shape: f32[24,256], index: 3, kind: input, shape index: {}]   ;;  %s3931_s4 = inlined_call_operand.vmem [shape: bf16[64,256], index: 4, kind: input, shape index: {}]   ;;  %s3932_s5 = inlined_call_operand.vmem [shape: f32[1,256], index: 5, kind: input, shape index: {}]   ;;  %s3933_s6 = inlined_call_operand.hbm [shape: f32[64,256], index: 6, kind: input, shape index: {}]   ;;  %s3934_s7 = inlined_call_operand.hbm [shape: bf16[64,256], index: 7, kind: input, shape index: {}]   ;;  %s3935_s8 = inlined_call_operand.vmem [shape: f32[1,256], index: 8, kind: input, shape index: {}]   ;;  %s3936_s9 = inlined_call_operand.hbm [shape: f32[64,128], index: 9, kind: input, shape index: {}]   ;;  %s3937_s10 = inlined_call_operand.vmem [shape: f32[1,128], index: 10, kind: input, shape index: {}]   ;;  %s3938_s11 = inlined_call_operand.hbm [shape: f32[2,8,128], index: 11, kind: output, shape index: {}]  }
   0x1   :  { %17 = vsyncpa [#allocation7], 0 }
   0x2   :  { %18 = vsyncpa [#allocation12], 0 }
   0x3   :  { %19 = vsyncpa [#allocation15], 0 }
   0x4   :  { %20 = vsyncpa [#allocation8], 0  ;;  %s27_s19 = sshll.u32 %s3927_s0, 4  ;;  %s2804_s20 = smov [#allocation11]   ;;  %s28_s19 = int_to_ptr.vmem [resolvable:$true] %s27_s19 }
   0x5   :  { %s56_s21 = sshll.u32 %s2804_s20, 4  ;;  %s57_s21 = int_to_ptr.vmem [resolvable:$true] %s56_s21 }
   0x6   :  { %s2690_s22 = scalar_lea.vmem %s57_s21, 2048  ;;  %p2695_p1 = scmp.lt.s32.totalorder %s57_s21, %s57_s21 }
   0x7   :  { %p2691_p0 = scmp.ne.s32.totalorder %s57_s21, %s2690_s22  ;;  %p2696_p2 = scmp.lt.s32.totalorder %s2690_s22, %s2690_s22 }
   0x9   :  { %p2697_p3 = por %p2696_p2, %p2695_p1 }
   0xb   :  { %p2698_p4 = pnand %p2697_p3, %p2691_p0 }
   0xd   :  { %2701 = shalt.err (!%p2698_p4)
}
   0xe   :  { %s2805_s23 = smov 256   ;;  %s2806_s24 = smov 16  }
   0xf   :  { %62 = dma.hbm_to_vmem [thread:$0]  %s3933_s6, 2048, %s57_s21, [#allocation12], %s2805_s23, %s2805_s23, %s2806_s24  }
  0x10   :  { %s2702_s27 = scalar_lea.vmem %s28_s19, 32  ;;  %p2707_p6 = scmp.lt.s32.totalorder %s28_s19, %s28_s19 }
  0x11   :  { %p2703_p5 = scmp.ne.s32.totalorder %s28_s19, %s2702_s27  ;;  %p2708_p7 = scmp.lt.s32.totalorder %s2702_s27, %s2702_s27 }
  0x13   :  { %p2709_p8 = por %p2708_p7, %p2707_p6 }
  0x15   :  { %p2710_p9 = pnand %p2709_p8, %p2703_p5 }
  0x17   :  { %2713 = shalt.err (!%p2710_p9)
}
  0x18   :  { %s2807_s0 = smov [#allocation6]   ;;  %s2808_s28 = smov [#allocation10]  }
  0x19   :  { %30 = dma.vmem_to_smem %s28_s19, 32, %s2807_s0, [#allocation9]  }
  0x1a   :  { %s40_s29 = sshll.u32 %s2808_s28, 4  ;;  %s2809_s30 = smov [#allocation13]   ;;  %s41_s29 = int_to_ptr.vmem [resolvable:$true] %s40_s29 }
  0x1b   :  { %s68_s12 = sshll.u32 %s2809_s30, 4  ;;  %s2722_s13 = scalar_lea.vmem %s41_s29, 768  ;;  %s69_s12 = int_to_ptr.vmem [resolvable:$true] %s68_s12 }
  0x1c   :  { %p2723_p10 = scmp.ne.s32.totalorder %s41_s29, %s2722_s13  ;;  %p2727_p11 = scmp.lt.s32.totalorder %s41_s29, %s41_s29 }
  0x1d   :  { %p2728_p12 = scmp.lt.s32.totalorder %s2722_s13, %s2722_s13 }
  0x1f   :  { %p2729_p13 = por %p2728_p12, %p2727_p11 }
  0x21   :  { %p2730_p0 = pnand %p2729_p13, %p2723_p10 }
  0x23   :  { %2733 = shalt.err (!%p2730_p0)
}
  0x24   :  { %46 = dma.hbm_to_vmem [thread:$0]  %s3930_s3, 768, %s41_s29, [#allocation7], %s2805_s23, %s2805_s23, %s2806_s24  }
  0x25   :  { %s2742_s15 = scalar_lea.vmem %s69_s12, 1024  ;;  %p2747_p2 = scmp.lt.s32.totalorder %s69_s12, %s69_s12 }
  0x26   :  { %p2743_p1 = scmp.ne.s32.totalorder %s69_s12, %s2742_s15  ;;  %p2748_p3 = scmp.lt.s32.totalorder %s2742_s15, %s2742_s15 }
  0x28   :  { %p2749_p4 = por %p2748_p3, %p2747_p2 }
  0x2a   :  { %p2750_p5 = pnand %p2749_p4, %p2743_p1 }
  0x2c   :  { %2753 = shalt.err (!%p2750_p5)
}
  0x2d   :  { %s2810_s16 = smov 128   ;;  %s2811_s17 = smov 8  }
  0x2e   :  { %74 = dma.hbm_to_vmem [thread:$0]  %s3934_s7, 1024, %s69_s12, [#allocation12], %s2810_s16, %s2810_s16, %s2811_s17  }
  0x2f   :  { %s2812_s20 = smov [#allocation14]  }
  0x30   :  { %s82_s21 = sshll.u32 %s2812_s20, 4  ;;  %s83_s21 = int_to_ptr.vmem [resolvable:$true] %s82_s21 }
  0x31   :  { %s2762_s3 = scalar_lea.vmem %s83_s21, 1024  ;;  %p2767_p7 = scmp.lt.s32.totalorder %s83_s21, %s83_s21 }
  0x32   :  { %p2763_p6 = scmp.ne.s32.totalorder %s83_s21, %s2762_s3  ;;  %p2768_p8 = scmp.lt.s32.totalorder %s2762_s3, %s2762_s3 }
  0x34   :  { %p2769_p9 = por %p2768_p8, %p2767_p7 }
  0x36   :  { %p2770_p10 = pnand %p2769_p9, %p2763_p6 }
  0x38   :  { %2773 = shalt.err (!%p2770_p10)
}
  0x39   :  { %88 = dma.hbm_to_vmem [thread:$0]  %s3936_s9, 1024, %s83_s21, [#allocation15], %s2810_s16, %s2810_s16, %s2811_s17  }
  0x3a   :  { %2794 = dma.done.wait [#allocation9], 32  }
  0x3b   :  { %2795 = vsyncadd [#allocation9], 4294967264 }
  0x3c   :  { %2796 = dma.done.wait [#allocation7], 768  }
  0x3d   :  { %2797 = vsyncadd [#allocation7], 4294966528 }
  0x3e   :  { %2798 = dma.done.wait [#allocation12], 3072  }
  0x3f   :  { %2799 = vsyncadd [#allocation12], 4294964224 }
  0x40   :  { %2800 = dma.done.wait [#allocation15], 1024  }
  0x41   :  { %2801 = vsyncadd [#allocation15], 4294966272 }
  0x42   :  { %106 = sfence }
  0x43   :  { %v270_v0 = vld [vmem:[%s3928_s1 + $0x5] sm:$0x1]  ;;  %v248_v1 = vld [vmem:[%s3928_s1 + $0x4] sm:$0x1]  ;;  %v2405_v2 = vld [vmem:[%s3928_s1 + $0xd] sm:$0x1]  ;;  %v108_v63 = vlaneseq }
  0x44   :  { %v271_v3 = vcvt.s32.f32 %v270_v0  ;;  %v249_v4 = vcvt.s32.f32 %v248_v1  ;;  %v2402_v5 = vld [vmem:[%s3928_s1 + $0xc] sm:$0x1]  ;;  %v282_v6 = vcvt.s32.f32 %v2405_v2  ;;  %v2408_v8 = vld [vmem:[%s3928_s1 + $0xe] sm:$0x1]  ;;  %s2918_s13 = sld [smem:[#allocation6 + $0x5]]  ;;  %vm144_vm0 = vcmask 195584  }
  0x45   :  { %v260_v7 = vcvt.s32.f32 %v2402_v5  ;;  %v345_v9 = vld [vmem:[#allocation10 + $0x28] sm:$0xff]  ;;  %v292_v10 = vld [vmem:[%s3928_s1 + $0x6] sm:$0x1]  ;;  %s2923_s15 = sld [smem:[#allocation6 + $0x4]]  ;;  %v2813_v12 = vmov 0.0   ;;  %v343_v13 = vld [vmem:[#allocation10 + $0x18] sm:$0xff]  ;;  %v304_v18 = vcvt.s32.f32 %v2408_v8 }
  0x46   :  { %273 = vrot.lane.b32.xlu1 %v271_v3, %s2806_s24  ;;  %251 = vrot.lane.b32.xlu0 %v249_v4, %s2806_s24  ;;  %v344_v11 = vld [vmem:[#allocation10 + $0x20] sm:$0xff]  ;;  %150 = vst.msk [vmem:[#allocation2 + $0x28] sm:$0xff] %vm144_vm0, %v2813_v12  ;;  %145 = vst.msk [vmem:[#allocation2] sm:$0xff] %vm144_vm0, %v2813_v12  ;;  %s2942_s18 = sld [smem:[#allocation6 + $0x85]]  ;;  %v342_v14 = vld [vmem:[#allocation10 + $0x10] sm:$0xff]  ;;  %v293_v19 = vcvt.s32.f32 %v292_v10  ;;  %vm156_vm1 = vcmask 122880  }
  0x47   :  { %2511 = vmatprep.subr.mxu1 %v345_v9  ;;  %470 = vmatprep.mubr.f32.mxu1 %v2813_v12  ;;  %146 = vst.msk [vmem:[#allocation2 + $0x8] sm:$0xff] %vm144_vm0, %v2813_v12  ;;  %147 = vst.msk [vmem:[#allocation2 + $0x10] sm:$0xff] %vm144_vm0, %v2813_v12  ;;  %v2411_v15 = vld [vmem:[%s3928_s1 + $0xf] sm:$0x1]  ;;  %v314_v16 = vld [vmem:[%s3928_s1 + $0x7] sm:$0x1] }
  0x48   :  { %148 = vst.msk [vmem:[#allocation2 + $0x18] sm:$0xff] %vm144_vm0, %v2813_v12  ;;  %149 = vst.msk [vmem:[#allocation2 + $0x20] sm:$0xff] %vm144_vm0, %v2813_v12  ;;  %2514 = vmatpush1.msra.mxu1 %v344_v11  ;;  %408 = vmatprep.subr.mxu0 %v345_v9  ;;  %s2950_s22 = sld [smem:[#allocation6 + $0x84]]  ;;  %v341_v17 = vld [vmem:[#allocation10 + $0x8] sm:$0xff]  ;;  %v340_v20 = vld [vmem:[#allocation10] sm:$0xff]  ;;  %v326_v24 = vcvt.s32.f32 %v2411_v15  ;;  %v315_v25 = vcvt.s32.f32 %v314_v16  ;;  %vm164_vm2 = vcmask 147584  }
  0x49   :  { %151 = vst.msk [vmem:[#allocation2 + $0x30] sm:$0xff] %vm144_vm0, %v2813_v12  ;;  %152 = vst.msk [vmem:[#allocation2 + $0x38] sm:$0xff] %vm144_vm0, %v2813_v12  ;;  %2512 = vmatprep.subr.mxu1 %v343_v13  ;;  %409 = vmatpush1.msra.mxu0 %v344_v11  ;;  %s2954_s23 = sld [smem:[#allocation6 + $0x86]]  ;;  %v2961_v21 = vld [vmem:[%s3931_s4 + $0x34] ss:$8 sps:$4 sm:$0xff]   ;;  %v2814_v62 = vmov 0  }
  0x4a   :  { %284 = vrot.lane.b32.xlu1 %v282_v6, %s2806_s24  ;;  %262 = vrot.lane.b32.xlu0 %v260_v7, %s2806_s24  ;;  %s2956_s7 = sld [smem:[#allocation6 + $0x6]]  ;;  %s267_s28 = scalar_lea.vmem %s3929_s2, %s2918_s13  ;;  %v2390_v22 = vld [vmem:[%s3928_s1 + $0x8] sm:$0x1]  ;;  %v158_v26 = vld [vmem:[%s3928_s1] sm:$0x1]  ;;  %v3122_v1 = vand.u32 127, %v108_v63 }
  0x4b   :  { %2515 = vmatpush1.msra.mxu1 %v342_v14  ;;  %410 = vmatprep.subr.mxu0 %v343_v13  ;;  %s2967_s9 = sld [smem:[#allocation6 + $0x87]]  ;;  %v268_v23 = vld [vmem:[%s267_s28] sm:$0x1]  ;;  %s245_s14 = scalar_lea.vmem %s3929_s2, %s2923_s15  ;;  %v172_v31 = vcvt.s32.f32 %v2390_v22  ;;  %v159_v32 = vcvt.s32.f32 %v158_v26  ;;  %v565_v42 = vld [vmem:[%s3931_s4 + $0x30] sm:$0xff]  ;;  %v566_v43 = vld [vmem:[%s3931_s4 + $0x38] sm:$0xff]  ;;  %v3126_v3 = vshrl.u32 %v108_v63, 7 }
  0x4c   :  { %2513 = vmatprep.subr.mxu1 %v341_v17  ;;  %411 = vmatpush1.msra.mxu0 %v342_v14  ;;  %s2976_s19 = sld [smem:[#allocation6 + $0x7]]  ;;  %269 = vst.msk [vmem:[#allocation2 + $0x28] sm:$0x1] %vm156_vm1, %v268_v23  ;;  %v246_v27 = vld [vmem:[%s245_s14] sm:$0x1]  ;;  %s278_s3 = scalar_lea.vmem %s3929_s2, %s2942_s18  ;;  %v3048_v46 = vcombine.low %v565_v42, %v566_v43  ;;  %v110_v5 = vadd.s32 128, %v3122_v1 }
  0x4d   :  { %2516 = vmatpush1.msra.mxu1 %v340_v20  ;;  %412 = vmatprep.subr.mxu0 %v341_v17  ;;  %s2988_s25 = sld [smem:[#allocation6 + $0x80]]  ;;  %247 = vst.msk [vmem:[#allocation2 + $0x20] sm:$0x1] %vm156_vm1, %v246_v27  ;;  %v279_v28 = vld [vmem:[%s278_s3] sm:$0x1]  ;;  %v350_v7 = vsub.s32 0, %v3126_v3 }
  0x4e   :  { %306 = vrot.lane.b32.xlu1 %v304_v18, %s2806_s24  ;;  %295 = vrot.lane.b32.xlu0 %v293_v19, %s2806_s24  ;;  %s256_s0 = scalar_lea.vmem %s3929_s2, %s2950_s22  ;;  %s2996_s28 = sld [smem:[#allocation6]]  ;;  %280 = vst.msk [vmem:[#allocation2 + $0x29] sm:$0x1] %vm156_vm1, %v279_v28  ;;  %v3053_v47 = vld [vmem:[%s3931_s4 + $0x24] ss:$8 sps:$4 sm:$0xff]   ;;  %v115_v8 = vand.u32 63, %v3122_v1 }
  0x4f   :  { %621 = vmatprep.subr.bf16.mxu1 %v2961_v21  ;;  %413 = vmatpush1.msra.mxu0 %v340_v20  ;;  %v257_v29 = vld [vmem:[%s256_s0] sm:$0x1]  ;;  %s300_s30 = scalar_lea.vmem %s3929_s2, %s2954_s23  ;;  %v3069_v52 = vld [vmem:[%s3931_s4 + $0x14] ss:$8 sps:$4 sm:$0xff]   ;;  %v3079_v56 = vld [vmem:[%s3931_s4 + $0x10] ss:$8 sps:$4 sm:$0xff]  }
  0x50   :  { %446 = vmatprep.mubr.f32.mxu0 %v2813_v12  ;;  %767 = vmatprep.subr.bf16.mxu0 %v2961_v21  ;;  %258 = vst.msk [vmem:[#allocation2 + $0x21] sm:$0x1] %vm156_vm1, %v257_v29  ;;  %v301_v30 = vld [vmem:[%s300_s30] sm:$0x1]  ;;  %s289_s6 = scalar_lea.vmem %s3929_s2, %s2956_s7  ;;  %v3085_v57 = vld [vmem:[%s3931_s4 + $0x4] ss:$8 sps:$4 sm:$0xff]  }
  0x51   :  { %302 = vst.msk [vmem:[#allocation2 + $0x31] sm:$0x1] %vm156_vm1, %v301_v30  ;;  %v290_v33 = vld [vmem:[%s289_s6] sm:$0x1]  ;;  %s322_s13 = scalar_lea.vmem %s3929_s2, %s2967_s9  ;;  %v354_v11 = vsub.s32 1, %v3126_v3  ;;  %v122_v13 = vand.u32 63, %v110_v5 }
  0x52   :  { %328 = vrot.lane.b32.xlu1 %v326_v24, %s2806_s24  ;;  %317 = vrot.lane.b32.xlu0 %v315_v25, %s2806_s24  ;;  %291 = vst.msk [vmem:[#allocation2 + $0x30] sm:$0x1] %vm156_vm1, %v290_v33  ;;  %v323_v34 = vld [vmem:[%s322_s13] sm:$0x1]  ;;  %s311_s7 = scalar_lea.vmem %s3929_s2, %s2976_s19  ;;  %vm3147_vm3 = vcmp.lt.s32.totalorder %v115_v8, 32  ;;  %vm138_vm5 = vcmp.lt.s32.totalorder %v110_v5, 192 }
  0x53   :  { %324 = vst.msk [vmem:[#allocation2 + $0x39] sm:$0x1] %vm156_vm1, %v323_v34  ;;  %v312_v35 = vld [vmem:[%s311_s7] sm:$0x1]  ;;  %s167_s26 = scalar_lea.vmem %s3929_s2, %s2988_s25  ;;  %vm3161_vm4 = vcmp.lt.s32.totalorder %v122_v13, 32  ;;  %v2815_v34 = vmov 1.0  }
  0x54   :  { %313 = vst.msk [vmem:[#allocation2 + $0x38] sm:$0x1] %vm156_vm1, %v312_v35  ;;  %v168_v36 = vld [vmem:[%s167_s26] sm:$0x1]  ;;  %s154_s9 = scalar_lea.vmem %s3929_s2, %s2996_s28  ;;  %v3188_v35 = vsel %vm138_vm5, 0.5, %v2815_v34  ;;  %v3193_v42 = vsel %vm138_vm5, 0.5, %v2813_v12 }
  0x55   :  { %169 = vst.msk [vmem:[#allocation2 + $0x1] sm:$0x1] %vm156_vm1, %v168_v36  ;;  %v155_v37 = vld [vmem:[%s154_s9] sm:$0x1]  ;;  %s2816_s27 = smov 64   ;;  %s2392_s0 = sld [smem:[#allocation6 + $0x81]] }
  0x56   :  { %174 = vrot.lane.b32.xlu1 %v172_v31, %s2806_s24  ;;  %161 = vrot.lane.b32.xlu0 %v159_v32, %s2806_s24  ;;  %157 = vst.msk [vmem:[#allocation2] sm:$0x1] %vm156_vm1, %v155_v37  ;;  %v3063_v51 = vld [vmem:[%s3931_s4 + $0x20] ss:$8 sps:$4 sm:$0xff]   ;;  %s2391_s9 = sld [smem:[#allocation6 + $0x1]]  ;;  %vm609_vm6 = vcmask 523264  }
  0x57   :  { %v3093_v59 = vld [vmem:[%s3931_s4] ss:$8 sps:$4 sm:$0xff]   ;;  %s2394_s20 = sld [smem:[#allocation6 + $0x2]]  ;;  %vm143_vm7 = vcmp.lt.s32.totalorder %v3122_v1, 32 }
  0x58   :  { %v346_v9 = vld [vmem:[%s3932_s5] sm:$0x3]  ;;  %s2395_s21 = sld [smem:[#allocation6 + $0x82]] }
  0x59   :  { %v3145_v15 = vrot.slane %v346_v9, %v350_v7  ;;  %v3153_v19 = vrot.slane %v346_v9, %v354_v11  ;;  %s2397_s7 = sld [smem:[#allocation6 + $0x3]] }
  0x5a   :  { %s2398_s15 = sld [smem:[#allocation6 + $0x83]] }
  0x5b   :  { %s190_s28 = scalar_lea.vmem %s3929_s2, %s2392_s0 }
  0x5c   :  { %s179_s30 = scalar_lea.vmem %s3929_s2, %s2391_s9 }
  0x5d   :  { %s201_s5 = scalar_lea.vmem %s3929_s2, %s2394_s20 }
  0x5e   :  { %s212_s9 = scalar_lea.vmem %s3929_s2, %s2395_s21 }
  0xb8   :  { %v274_v38 = vpop.permute.xlu1 %273  ;;  %v252_v39 = vpop.permute.xlu0 %251 }
  0xb9   :  { %276 = vst.msk [vmem:[#allocation2 + $0x28] sm:$0x1] %vm164_vm2, %v274_v38  ;;  %254 = vst.msk [vmem:[#allocation2 + $0x20] sm:$0x1] %vm164_vm2, %v252_v39 }
  0xbc   :  { %v285_v40 = vpop.permute.xlu1 %284  ;;  %v263_v41 = vpop.permute.xlu0 %262 }
  0xbd   :  { %287 = vst.msk [vmem:[#allocation2 + $0x29] sm:$0x1] %vm164_vm2, %v285_v40  ;;  %265 = vst.msk [vmem:[#allocation2 + $0x21] sm:$0x1] %vm164_vm2, %v263_v41 }
  0xc0   :  { %v307_v44 = vpop.permute.xlu1 %306  ;;  %v296_v45 = vpop.permute.xlu0 %295 }
  0xc1   :  { %309 = vst.msk [vmem:[#allocation2 + $0x31] sm:$0x1] %vm164_vm2, %v307_v44  ;;  %298 = vst.msk [vmem:[#allocation2 + $0x30] sm:$0x1] %vm164_vm2, %v296_v45  ;;  %v182_v44 = vld [vmem:[%s3928_s1 + $0x1] sm:$0x1] }
  0xc4   :  { %v329_v48 = vpop.permute.xlu1 %328  ;;  %v318_v49 = vpop.permute.xlu0 %317  ;;  %v336_v50 = vld [vmem:[#allocation2 + $0x20] sm:$0xff]  ;;  %v337_v55 = vld [vmem:[#allocation2 + $0x28] sm:$0xff] }
  0xc5   :  { %331 = vst.msk [vmem:[#allocation2 + $0x39] sm:$0x1] %vm164_vm2, %v329_v48  ;;  %320 = vst.msk [vmem:[#allocation2 + $0x38] sm:$0x1] %vm164_vm2, %v318_v49  ;;  %2416 = vmatmul.mubr.msk.f32.vlgmr.msra.gmra.mxu1 %vm144_vm0, %v336_v50  ;;  %v183_v48 = vcvt.s32.f32 %v182_v44 }
  0xc6   :  { %622 = vmatpush1.bf16.msra.mxu1 %v3048_v46  ;;  %476 = vmatprep.mubr.f32.mxu1 %v2813_v12 }
  0xc7   :  { %623 = vmatprep.subr.bf16.mxu1 %v3053_v47 }
  0xc8   :  { %v175_v53 = vpop.permute.xlu1 %174  ;;  %v162_v54 = vpop.permute.xlu0 %161  ;;  %v338_v58 = vld [vmem:[#allocation2 + $0x30] sm:$0xff] }
  0xc9   :  { %177 = vst.msk [vmem:[#allocation2 + $0x1] sm:$0x1] %vm164_vm2, %v175_v53  ;;  %165 = vst.msk [vmem:[#allocation2] sm:$0x1] %vm164_vm2, %v162_v54  ;;  %2417 = vmatmul.mubr.msk.f32.gmra.mxu1 %vm144_vm0, %v337_v55  ;;  %v191_v53 = vld [vmem:[%s190_s28] sm:$0x1]  ;;  %s223_s28 = scalar_lea.vmem %s3929_s2, %s2397_s7 }
  0xca   :  { %624 = vmatpush1.bf16.msra.mxu1 %v3063_v51  ;;  %482 = vmatprep.mubr.f32.mxu1 %v2813_v12  ;;  %192 = vst.msk [vmem:[#allocation2 + $0x9] sm:$0x1] %vm156_vm1, %v191_v53  ;;  %v180_v54 = vld [vmem:[%s179_s30] sm:$0x1]  ;;  %s234_s30 = scalar_lea.vmem %s3929_s2, %s2398_s15 }
  0xcb   :  { %625 = vmatprep.subr.bf16.mxu1 %v3069_v52  ;;  %181 = vst.msk [vmem:[#allocation2 + $0x8] sm:$0x1] %vm156_vm1, %v180_v54 }
  0xcc   :  { %v339_v61 = vld [vmem:[#allocation2 + $0x38] sm:$0xff] }
  0xcd   :  { %2418 = vmatmul.mubr.msk.f32.gmra.mxu1 %vm144_vm0, %v338_v58 }
  0xce   :  { %626 = vmatpush1.bf16.msra.mxu1 %v3079_v56  ;;  %488 = vmatprep.mubr.f32.mxu1 %v2813_v12 }
  0xcf   :  { %627 = vmatprep.subr.bf16.mxu1 %v3085_v57 }
  0xd0   :  { %v332_v60 = vld [vmem:[#allocation2] sm:$0xff] }
  0xd1   :  { %2412 = vmatmul.mubr.msk.f32.vlgmr.msra.gmra.mxu0 %vm144_vm0, %v332_v60  ;;  %2419 = vmatmul.mubr.msk.f32.gmra.mxu1 %vm144_vm0, %v339_v61  ;;  %v2393_v61 = vld [vmem:[%s3928_s1 + $0x9] sm:$0x1] }
  0xd2   :  { %628 = vmatpush1.bf16.msra.mxu1 %v3093_v59  ;;  %645 = vmatprep.mubr.bf16.mxu1 %v2814_v62  ;;  %v194_v5 = vcvt.s32.f32 %v2393_v61 }
  0xd3   :  { %452 = vmatprep.mubr.f32.mxu0 %v2813_v12  ;;  %694 = vmatprep.subr.bf16.mxu1 %v2961_v21 }
  0xd4   :  { %768 = vmatpush1.bf16.msra.mxu0 %v3048_v46 }
  0xd5   :  { %646 = vmatmul.mubr.bf16.vlgmr.msra.gmra.mxu1 %v2814_v62  ;;  %769 = vmatprep.subr.bf16.mxu0 %v3053_v47 }
  0xd6   :  { %695 = vmatpush1.bf16.msra.mxu1 %v3048_v46  ;;  %718 = vmatprep.mubr.bf16.mxu1 %v2814_v62 }
  0xd7   :  { %696 = vmatprep.subr.bf16.mxu1 %v3053_v47 }
  0xd8   :  { %770 = vmatpush1.bf16.msra.mxu0 %v3063_v51 }
  0xd9   :  { %771 = vmatprep.subr.bf16.mxu0 %v3069_v52 }
  0xda   :  { %697 = vmatpush1.bf16.msra.mxu1 %v3063_v51 }
  0xdb   :  { %698 = vmatprep.subr.bf16.mxu1 %v3069_v52 }
  0xdc   :  { %772 = vmatpush1.bf16.msra.mxu0 %v3079_v56 }
  0xdd   :  { %773 = vmatprep.subr.bf16.mxu0 %v3085_v57 }
  0xde   :  { %699 = vmatpush1.bf16.msra.mxu1 %v3079_v56 }
  0xdf   :  { %700 = vmatprep.subr.bf16.mxu1 %v3085_v57 }
  0xe0   :  { %774 = vmatpush1.bf16.msra.mxu0 %v3093_v59 }
  0xe1   :  { %913 = vmatprep.subr.bf16.mxu0 %v2961_v21 }
  0xe2   :  { %701 = vmatpush1.bf16.msra.mxu1 %v3093_v59 }
  0xe3   :  { %840 = vmatprep.subr.bf16.mxu1 %v2961_v21 }
 0x185   :  { %v3120_v0 = vpop.f32.mrf.mxu1 }
 0x187   :  { %v3124_v2 = vpop.f32.mrf.mxu1 }
 0x189   :  { %v3128_v4 = vpop.f32.mrf.mxu1 }
 0x18b   :  { %v3131_v6 = vpop.f32.mrf.mxu1 }
 0x18d   :  { %v3138_v10 = vpop.f32.mrf.mxu1 }
 0x18e   :  { %v3236_v34 = vadd.f32 %v3138_v10, %v3145_v15 }
 0x18f   :  { %v3141_v14 = vpop.f32.mrf.mxu1 }
 0x191   :  { %v448_v17 = vpop.f32.mrf.mxu0  ;;  %v490_v18 = vpop.f32.mrf.mxu1 }
 0x192   :  { %v3156_v20 = vadd.f32 %v448_v17, %v3145_v15  ;;  %v3159_v22 = vadd.f32 %v490_v18, %v3145_v15 }
 0x193   :  { %v450_v24 = vpop.f32.mrf.mxu0  ;;  %v492_v25 = vpop.f32.mrf.mxu1 }
 0x194   :  { %v3166_v26 = vadd.f32 %v450_v24, %v3153_v19  ;;  %v3169_v27 = vadd.f32 %v492_v25, %v3153_v19  ;;  %v515_v28 = vsel %vm3147_vm3, %v3156_v20, %v3159_v22  ;;  %v519_v29 = vsel %vm3147_vm3, %v3159_v22, %v3156_v20 }
 0x195   :  { %v647_v30 = vpop.f32.mrf.mxu1 }
 0x196   :  { %v648_v31 = vadd.f32 %v647_v30, %v515_v28  ;;  %v516_v32 = vsel %vm3161_vm4, %v3166_v26, %v3169_v27  ;;  %v520_v33 = vsel %vm3161_vm4, %v3169_v27, %v3166_v26 }
 0x197   :  { %v649_v36 = vpop.f32.mrf.mxu1 }
 0x198   :  { %v650_v37 = vadd.f32 %v649_v36, %v516_v32  ;;  %v654_v49 = vmul.f32 0.5, %v648_v31 }
 0x199   :  { %v651_v38 = vpop.f32.mrf.mxu1 }
 0x19a   :  { %v655_v39 = vmul.f32 %v650_v37, %v3188_v35  ;;  %v3243_v38 = vadd.f32 %v3141_v14, %v3153_v19 }
 0x19b   :  { %v652_v40 = vpop.f32.mrf.mxu1 }
 0x19c   :  { %2554 = vtanh.f32 %v655_v39 }
 0x19d   :  { %2556 = vtanh.f32 %v654_v49 }
 0x1a9   :  { %v2555_v41 = vpop.eup %2554 }
 0x1aa   :  { %v659_v43 = vmul.f32 %v2555_v41, %v3188_v35  ;;  %v2557_v50 = vpop.eup %2556 }
 0x1ab   :  { %v658_v55 = vmul.f32 0.5, %v2557_v50 }
 0x1ac   :  { %v661_v45 = vadd.f32 %v659_v43, %v3193_v42 }
 0x1ad   :  { %v660_v58 = vadd.f32 0.5, %v658_v55 }
 0x1ae   :  { %664 = vrot.lane.b32.xlu0 %v661_v45, %s2816_s27 }
 0x1af   :  { %v662_v9 = vmul.f32 0.0, %v660_v58 }
 0x1b2   :  { %185 = vrot.lane.b32.xlu0 %v183_v48, %s2806_s24 }
 0x220   :  { %v665_v60 = vpop.permute.xlu0 %664 }
 0x221   :  { %v667_v63 = vmul.f32 %v665_v60, %v660_v58  ;;  %v204_v58 = vld [vmem:[%s3928_s1 + $0x2] sm:$0x1] }
 0x222   :  { %v205_v61 = vcvt.s32.f32 %v204_v58 }
 0x223   :  { %669 = vrot.lane.b32.xlu1 %v667_v63, %s2816_s27  ;;  %v226_v63 = vld [vmem:[%s3928_s1 + $0x3] sm:$0x1] }
 0x224   :  { %v186_v8 = vpop.permute.xlu0 %185 }
 0x225   :  { %188 = vst.msk [vmem:[#allocation2 + $0x8] sm:$0x1] %vm164_vm2, %v186_v8 }
 0x227   :  { %196 = vrot.lane.b32.xlu1 %v194_v5, %s2806_s24  ;;  %v227_v5 = vcvt.s32.f32 %v226_v63 }
 0x295   :  { %v670_v13 = vpop.permute.xlu1 %669 }
 0x296   :  { %v3216_v17 = vadd.f32 %v670_v13, %v662_v9  ;;  %v202_v13 = vld [vmem:[%s201_s5] sm:$0x1] }
 0x297   :  { %203 = vst.msk [vmem:[#allocation2 + $0x10] sm:$0x1] %vm156_vm1, %v202_v13 }
 0x298   :  { %2558 = vtanh.f32 %v3216_v17 }
 0x299   :  { %v197_v18 = vpop.permute.xlu1 %196 }
 0x29a   :  { %199 = vst.msk [vmem:[#allocation2 + $0x9] sm:$0x1] %vm164_vm2, %v197_v18  ;;  %v213_v18 = vld [vmem:[%s212_s9] sm:$0x1] }
 0x29b   :  { %214 = vst.msk [vmem:[#allocation2 + $0x11] sm:$0x1] %vm156_vm1, %v213_v18  ;;  %v3334_v18 = vadd.f32 %v3131_v6, %v3153_v19 }
 0x2a1   :  { %v333_v24 = vld [vmem:[#allocation2 + $0x8] sm:$0xff] }
 0x2a2   :  { %2413 = vmatmul.mubr.msk.f32.gmra.mxu0 %vm144_vm0, %v333_v24 }
 0x2a3   :  { %458 = vmatprep.mubr.f32.mxu0 %v2813_v12 }
 0x2a5   :  { %v2559_v25 = vpop.eup %2558 }
 0x2a6   :  { %675 = vrot.lane.b32.xlu0 %v2559_v25, %s2816_s27  ;;  %v224_v25 = vld [vmem:[%s223_s28] sm:$0x1] }
 0x2a7   :  { %225 = vst.msk [vmem:[#allocation2 + $0x18] sm:$0x1] %vm156_vm1, %v224_v25 }
 0x318   :  { %v676_v28 = vpop.permute.xlu0 %675 }
 0x319   :  { %v678_v30 = vmul.f32 %v676_v28, %v661_v45  ;;  %v235_v28 = vld [vmem:[%s234_s30] sm:$0x1] }
 0x31a   :  { %236 = vst.msk [vmem:[#allocation2 + $0x19] sm:$0x1] %vm156_vm1, %v235_v28 }
 0x31b   :  { %679 = vst.msk [vmem:[#allocation4] sm:$0xff] %vm609_vm6, %v678_v30  ;;  %v680_v31 = vpack.c.bf16 %v678_v30, %v678_v30 }
 0x31d   :  { %2428 = vmatmul.mubr.msk.bf16.vlgmr.msra.gmra.mxu1 %vm609_vm6, %v680_v31 }
 0x31e   :  { %841 = vmatpush1.bf16.msra.mxu1 %v3048_v46  ;;  %864 = vmatprep.mubr.bf16.mxu1 %v2814_v62 }
 0x31f   :  { %842 = vmatprep.subr.bf16.mxu1 %v3053_v47 }
 0x322   :  { %843 = vmatpush1.bf16.msra.mxu1 %v3063_v51 }
 0x323   :  { %844 = vmatprep.subr.bf16.mxu1 %v3069_v52 }
 0x326   :  { %845 = vmatpush1.bf16.msra.mxu1 %v3079_v56 }
 0x327   :  { %846 = vmatprep.subr.bf16.mxu1 %v3085_v57 }
 0x32a   :  { %847 = vmatpush1.bf16.msra.mxu1 %v3093_v59 }
 0x32b   :  { %986 = vmatprep.subr.bf16.mxu1 %v2961_v21 }
 0x362   :  { %v454_v32 = vpop.f32.mrf.mxu0 }
 0x363   :  { %v3239_v36 = vadd.f32 %v454_v32, %v3145_v15  ;;  %v2396_v32 = vld [vmem:[%s3928_s1 + $0xa] sm:$0x1] }
 0x364   :  { %v456_v37 = vpop.f32.mrf.mxu0 }
 0x365   :  { %v3246_v39 = vadd.f32 %v456_v37, %v3153_v19  ;;  %v527_v40 = vsel %vm3147_vm3, %v3239_v36, %v3236_v34  ;;  %v531_v10 = vsel %vm3147_vm3, %v3236_v34, %v3239_v36 }
 0x367   :  { %v532_v41 = vsel %vm3161_vm4, %v3243_v38, %v3246_v39  ;;  %v528_v44 = vsel %vm3161_vm4, %v3246_v39, %v3243_v38 }
 0x3dd   :  { %v720_v14 = vpop.f32.mrf.mxu1 }
 0x3de   :  { %v721_v43 = vadd.f32 %v720_v14, %v527_v40  ;;  %v216_v40 = vcvt.s32.f32 %v2396_v32  ;;  %v2399_v14 = vld [vmem:[%s3928_s1 + $0xb] sm:$0x1] }
 0x3df   :  { %v722_v45 = vpop.f32.mrf.mxu1 }
 0x3e0   :  { %v723_v48 = vadd.f32 %v722_v45, %v528_v44  ;;  %v727_v8 = vmul.f32 0.5, %v721_v43  ;;  %v238_v44 = vcvt.s32.f32 %v2399_v14 }
 0x3e1   :  { %v724_v49 = vpop.f32.mrf.mxu1 }
 0x3e2   :  { %v728_v50 = vmul.f32 %v723_v48, %v3188_v35 }
 0x3e3   :  { %v725_v53 = vpop.f32.mrf.mxu1 }
 0x3e4   :  { %2560 = vtanh.f32 %v728_v50 }
 0x3e5   :  { %2562 = vtanh.f32 %v727_v8  ;;  %v3327_v8 = vadd.f32 %v3128_v4, %v3145_v15 }
 0x3f1   :  { %v2561_v54 = vpop.eup %2560 }
 0x3f2   :  { %v732_v55 = vmul.f32 %v2561_v54, %v3188_v35  ;;  %v2563_v9 = vpop.eup %2562 }
 0x3f3   :  { %v731_v24 = vmul.f32 0.5, %v2563_v9 }
 0x3f4   :  { %v734_v60 = vadd.f32 %v732_v55, %v3193_v42 }
 0x3f5   :  { %v733_v30 = vadd.f32 0.5, %v731_v24 }
 0x3f6   :  { %737 = vrot.lane.b32.xlu1 %v734_v60, %s2816_s27 }
 0x3f7   :  { %v735_v48 = vmul.f32 %v733_v30, %v3216_v17 }
 0x3fa   :  { %207 = vrot.lane.b32.xlu1 %v205_v61, %s2806_s24 }
 0x3fe   :  { %229 = vrot.lane.b32.xlu1 %v227_v5, %s2806_s24 }
 0x468   :  { %v738_v31 = vpop.permute.xlu1 %737 }
 0x469   :  { %v740_v37 = vmul.f32 %v738_v31, %v733_v30  ;;  %v3349_v30 = vadd.f32 %v3120_v0, %v3145_v15 }
 0x46b   :  { %742 = vrot.lane.b32.xlu0 %v740_v37, %s2816_s27  ;;  %v3360_v37 = vadd.f32 %v3124_v2, %v3153_v19 }
 0x46c   :  { %v208_v43 = vpop.permute.xlu1 %207 }
 0x46d   :  { %210 = vst.msk [vmem:[#allocation2 + $0x10] sm:$0x1] %vm164_vm2, %v208_v43 }
 0x46f   :  { %218 = vrot.lane.b32.xlu0 %v216_v40, %s2806_s24 }
 0x470   :  { %v230_v45 = vpop.permute.xlu1 %229 }
 0x471   :  { %232 = vst.msk [vmem:[#allocation2 + $0x18] sm:$0x1] %vm164_vm2, %v230_v45 }
 0x473   :  { %240 = vrot.lane.b32.xlu0 %v238_v44, %s2806_s24 }
 0x4dd   :  { %v743_v49 = vpop.permute.xlu0 %742 }
 0x4de   :  { %v3304_v50 = vadd.f32 %v743_v49, %v735_v48 }
 0x4e0   :  { %2564 = vtanh.f32 %v3304_v50 }
 0x4e1   :  { %v219_v53 = vpop.permute.xlu0 %218 }
 0x4e2   :  { %221 = vst.msk [vmem:[#allocation2 + $0x11] sm:$0x1] %vm164_vm2, %v219_v53 }
 0x4e5   :  { %v241_v54 = vpop.permute.xlu0 %240 }
 0x4e6   :  { %243 = vst.msk [vmem:[#allocation2 + $0x19] sm:$0x1] %vm164_vm2, %v241_v54 }
 0x4e9   :  { %v334_v55 = vld [vmem:[#allocation2 + $0x10] sm:$0xff] }
 0x4ea   :  { %2414 = vmatmul.mubr.msk.f32.gmra.mxu0 %vm144_vm0, %v334_v55 }
 0x4eb   :  { %464 = vmatprep.mubr.f32.mxu0 %v2813_v12 }
 0x4ed   :  { %v2565_v58 = vpop.eup %2564  ;;  %v335_v61 = vld [vmem:[#allocation2 + $0x18] sm:$0xff] }
 0x4ee   :  { %2415 = vmatmul.mubr.msk.f32.gmra.mxu0 %vm144_vm0, %v335_v61  ;;  %748 = vrot.lane.b32.xlu1 %v2565_v58, %s2816_s27 }
 0x4ef   :  { %791 = vmatprep.mubr.bf16.mxu0 %v2814_v62 }
 0x560   :  { %v749_v17 = vpop.permute.xlu1 %748 }
 0x561   :  { %v751_v63 = vmul.f32 %v749_v17, %v734_v60 }
 0x563   :  { %752 = vst.msk [vmem:[#allocation4 + $0x8] sm:$0xff] %vm609_vm6, %v751_v63  ;;  %v753_v5 = vpack.c.bf16 %v751_v63, %v751_v63 }
 0x565   :  { %2429 = vmatmul.mubr.msk.bf16.vlgmr.msra.gmra.mxu0 %vm609_vm6, %v753_v5 }
 0x566   :  { %914 = vmatpush1.bf16.msra.mxu0 %v3048_v46  ;;  %937 = vmatprep.mubr.bf16.mxu0 %v2814_v62 }
 0x567   :  { %915 = vmatprep.subr.bf16.mxu0 %v3053_v47 }
 0x56a   :  { %916 = vmatpush1.bf16.msra.mxu0 %v3063_v51 }
 0x56b   :  { %917 = vmatprep.subr.bf16.mxu0 %v3069_v52 }
 0x56e   :  { %918 = vmatpush1.bf16.msra.mxu0 %v3079_v56 }
 0x56f   :  { %919 = vmatprep.subr.bf16.mxu0 %v3085_v57 }
 0x572   :  { %920 = vmatpush1.bf16.msra.mxu0 %v3093_v59 }
 0x573   :  { %1059 = vmatprep.subr.bf16.mxu0 %v2961_v21 }
 0x5aa   :  { %v460_v60 = vpop.f32.mrf.mxu0 }
 0x5ab   :  { %v3330_v9 = vadd.f32 %v460_v60, %v3145_v15 }
 0x5ac   :  { %v462_v13 = vpop.f32.mrf.mxu0 }
 0x5ad   :  { %v3337_v24 = vadd.f32 %v462_v13, %v3153_v19  ;;  %v539_v25 = vsel %vm3147_vm3, %v3330_v9, %v3327_v8  ;;  %v543_v4 = vsel %vm3147_vm3, %v3327_v8, %v3330_v9 }
 0x5ae   :  { %v466_v28 = vpop.f32.mrf.mxu0 }
 0x5af   :  { %v3352_v6 = vadd.f32 %v466_v28, %v3145_v15  ;;  %v544_v31 = vsel %vm3161_vm4, %v3334_v18, %v3337_v24 }
 0x5b0   :  { %v468_v32 = vpop.f32.mrf.mxu0 }
 0x5b1   :  { %v3363_v40 = vadd.f32 %v468_v32, %v3153_v19  ;;  %v551_v0 = vsel %vm3147_vm3, %v3352_v6, %v3349_v30  ;;  %v555_v15 = vsel %vm3147_vm3, %v3349_v30, %v3352_v6  ;;  %v540_v19 = vsel %vm3161_vm4, %v3337_v24, %v3334_v18 }
 0x5b3   :  { %v556_v14 = vsel %vm3161_vm4, %v3360_v37, %v3363_v40 }
 0x625   :  { %v793_v2 = vpop.f32.mrf.mxu0 }
 0x626   :  { %v794_v43 = vadd.f32 %v793_v2, %v539_v25 }
 0x627   :  { %v795_v44 = vpop.f32.mrf.mxu0 }
 0x628   :  { %v796_v45 = vadd.f32 %v795_v44, %v540_v19  ;;  %v800_v61 = vmul.f32 0.5, %v794_v43 }
 0x629   :  { %v797_v48 = vpop.f32.mrf.mxu0 }
 0x62a   :  { %v801_v49 = vmul.f32 %v796_v45, %v3188_v35  ;;  %v552_v48 = vsel %vm3161_vm4, %v3363_v40, %v3360_v37 }
 0x62b   :  { %v798_v53 = vpop.f32.mrf.mxu0 }
 0x62c   :  { %2566 = vtanh.f32 %v801_v49 }
 0x62d   :  { %2568 = vtanh.f32 %v800_v61 }
 0x639   :  { %v2567_v54 = vpop.eup %2566 }
 0x63a   :  { %v805_v55 = vmul.f32 %v2567_v54, %v3188_v35  ;;  %v2569_v17 = vpop.eup %2568 }
 0x63b   :  { %v804_v63 = vmul.f32 0.5, %v2569_v17 }
 0x63c   :  { %v807_v58 = vadd.f32 %v805_v55, %v3193_v42 }
 0x63d   :  { %v806_v5 = vadd.f32 0.5, %v804_v63 }
 0x63e   :  { %810 = vrot.lane.b32.xlu0 %v807_v58, %s2816_s27 }
 0x63f   :  { %v808_v25 = vmul.f32 %v806_v5, %v3304_v50 }
 0x6b0   :  { %v811_v60 = vpop.permute.xlu0 %810 }
 0x6b1   :  { %v813_v13 = vmul.f32 %v811_v60, %v806_v5 }
 0x6b3   :  { %815 = vrot.lane.b32.xlu1 %v813_v13, %s2816_s27 }
 0x725   :  { %v816_v28 = vpop.permute.xlu1 %815 }
 0x726   :  { %v818_v32 = vadd.f32 %v816_v28, %v808_v25 }
 0x728   :  { %2570 = vtanh.f32 %v818_v32 }
 0x735   :  { %v2571_v2 = vpop.eup %2570 }
 0x736   :  { %821 = vrot.lane.b32.xlu0 %v2571_v2, %s2816_s27 }
 0x7a8   :  { %v822_v19 = vpop.permute.xlu0 %821 }
 0x7a9   :  { %v824_v44 = vmul.f32 %v822_v19, %v807_v58 }
 0x7ab   :  { %825 = vst.msk [vmem:[#allocation4 + $0x10] sm:$0xff] %vm609_vm6, %v824_v44  ;;  %v826_v43 = vpack.c.bf16 %v824_v44, %v824_v44 }
 0x7ad   :  { %2430 = vmatmul.mubr.msk.bf16.vlgmr.msra.gmra.mxu1 %vm609_vm6, %v826_v43 }
 0x7ae   :  { %987 = vmatpush1.bf16.msra.mxu1 %v3048_v46  ;;  %1010 = vmatprep.mubr.bf16.mxu1 %v2814_v62 }
 0x7af   :  { %988 = vmatprep.subr.bf16.mxu1 %v3053_v47 }
 0x7b2   :  { %989 = vmatpush1.bf16.msra.mxu1 %v3063_v51 }
 0x7b3   :  { %990 = vmatprep.subr.bf16.mxu1 %v3069_v52 }
 0x7b6   :  { %991 = vmatpush1.bf16.msra.mxu1 %v3079_v56 }
 0x7b7   :  { %992 = vmatprep.subr.bf16.mxu1 %v3085_v57 }
 0x7ba   :  { %993 = vmatpush1.bf16.msra.mxu1 %v3093_v59 }
 0x7bb   :  { %1132 = vmatprep.subr.bf16.mxu1 %v2961_v21 }
 0x86d   :  { %v866_v50 = vpop.f32.mrf.mxu1 }
 0x86e   :  { %v867_v45 = vadd.f32 %v866_v50, %v551_v0 }
 0x86f   :  { %v868_v49 = vpop.f32.mrf.mxu1 }
 0x870   :  { %v869_v53 = vadd.f32 %v868_v49, %v552_v48  ;;  %v873_v21 = vmul.f32 0.5, %v867_v45 }
 0x871   :  { %v870_v54 = vpop.f32.mrf.mxu1 }
 0x872   :  { %v874_v55 = vmul.f32 %v869_v53, %v3188_v35 }
 0x873   :  { %v871_v58 = vpop.f32.mrf.mxu1 }
 0x874   :  { %2572 = vtanh.f32 %v874_v55 }
 0x875   :  { %2574 = vtanh.f32 %v873_v21 }
 0x881   :  { %v2573_v61 = vpop.eup %2572 }
 0x882   :  { %v878_v17 = vmul.f32 %v2573_v61, %v3188_v35  ;;  %v2575_v0 = vpop.eup %2574 }
 0x883   :  { %v877_v5 = vmul.f32 0.5, %v2575_v0 }
 0x884   :  { %v880_v63 = vadd.f32 %v878_v17, %v3193_v42 }
 0x885   :  { %v879_v60 = vadd.f32 0.5, %v877_v5 }
 0x886   :  { %883 = vrot.lane.b32.xlu1 %v880_v63, %s2816_s27 }
 0x887   :  { %v881_v28 = vmul.f32 %v879_v60, %v818_v32 }
 0x8f8   :  { %v884_v13 = vpop.permute.xlu1 %883 }
 0x8f9   :  { %v886_v25 = vmul.f32 %v884_v13, %v879_v60 }
 0x8fb   :  { %888 = vrot.lane.b32.xlu0 %v886_v25, %s2816_s27 }
 0x96d   :  { %v889_v2 = vpop.permute.xlu0 %888 }
 0x96e   :  { %v891_v19 = vadd.f32 %v889_v2, %v881_v28 }
 0x970   :  { %2576 = vtanh.f32 %v891_v19 }
 0x97d   :  { %v2577_v44 = vpop.eup %2576 }
 0x97e   :  { %894 = vrot.lane.b32.xlu1 %v2577_v44, %s2816_s27 }
 0x9f0   :  { %v895_v43 = vpop.permute.xlu1 %894 }
 0x9f1   :  { %v897_v50 = vmul.f32 %v895_v43, %v880_v63 }
 0x9f3   :  { %898 = vst.msk [vmem:[#allocation4 + $0x18] sm:$0xff] %vm609_vm6, %v897_v50  ;;  %v899_v45 = vpack.c.bf16 %v897_v50, %v897_v50 }
 0x9f5   :  { %2431 = vmatmul.mubr.msk.bf16.vlgmr.msra.gmra.mxu0 %vm609_vm6, %v899_v45 }
 0x9f6   :  { %1060 = vmatpush1.bf16.msra.mxu0 %v3048_v46  ;;  %1083 = vmatprep.mubr.bf16.mxu0 %v2814_v62 }
 0x9f7   :  { %1061 = vmatprep.subr.bf16.mxu0 %v3053_v47 }
 0x9fa   :  { %1062 = vmatpush1.bf16.msra.mxu0 %v3063_v51  ;;  %v1209_v2 = vld [vmem:[#allocation4 + $0x18] sm:$0xff] }
 0x9fb   :  { %1063 = vmatprep.subr.bf16.mxu0 %v3069_v52 }
 0x9fe   :  { %1064 = vmatpush1.bf16.msra.mxu0 %v3079_v56 }
 0x9ff   :  { %1065 = vmatprep.subr.bf16.mxu0 %v3085_v57 }
 0xa02   :  { %1066 = vmatpush1.bf16.msra.mxu0 %v3093_v59 }
 0xab5   :  { %v939_v32 = vpop.f32.mrf.mxu0 }
 0xab6   :  { %v940_v48 = vadd.f32 %v939_v32, %v555_v15 }
 0xab7   :  { %v941_v49 = vpop.f32.mrf.mxu0 }
 0xab8   :  { %v942_v53 = vadd.f32 %v941_v49, %v556_v14  ;;  %v946_v30 = vmul.f32 0.5, %v940_v48 }
 0xab9   :  { %v943_v54 = vpop.f32.mrf.mxu0 }
 0xaba   :  { %v947_v55 = vmul.f32 %v942_v53, %v3188_v35 }
 0xabb   :  { %v944_v58 = vpop.f32.mrf.mxu0 }
 0xabc   :  { %2578 = vtanh.f32 %v947_v55 }
 0xabd   :  { %2580 = vtanh.f32 %v946_v30 }
 0xac9   :  { %v2579_v61 = vpop.eup %2578 }
 0xaca   :  { %v951_v17 = vmul.f32 %v2579_v61, %v3188_v35  ;;  %v2581_v6 = vpop.eup %2580 }
 0xacb   :  { %v950_v15 = vmul.f32 0.5, %v2581_v6 }
 0xacc   :  { %v953_v63 = vadd.f32 %v951_v17, %v3193_v42  ;;  %v1203_v17 = vld [vmem:[#allocation4 + $0x10] sm:$0xff] }
 0xacd   :  { %v952_v21 = vadd.f32 0.5, %v950_v15 }
 0xace   :  { %956 = vrot.lane.b32.xlu0 %v953_v63, %s2816_s27 }
 0xacf   :  { %v954_v40 = vmul.f32 %v952_v21, %v891_v19 }
 0xb40   :  { %v957_v0 = vpop.permute.xlu0 %956 }
 0xb41   :  { %v959_v37 = vmul.f32 %v957_v0, %v952_v21 }
 0xb43   :  { %961 = vrot.lane.b32.xlu1 %v959_v37, %s2816_s27 }
 0xbb5   :  { %v962_v14 = vpop.permute.xlu1 %961 }
 0xbb6   :  { %v964_v5 = vadd.f32 %v962_v14, %v954_v40 }
 0xbb8   :  { %2582 = vtanh.f32 %v964_v5 }
 0xbc5   :  { %v2583_v60 = vpop.eup %2582 }
 0xbc6   :  { %967 = vrot.lane.b32.xlu0 %v2583_v60, %s2816_s27 }
 0xc38   :  { %v968_v13 = vpop.permute.xlu0 %967 }
 0xc39   :  { %v970_v25 = vmul.f32 %v968_v13, %v953_v63 }
 0xc3b   :  { %971 = vst.msk [vmem:[#allocation4 + $0x20] sm:$0xff] %vm609_vm6, %v970_v25  ;;  %v972_v28 = vpack.c.bf16 %v970_v25, %v970_v25 }
 0xc3d   :  { %2432 = vmatmul.mubr.msk.bf16.vlgmr.msra.gmra.mxu1 %vm609_vm6, %v972_v28 }
 0xc3e   :  { %1133 = vmatpush1.bf16.msra.mxu1 %v3048_v46  ;;  %1156 = vmatprep.mubr.bf16.mxu1 %v2814_v62 }
 0xc3f   :  { %1134 = vmatprep.subr.bf16.mxu1 %v3053_v47 }
 0xc42   :  { %v1210_v19 = vld [vmem:[#allocation4 + $0x20] sm:$0xff]  ;;  %1135 = vmatpush1.bf16.msra.mxu1 %v3063_v51 }
 0xc43   :  { %v1211_v44 = vsel %vm143_vm7, %v1209_v2, %v1210_v19  ;;  %v1213_v43 = vsel %vm143_vm7, %v1210_v19, %v1209_v2  ;;  %1136 = vmatprep.subr.bf16.mxu1 %v3069_v52 }
 0xc44   :  { %1212 = vst.msk [vmem:[#allocation4 + $0x18] sm:$0xff] %vm609_vm6, %v1211_v44  ;;  %1214 = vst.msk [vmem:[#allocation4 + $0x20] sm:$0xff] %vm609_vm6, %v1213_v43 }
 0xc46   :  { %1137 = vmatpush1.bf16.msra.mxu1 %v3079_v56 }
 0xc47   :  { %1138 = vmatprep.subr.bf16.mxu1 %v3085_v57 }
 0xc4a   :  { %1139 = vmatpush1.bf16.msra.mxu1 %v3093_v59 }
 0xcfd   :  { %v1012_v46 = vpop.f32.mrf.mxu1 }
 0xcfe   :  { %v1013_v47 = vadd.f32 %v1012_v46, %v543_v4 }
 0xcff   :  { %v1014_v51 = vpop.f32.mrf.mxu1 }
 0xd00   :  { %v1015_v52 = vadd.f32 %v1014_v51, %v544_v31  ;;  %v1019_v8 = vmul.f32 0.5, %v1013_v47  ;;  %v1197_v51 = vld [vmem:[#allocation4 + $0x8] sm:$0xff] }
 0xd01   :  { %v1016_v50 = vpop.f32.mrf.mxu1 }
 0xd02   :  { %v1020_v56 = vmul.f32 %v1015_v52, %v3188_v35 }
 0xd03   :  { %v1017_v57 = vpop.f32.mrf.mxu1 }
 0xd04   :  { %2584 = vtanh.f32 %v1020_v56 }
 0xd05   :  { %2586 = vtanh.f32 %v1019_v8 }
 0xd11   :  { %v2585_v59 = vpop.eup %2584 }
 0xd12   :  { %v1024_v45 = vmul.f32 %v2585_v59, %v3188_v35  ;;  %v2587_v9 = vpop.eup %2586 }
 0xd13   :  { %v1023_v4 = vmul.f32 0.5, %v2587_v9 }
 0xd14   :  { %v1026_v32 = vadd.f32 %v1024_v45, %v3193_v42 }
 0xd15   :  { %v1025_v48 = vadd.f32 0.5, %v1023_v4 }
 0xd16   :  { %1029 = vrot.lane.b32.xlu1 %v1026_v32, %s2816_s27 }
 0xd17   :  { %v1027_v24 = vmul.f32 %v1025_v48, %v964_v5 }
 0xd88   :  { %v1030_v49 = vpop.permute.xlu1 %1029 }
 0xd89   :  { %v1032_v18 = vmul.f32 %v1030_v49, %v1025_v48 }
 0xd8b   :  { %1034 = vrot.lane.b32.xlu0 %v1032_v18, %s2816_s27 }
 0xdfd   :  { %v1035_v31 = vpop.permute.xlu0 %1034 }
 0xdfe   :  { %v1037_v53 = vadd.f32 %v1035_v31, %v1027_v24 }
 0xe00   :  { %2588 = vtanh.f32 %v1037_v53 }
 0xe0d   :  { %v2589_v54 = vpop.eup %2588 }
 0xe0e   :  { %1040 = vrot.lane.b32.xlu1 %v2589_v54, %s2816_s27  ;;  %v1238_v54 = vld [vmem:[#allocation11 + $0x78] sm:$0xff] }
 0xe0f   :  { %1291 = vmatprep.subr.mxu0 %v1238_v54 }
 0xe80   :  { %v1041_v55 = vpop.permute.xlu1 %1040 }
 0xe81   :  { %v1043_v58 = vmul.f32 %v1041_v55, %v1026_v32  ;;  %v1237_v55 = vld [vmem:[#allocation11 + $0x70] sm:$0xff] }
 0xe83   :  { %1044 = vst.msk [vmem:[#allocation4 + $0x28] sm:$0xff] %vm609_vm6, %v1043_v58  ;;  %v1045_v61 = vpack.c.bf16 %v1043_v58, %v1043_v58  ;;  %v1236_v58 = vld [vmem:[#allocation11 + $0x68] sm:$0xff] }
 0xe85   :  { %2433 = vmatmul.mubr.msk.bf16.vlgmr.msra.gmra.mxu0 %vm609_vm6, %v1045_v61  ;;  %v1235_v61 = vld [vmem:[#allocation11 + $0x60] sm:$0xff] }
 0xe86   :  { %1339 = vmatprep.mubr.f32.mxu0 %v2813_v12  ;;  %1292 = vmatpush1.msra.mxu0 %v1237_v55 }
 0xe87   :  { %1293 = vmatprep.subr.mxu0 %v1236_v58 }
 0xe88   :  { %1294 = vmatpush1.msra.mxu0 %v1235_v61 }
 0xe8a   :  { %v1204_v63 = vld [vmem:[#allocation4 + $0x28] sm:$0xff] }
 0xe8b   :  { %v1205_v30 = vsel %vm143_vm7, %v1203_v17, %v1204_v63  ;;  %v1207_v6 = vsel %vm143_vm7, %v1204_v63, %v1203_v17  ;;  %v1234_v17 = vld [vmem:[#allocation11 + $0x58] sm:$0xff]  ;;  %v1233_v63 = vld [vmem:[#allocation11 + $0x50] sm:$0xff] }
 0xe8c   :  { %1206 = vst.msk [vmem:[#allocation4 + $0x10] sm:$0xff] %vm609_vm6, %v1205_v30  ;;  %1208 = vst.msk [vmem:[#allocation4 + $0x28] sm:$0xff] %vm609_vm6, %v1207_v6  ;;  %1295 = vmatprep.subr.mxu0 %v1234_v17  ;;  %v1232_v30 = vld [vmem:[#allocation11 + $0x48] sm:$0xff]  ;;  %v1231_v6 = vld [vmem:[#allocation11 + $0x40] sm:$0xff] }
 0xe8d   :  { %1296 = vmatpush1.msra.mxu0 %v1233_v63 }
 0xe8e   :  { %1297 = vmatprep.subr.mxu0 %v1232_v30 }
 0xe8f   :  { %1298 = vmatpush1.msra.mxu0 %v1231_v6 }
 0xf45   :  { %v1085_v15 = vpop.f32.mrf.mxu0 }
 0xf46   :  { %v1086_v21 = vadd.f32 %v1085_v15, %v531_v10  ;;  %v1230_v15 = vld [vmem:[#allocation11 + $0x38] sm:$0xff] }
 0xf47   :  { %v1087_v0 = vpop.f32.mrf.mxu0  ;;  %1299 = vmatprep.subr.mxu0 %v1230_v15 }
 0xf48   :  { %v1088_v37 = vadd.f32 %v1087_v0, %v532_v41  ;;  %v1092_v34 = vmul.f32 0.5, %v1086_v21  ;;  %v1229_v21 = vld [vmem:[#allocation11 + $0x30] sm:$0xff]  ;;  %v1228_v0 = vld [vmem:[#allocation11 + $0x28] sm:$0xff] }
 0xf49   :  { %v1089_v40 = vpop.f32.mrf.mxu0  ;;  %1300 = vmatpush1.msra.mxu0 %v1229_v21 }
 0xf4a   :  { %v1093_v14 = vmul.f32 %v1088_v37, %v3188_v35  ;;  %v1227_v37 = vld [vmem:[#allocation11 + $0x20] sm:$0xff]  ;;  %1301 = vmatprep.subr.mxu0 %v1228_v0 }
 0xf4b   :  { %v1090_v5 = vpop.f32.mrf.mxu0  ;;  %1302 = vmatpush1.msra.mxu0 %v1227_v37 }
 0xf4c   :  { %2590 = vtanh.f32 %v1093_v14  ;;  %v1226_v14 = vld [vmem:[#allocation11 + $0x18] sm:$0xff]  ;;  %v1225_v5 = vld [vmem:[#allocation11 + $0x10] sm:$0xff] }
 0xf4d   :  { %2592 = vtanh.f32 %v1092_v34  ;;  %1303 = vmatprep.subr.mxu0 %v1226_v14  ;;  %v3523_v34 = vld [vmem:[#allocation13 + $0x30] ss:$8 sps:$4 sm:$0xff]  }
 0xf4e   :  { %1304 = vmatpush1.msra.mxu0 %v1225_v5 }
 0xf59   :  { %v2591_v60 = vpop.eup %2590 }
 0xf5a   :  { %v1097_v13 = vmul.f32 %v2591_v60, %v3188_v35  ;;  %v2593_v36 = vpop.eup %2592  ;;  %v1224_v60 = vld [vmem:[#allocation11 + $0x8] sm:$0xff] }
 0xf5b   :  { %v1096_v10 = vmul.f32 0.5, %v2593_v36  ;;  %1305 = vmatprep.subr.mxu0 %v1224_v60  ;;  %v3528_v36 = vld [vmem:[#allocation13 + $0x24] ss:$8 sps:$4 sm:$0xff]  }
 0xf5c   :  { %v1099_v25 = vadd.f32 %v1097_v13, %v3193_v42  ;;  %v1223_v13 = vld [vmem:[#allocation11] sm:$0xff] }
 0xf5d   :  { %v1098_v28 = vadd.f32 0.5, %v1096_v10  ;;  %1306 = vmatpush1.msra.mxu0 %v1223_v13  ;;  %v3530_v10 = vld [vmem:[#allocation13 + $0x20] ss:$8 sps:$4 sm:$0xff]  }
 0xf5e   :  { %1102 = vrot.lane.b32.xlu0 %v1099_v25, %s2816_s27 }
 0xf5f   :  { %v1100_v39 = vmul.f32 %v1098_v28, %v1037_v53 }
 0xfd0   :  { %v1103_v2 = vpop.permute.xlu0 %1102 }
 0xfd1   :  { %v1105_v38 = vmul.f32 %v1103_v2, %v1098_v28  ;;  %v3534_v28 = vld [vmem:[#allocation13 + $0x14] ss:$8 sps:$4 sm:$0xff]   ;;  %v3536_v2 = vld [vmem:[#allocation13 + $0x10] ss:$8 sps:$4 sm:$0xff]  }
 0xfd3   :  { %1107 = vrot.lane.b32.xlu1 %v1105_v38, %s2816_s27  ;;  %v3540_v38 = vld [vmem:[#allocation13 + $0x4] ss:$8 sps:$4 sm:$0xff]  }
0x1045   :  { %v1108_v41 = vpop.permute.xlu1 %1107 }
0x1046   :  { %v1110_v19 = vadd.f32 %v1108_v41, %v1100_v39  ;;  %v3542_v39 = vld [vmem:[#allocation13] ss:$8 sps:$4 sm:$0xff]  }
0x1048   :  { %2594 = vtanh.f32 %v1110_v19 }
0x1055   :  { %v2595_v44 = vpop.eup %2594 }
0x1056   :  { %1113 = vrot.lane.b32.xlu0 %v2595_v44, %s2816_s27  ;;  %v1191_v44 = vld [vmem:[#allocation4] sm:$0xff] }
0x10c8   :  { %v1114_v43 = vpop.permute.xlu0 %1113 }
0x10c9   :  { %v1116_v46 = vmul.f32 %v1114_v43, %v1099_v25  ;;  %v3521_v25 = vld [vmem:[#allocation13 + $0x34] ss:$8 sps:$4 sm:$0xff]  }
0x10ca   :  { %1510 = vmatprep.subr.bf16.mxu1 %v3521_v25  ;;  %1656 = vmatprep.subr.bf16.mxu0 %v3521_v25 }
0x10cb   :  { %1117 = vst.msk [vmem:[#allocation4 + $0x30] sm:$0xff] %vm609_vm6, %v1116_v46  ;;  %v1118_v47 = vpack.c.bf16 %v1116_v46, %v1116_v46 }
0x10cd   :  { %2434 = vmatmul.mubr.msk.bf16.vlgmr.msra.gmra.mxu1 %vm609_vm6, %v1118_v47 }
0x10ce   :  { %1534 = vmatprep.mubr.bf16.mxu1 %v2814_v62  ;;  %1511 = vmatpush1.bf16.msra.mxu1 %v3523_v34 }
0x10cf   :  { %1512 = vmatprep.subr.bf16.mxu1 %v3528_v36 }
0x10d2   :  { %v1198_v52 = vld [vmem:[#allocation4 + $0x30] sm:$0xff]  ;;  %1513 = vmatpush1.bf16.msra.mxu1 %v3530_v10 }
0x10d3   :  { %v1199_v50 = vsel %vm143_vm7, %v1197_v51, %v1198_v52  ;;  %v1201_v56 = vsel %vm143_vm7, %v1198_v52, %v1197_v51  ;;  %1514 = vmatprep.subr.bf16.mxu1 %v3534_v28 }
0x10d4   :  { %1200 = vst.msk [vmem:[#allocation4 + $0x8] sm:$0xff] %vm609_vm6, %v1199_v50  ;;  %1202 = vst.msk [vmem:[#allocation4 + $0x30] sm:$0xff] %vm609_vm6, %v1201_v56  ;;  %v1217_v50 = vld [vmem:[#allocation4 + $0x10] sm:$0xff]  ;;  %v1218_v56 = vld [vmem:[#allocation4 + $0x18] sm:$0xff] }
0x10d6   :  { %1515 = vmatpush1.bf16.msra.mxu1 %v3536_v2 }
0x10d7   :  { %1516 = vmatprep.subr.bf16.mxu1 %v3540_v38 }
0x10da   :  { %1517 = vmatpush1.bf16.msra.mxu1 %v3542_v39 }
0x10db   :  { %1583 = vmatprep.subr.bf16.mxu1 %v3521_v25  ;;  %v1216_v52 = vld [vmem:[#allocation4 + $0x8] sm:$0xff] }
0x10dd   :  { %1535 = vmatmul.mubr.bf16.vlgmr.msra.gmra.mxu1 %v2814_v62 }
0x10de   :  { %1584 = vmatpush1.bf16.msra.mxu1 %v3523_v34  ;;  %1607 = vmatprep.mubr.bf16.mxu1 %v2814_v62 }
0x10df   :  { %1585 = vmatprep.subr.bf16.mxu1 %v3528_v36 }
0x10e2   :  { %1586 = vmatpush1.bf16.msra.mxu1 %v3530_v10 }
0x10e3   :  { %1587 = vmatprep.subr.bf16.mxu1 %v3534_v28 }
0x10e6   :  { %1588 = vmatpush1.bf16.msra.mxu1 %v3536_v2 }
0x10e7   :  { %1589 = vmatprep.subr.bf16.mxu1 %v3540_v38 }
0x10ea   :  { %1590 = vmatpush1.bf16.msra.mxu1 %v3542_v39 }
0x10eb   :  { %1729 = vmatprep.subr.bf16.mxu1 %v3521_v25 }
0x118d   :  { %v1158_v57 = vpop.f32.mrf.mxu1 }
0x118e   :  { %v1159_v59 = vadd.f32 %v1158_v57, %v519_v29  ;;  %v1219_v57 = vld [vmem:[#allocation4 + $0x20] sm:$0xff] }
0x118f   :  { %v1160_v45 = vpop.f32.mrf.mxu1 }
0x1190   :  { %v1161_v32 = vadd.f32 %v1160_v45, %v520_v33  ;;  %v1165_v20 = vmul.f32 0.5, %v1159_v59  ;;  %v1220_v59 = vld [vmem:[#allocation4 + $0x28] sm:$0xff]  ;;  %v1221_v45 = vld [vmem:[#allocation4 + $0x30] sm:$0xff] }
0x1191   :  { %v1162_v8 = vpop.f32.mrf.mxu1 }
0x1192   :  { %v1166_v9 = vmul.f32 %v1161_v32, %v3188_v35 }
0x1193   :  { %v1163_v4 = vpop.f32.mrf.mxu1 }
0x1194   :  { %2596 = vtanh.f32 %v1166_v9 }
0x1195   :  { %2598 = vtanh.f32 %v1165_v20 }
0x119d   :  { %v1536_v8 = vpop.f32.mrf.mxu1 }
0x119f   :  { %v1538_v9 = vpop.f32.mrf.mxu1 }
0x11a1   :  { %v2597_v48 = vpop.eup %2596  ;;  %v1540_v4 = vpop.f32.mrf.mxu1 }
0x11a2   :  { %v1170_v49 = vmul.f32 %v2597_v48, %v3188_v35  ;;  %v2599_v22 = vpop.eup %2598 }
0x11a3   :  { %v1169_v29 = vmul.f32 0.5, %v2599_v22  ;;  %v1541_v48 = vpop.f32.mrf.mxu1 }
0x11a4   :  { %v3515_v18 = vadd.f32 %v1170_v49, %v3193_v42  ;;  %v1239_v49 = vld [vmem:[%s3935_s8] sm:$0x3] }
0x11a5   :  { %v1171_v26 = vadd.f32 0.5, %v1169_v29  ;;  %v1244_v22 = vrot.slane %v1239_v49, %v350_v7 }
0x11a6   :  { %1175 = vrot.lane.b32.xlu1 %v3515_v18, %s2816_s27 }
0x11a7   :  { %v1173_v24 = vmul.f32 %v1171_v26, %v1110_v19 }
0x1218   :  { %v1176_v27 = vpop.permute.xlu1 %1175 }
0x1219   :  { %v1178_v33 = vmul.f32 %v1176_v27, %v1171_v26 }
0x121b   :  { %1180 = vrot.lane.b32.xlu0 %v1178_v33, %s2816_s27 }
0x128d   :  { %v1181_v31 = vpop.permute.xlu0 %1180 }
0x128e   :  { %v1183_v53 = vadd.f32 %v1181_v31, %v1173_v24 }
0x1290   :  { %2600 = vtanh.f32 %v1183_v53 }
0x129d   :  { %v2601_v40 = vpop.eup %2600 }
0x129e   :  { %1186 = vrot.lane.b32.xlu1 %v2601_v40, %s2816_s27 }
0x1310   :  { %v1187_v41 = vpop.permute.xlu1 %1186 }
0x1311   :  { %v1189_v19 = vmul.f32 %v1187_v41, %v3515_v18 }
0x1313   :  { %1190 = vst.msk [vmem:[#allocation4 + $0x38] sm:$0xff] %vm609_vm6, %v1189_v19 }
0x131a   :  { %v1192_v43 = vld [vmem:[#allocation4 + $0x38] sm:$0xff] }
0x131b   :  { %v1193_v46 = vsel %vm143_vm7, %v1191_v44, %v1192_v43  ;;  %v1195_v47 = vsel %vm143_vm7, %v1192_v43, %v1191_v44 }
0x131c   :  { %1194 = vst.msk [vmem:[#allocation4] sm:$0xff] %vm609_vm6, %v1193_v46  ;;  %1196 = vst.msk [vmem:[#allocation4 + $0x38] sm:$0xff] %vm609_vm6, %v1195_v47 }
0x1323   :  { %v1215_v51 = vld [vmem:[#allocation4] sm:$0xff]  ;;  %v1222_v32 = vld [vmem:[#allocation4 + $0x38] sm:$0xff] }
0x1324   :  { %2435 = vmatmul.mubr.msk.f32.vlgmr.msra.gmra.mxu0 %vm609_vm6, %v1215_v51 }
0x1325   :  { %1345 = vmatprep.mubr.f32.mxu0 %v2813_v12  ;;  %1657 = vmatpush1.bf16.msra.mxu0 %v3523_v34 }
0x1326   :  { %1658 = vmatprep.subr.bf16.mxu0 %v3528_v36 }
0x1328   :  { %2436 = vmatmul.mubr.msk.f32.gmra.mxu0 %vm609_vm6, %v1216_v52 }
0x1329   :  { %1351 = vmatprep.mubr.f32.mxu0 %v2813_v12  ;;  %1659 = vmatpush1.bf16.msra.mxu0 %v3530_v10 }
0x132a   :  { %1660 = vmatprep.subr.bf16.mxu0 %v3534_v28 }
0x132c   :  { %2437 = vmatmul.mubr.msk.f32.gmra.mxu0 %vm609_vm6, %v1217_v50 }
0x132d   :  { %1357 = vmatprep.mubr.f32.mxu0 %v2813_v12  ;;  %1661 = vmatpush1.bf16.msra.mxu0 %v3536_v2 }
0x132e   :  { %1662 = vmatprep.subr.bf16.mxu0 %v3540_v38 }
0x1330   :  { %2438 = vmatmul.mubr.msk.f32.gmra.mxu0 %vm609_vm6, %v1218_v56 }
0x1331   :  { %1363 = vmatprep.mubr.f32.mxu0 %v2813_v12  ;;  %1663 = vmatpush1.bf16.msra.mxu0 %v3542_v39 }
0x1332   :  { %1802 = vmatprep.subr.bf16.mxu0 %v3521_v25 }
0x1334   :  { %2439 = vmatmul.mubr.msk.f32.gmra.mxu0 %vm609_vm6, %v1219_v57 }
0x1335   :  { %1369 = vmatprep.mubr.f32.mxu0 %v2813_v12 }
0x1338   :  { %2440 = vmatmul.mubr.msk.f32.gmra.mxu0 %vm609_vm6, %v1220_v59 }
0x1339   :  { %1375 = vmatprep.mubr.f32.mxu0 %v2813_v12 }
0x133c   :  { %2441 = vmatmul.mubr.msk.f32.gmra.mxu0 %vm609_vm6, %v1221_v45 }
0x133d   :  { %1381 = vmatprep.mubr.f32.mxu0 %v2813_v12  ;;  %v1248_v12 = vrot.slane %v1239_v49, %v354_v11 }
0x1340   :  { %2442 = vmatmul.mubr.msk.f32.gmra.mxu0 %vm609_vm6, %v1222_v32 }
0x1341   :  { %1680 = vmatprep.mubr.bf16.mxu0 %v2814_v62 }
0x13e4   :  { %v1341_v18 = vpop.f32.mrf.mxu0 }
0x13e5   :  { %v3660_v50 = vadd.f32 %v1341_v18, %v1244_v22 }
0x13e6   :  { %v1343_v20 = vpop.f32.mrf.mxu0 }
0x13e7   :  { %v3672_v32 = vadd.f32 %v1343_v20, %v1248_v12 }
0x13e8   :  { %v1347_v29 = vpop.f32.mrf.mxu0 }
0x13e9   :  { %v3596_v26 = vadd.f32 %v1347_v29, %v1244_v22 }
0x13ea   :  { %v1349_v27 = vpop.f32.mrf.mxu0 }
0x13eb   :  { %v3598_v33 = vadd.f32 %v1349_v27, %v1248_v12 }
0x13ec   :  { %v1353_v24 = vpop.f32.mrf.mxu0 }
0x13ed   :  { %v3600_v31 = vadd.f32 %v1353_v24, %v1244_v22 }
0x13ee   :  { %v1355_v53 = vpop.f32.mrf.mxu0 }
0x13ef   :  { %v3602_v54 = vadd.f32 %v1355_v53, %v1248_v12 }
0x13f0   :  { %v1359_v55 = vpop.f32.mrf.mxu0 }
0x13f1   :  { %v3604_v58 = vadd.f32 %v1359_v55, %v1244_v22 }
0x13f2   :  { %v1361_v61 = vpop.f32.mrf.mxu0 }
0x13f3   :  { %v3606_v7 = vadd.f32 %v1361_v61, %v1248_v12 }
0x13f4   :  { %v1365_v17 = vpop.f32.mrf.mxu0 }
0x13f5   :  { %v3608_v3 = vadd.f32 %v1365_v17, %v1244_v22 }
0x13f6   :  { %v1367_v11 = vpop.f32.mrf.mxu0 }
0x13f7   :  { %v3610_v63 = vadd.f32 %v1367_v11, %v1248_v12  ;;  %v1444_v30 = vsel %vm3147_vm3, %v3604_v58, %v3608_v3  ;;  %v1448_v6 = vsel %vm3147_vm3, %v3608_v3, %v3604_v58 }
0x13f8   :  { %v1371_v15 = vpop.f32.mrf.mxu0 }
0x13f9   :  { %v3620_v21 = vadd.f32 %v1371_v15, %v1244_v22  ;;  %v1445_v0 = vsel %vm3161_vm4, %v3606_v7, %v3610_v63  ;;  %v1449_v37 = vsel %vm3161_vm4, %v3610_v63, %v3606_v7 }
0x13fa   :  { %v1373_v40 = vpop.f32.mrf.mxu0 }
0x13fb   :  { %v3630_v14 = vadd.f32 %v1373_v40, %v1248_v12  ;;  %v1432_v5 = vsel %vm3147_vm3, %v3600_v31, %v3620_v21  ;;  %v1436_v60 = vsel %vm3147_vm3, %v3620_v21, %v3600_v31 }
0x13fc   :  { %v1377_v13 = vpop.f32.mrf.mxu0 }
0x13fd   :  { %v3640_v41 = vadd.f32 %v1377_v13, %v1244_v22  ;;  %v1433_v19 = vsel %vm3161_vm4, %v3602_v54, %v3630_v14  ;;  %v1437_v44 = vsel %vm3161_vm4, %v3630_v14, %v3602_v54 }
0x13fe   :  { %v1379_v43 = vpop.f32.mrf.mxu0 }
0x13ff   :  { %v3650_v46 = vadd.f32 %v1379_v43, %v1248_v12  ;;  %v1420_v47 = vsel %vm3147_vm3, %v3596_v26, %v3640_v41  ;;  %v1424_v51 = vsel %vm3147_vm3, %v3640_v41, %v3596_v26 }
0x1400   :  { %v1383_v52 = vpop.f32.mrf.mxu0 }
0x1401   :  { %v3662_v56 = vadd.f32 %v1383_v52, %v1244_v22  ;;  %v1421_v57 = vsel %vm3161_vm4, %v3598_v33, %v3650_v46  ;;  %v1425_v59 = vsel %vm3161_vm4, %v3650_v46, %v3598_v33 }
0x1402   :  { %v1385_v45 = vpop.f32.mrf.mxu0 }
0x1403   :  { %v1408_v4 = vsel %vm3147_vm3, %v3660_v50, %v3662_v56  ;;  %v3678_v48 = vadd.f32 %v1385_v45, %v1248_v12  ;;  %v1412_v49 = vsel %vm3147_vm3, %v3662_v56, %v3660_v50 }
0x1404   :  { %v1537_v53 = vadd.f32 %v1536_v8, %v1408_v4 }
0x1405   :  { %v1409_v18 = vsel %vm3161_vm4, %v3672_v32, %v3678_v48  ;;  %v1413_v20 = vsel %vm3161_vm4, %v3678_v48, %v3672_v32 }
0x1406   :  { %v1539_v22 = vadd.f32 %v1538_v9, %v1409_v18  ;;  %v1543_v55 = vmul.f32 0.5, %v1537_v53 }
0x1408   :  { %v1544_v29 = vmul.f32 %v1539_v22, %v3188_v35 }
0x140a   :  { %2602 = vtanh.f32 %v1544_v29 }
0x140b   :  { %2604 = vtanh.f32 %v1543_v55 }
0x1417   :  { %v2603_v12 = vpop.eup %2602 }
0x1418   :  { %v1548_v27 = vmul.f32 %v2603_v12, %v3188_v35  ;;  %v2605_v61 = vpop.eup %2604 }
0x1419   :  { %v1547_v17 = vmul.f32 0.5, %v2605_v61 }
0x141a   :  { %v1550_v24 = vadd.f32 %v1548_v27, %v3193_v42 }
0x141b   :  { %v1549_v11 = vadd.f32 0.5, %v1547_v17 }
0x141c   :  { %1553 = vrot.lane.b32.xlu0 %v1550_v24, %s2816_s27 }
0x141d   :  { %v1551_v9 = vmul.f32 0.0, %v1549_v11 }
0x148e   :  { %v1554_v15 = vpop.permute.xlu0 %1553 }
0x148f   :  { %v1556_v40 = vmul.f32 %v1554_v15, %v1549_v11 }
0x1491   :  { %1558 = vrot.lane.b32.xlu1 %v1556_v40, %s2816_s27 }
0x1503   :  { %v1559_v13 = vpop.permute.xlu1 %1558 }
0x1504   :  { %v1561_v43 = vadd.f32 %v1559_v13, %v1551_v9 }
0x1506   :  { %2606 = vtanh.f32 %v1561_v43 }
0x1513   :  { %v2607_v52 = vpop.eup %2606 }
0x1514   :  { %1564 = vrot.lane.b32.xlu0 %v2607_v52, %s2816_s27 }
0x1586   :  { %v1565_v45 = vpop.permute.xlu0 %1564 }
0x1587   :  { %v1567_v18 = vmul.f32 %v1565_v45, %v1550_v24 }
0x1589   :  { %1568 = vst.msk [vmem:[#allocation5] sm:$0xff] %vm609_vm6, %v1567_v18  ;;  %v1569_v8 = vpack.c.bf16 %v1567_v18, %v1567_v18 }
0x158b   :  { %2451 = vmatmul.mubr.msk.bf16.vlgmr.msra.gmra.mxu1 %vm609_vm6, %v1569_v8 }
0x158c   :  { %1730 = vmatpush1.bf16.msra.mxu1 %v3523_v34  ;;  %1753 = vmatprep.mubr.bf16.mxu1 %v2814_v62 }
0x158d   :  { %1731 = vmatprep.subr.bf16.mxu1 %v3528_v36 }
0x1590   :  { %1732 = vmatpush1.bf16.msra.mxu1 %v3530_v10 }
0x1591   :  { %1733 = vmatprep.subr.bf16.mxu1 %v3534_v28 }
0x1594   :  { %1734 = vmatpush1.bf16.msra.mxu1 %v3536_v2 }
0x1595   :  { %1735 = vmatprep.subr.bf16.mxu1 %v3540_v38 }
0x1598   :  { %1736 = vmatpush1.bf16.msra.mxu1 %v3542_v39 }
0x1599   :  { %1875 = vmatprep.subr.bf16.mxu1 %v3521_v25 }
0x164b   :  { %v1609_v4 = vpop.f32.mrf.mxu1 }
0x164c   :  { %v1610_v22 = vadd.f32 %v1609_v4, %v1420_v47 }
0x164d   :  { %v1611_v29 = vpop.f32.mrf.mxu1 }
0x164e   :  { %v1612_v12 = vadd.f32 %v1611_v29, %v1421_v57  ;;  %v1616_v11 = vmul.f32 0.5, %v1610_v22 }
0x164f   :  { %v1613_v27 = vpop.f32.mrf.mxu1 }
0x1650   :  { %v1617_v24 = vmul.f32 %v1612_v12, %v3188_v35 }
0x1651   :  { %v1614_v53 = vpop.f32.mrf.mxu1 }
0x1652   :  { %2608 = vtanh.f32 %v1617_v24 }
0x1653   :  { %2610 = vtanh.f32 %v1616_v11 }
0x165f   :  { %v2609_v55 = vpop.eup %2608 }
0x1660   :  { %v1621_v61 = vmul.f32 %v2609_v55, %v3188_v35  ;;  %v2611_v15 = vpop.eup %2610 }
0x1661   :  { %v1620_v40 = vmul.f32 0.5, %v2611_v15 }
0x1662   :  { %v1623_v17 = vadd.f32 %v1621_v61, %v3193_v42 }
0x1663   :  { %v1622_v9 = vadd.f32 0.5, %v1620_v40 }
0x1664   :  { %1626 = vrot.lane.b32.xlu1 %v1623_v17, %s2816_s27 }
0x1665   :  { %v1624_v57 = vmul.f32 %v1622_v9, %v1561_v43 }
0x16d6   :  { %v1627_v47 = vpop.permute.xlu1 %1626 }
0x16d7   :  { %v1629_v13 = vmul.f32 %v1627_v47, %v1622_v9 }
0x16d9   :  { %1631 = vrot.lane.b32.xlu0 %v1629_v13, %s2816_s27 }
0x174b   :  { %v1632_v52 = vpop.permute.xlu0 %1631 }
0x174c   :  { %v1634_v45 = vadd.f32 %v1632_v52, %v1624_v57 }
0x174e   :  { %2612 = vtanh.f32 %v1634_v45 }
0x175b   :  { %v2613_v18 = vpop.eup %2612 }
0x175c   :  { %1637 = vrot.lane.b32.xlu1 %v2613_v18, %s2816_s27 }
0x17ce   :  { %v1638_v8 = vpop.permute.xlu1 %1637 }
0x17cf   :  { %v1640_v4 = vmul.f32 %v1638_v8, %v1623_v17 }
0x17d1   :  { %1641 = vst.msk [vmem:[#allocation5 + $0x8] sm:$0xff] %vm609_vm6, %v1640_v4  ;;  %v1642_v22 = vpack.c.bf16 %v1640_v4, %v1640_v4 }
0x17d3   :  { %2452 = vmatmul.mubr.msk.bf16.vlgmr.msra.gmra.mxu0 %vm609_vm6, %v1642_v22 }
0x17d4   :  { %1803 = vmatpush1.bf16.msra.mxu0 %v3523_v34  ;;  %1826 = vmatprep.mubr.bf16.mxu0 %v2814_v62 }
0x17d5   :  { %1804 = vmatprep.subr.bf16.mxu0 %v3528_v36 }
0x17d8   :  { %1805 = vmatpush1.bf16.msra.mxu0 %v3530_v10 }
0x17d9   :  { %1806 = vmatprep.subr.bf16.mxu0 %v3534_v28 }
0x17dc   :  { %1807 = vmatpush1.bf16.msra.mxu0 %v3536_v2 }
0x17dd   :  { %1808 = vmatprep.subr.bf16.mxu0 %v3540_v38 }
0x17e0   :  { %1809 = vmatpush1.bf16.msra.mxu0 %v3542_v39 }
0x17e1   :  { %1948 = vmatprep.subr.bf16.mxu0 %v3521_v25 }
0x1893   :  { %v1682_v43 = vpop.f32.mrf.mxu0 }
0x1894   :  { %v1683_v29 = vadd.f32 %v1682_v43, %v1432_v5 }
0x1895   :  { %v1684_v12 = vpop.f32.mrf.mxu0 }
0x1896   :  { %v1685_v27 = vadd.f32 %v1684_v12, %v1433_v19  ;;  %v1689_v5 = vmul.f32 0.5, %v1683_v29 }
0x1897   :  { %v1686_v24 = vpop.f32.mrf.mxu0 }
0x1898   :  { %v1690_v53 = vmul.f32 %v1685_v27, %v3188_v35 }
0x1899   :  { %v1687_v55 = vpop.f32.mrf.mxu0 }
0x189a   :  { %2614 = vtanh.f32 %v1690_v53 }
0x189b   :  { %2616 = vtanh.f32 %v1689_v5 }
0x18a7   :  { %v2615_v61 = vpop.eup %2614 }
0x18a8   :  { %v1694_v17 = vmul.f32 %v2615_v61, %v3188_v35  ;;  %v2617_v15 = vpop.eup %2616 }
0x18a9   :  { %v1693_v40 = vmul.f32 0.5, %v2617_v15 }
0x18aa   :  { %v1696_v11 = vadd.f32 %v1694_v17, %v3193_v42 }
0x18ab   :  { %v1695_v9 = vadd.f32 0.5, %v1693_v40 }
0x18ac   :  { %1699 = vrot.lane.b32.xlu0 %v1696_v11, %s2816_s27 }
0x18ad   :  { %v1697_v19 = vmul.f32 %v1695_v9, %v1634_v45 }
0x191e   :  { %v1700_v47 = vpop.permute.xlu0 %1699 }
0x191f   :  { %v1702_v13 = vmul.f32 %v1700_v47, %v1695_v9 }
0x1921   :  { %1704 = vrot.lane.b32.xlu1 %v1702_v13, %s2816_s27 }
0x1993   :  { %v1705_v57 = vpop.permute.xlu1 %1704 }
0x1994   :  { %v1707_v52 = vadd.f32 %v1705_v57, %v1697_v19 }
0x1996   :  { %2618 = vtanh.f32 %v1707_v52 }
0x19a3   :  { %v2619_v18 = vpop.eup %2618 }
0x19a4   :  { %1710 = vrot.lane.b32.xlu0 %v2619_v18, %s2816_s27 }
0x1a16   :  { %v1711_v8 = vpop.permute.xlu0 %1710 }
0x1a17   :  { %v1713_v4 = vmul.f32 %v1711_v8, %v1696_v11 }
0x1a19   :  { %1714 = vst.msk [vmem:[#allocation5 + $0x10] sm:$0xff] %vm609_vm6, %v1713_v4  ;;  %v1715_v22 = vpack.c.bf16 %v1713_v4, %v1713_v4 }
0x1a1b   :  { %2453 = vmatmul.mubr.msk.bf16.vlgmr.msra.gmra.mxu1 %vm609_vm6, %v1715_v22 }
0x1a1c   :  { %1876 = vmatpush1.bf16.msra.mxu1 %v3523_v34  ;;  %1899 = vmatprep.mubr.bf16.mxu1 %v2814_v62 }
0x1a1d   :  { %1877 = vmatprep.subr.bf16.mxu1 %v3528_v36 }
0x1a20   :  { %1878 = vmatpush1.bf16.msra.mxu1 %v3530_v10 }
0x1a21   :  { %1879 = vmatprep.subr.bf16.mxu1 %v3534_v28 }
0x1a24   :  { %1880 = vmatpush1.bf16.msra.mxu1 %v3536_v2 }
0x1a25   :  { %1881 = vmatprep.subr.bf16.mxu1 %v3540_v38 }
0x1a28   :  { %1882 = vmatpush1.bf16.msra.mxu1 %v3542_v39 }
0x1a29   :  { %2021 = vmatprep.subr.bf16.mxu1 %v3521_v25 }
0x1adb   :  { %v1755_v45 = vpop.f32.mrf.mxu1 }
0x1adc   :  { %v1756_v43 = vadd.f32 %v1755_v45, %v1444_v30 }
0x1add   :  { %v1757_v29 = vpop.f32.mrf.mxu1 }
0x1ade   :  { %v1758_v12 = vadd.f32 %v1757_v29, %v1445_v0  ;;  %v1762_v30 = vmul.f32 0.5, %v1756_v43 }
0x1adf   :  { %v1759_v27 = vpop.f32.mrf.mxu1 }
0x1ae0   :  { %v1763_v24 = vmul.f32 %v1758_v12, %v3188_v35 }
0x1ae1   :  { %v1760_v53 = vpop.f32.mrf.mxu1 }
0x1ae2   :  { %2620 = vtanh.f32 %v1763_v24 }
0x1ae3   :  { %2622 = vtanh.f32 %v1762_v30 }
0x1aef   :  { %v2621_v25 = vpop.eup %2620 }
0x1af0   :  { %v1767_v55 = vmul.f32 %v2621_v25, %v3188_v35  ;;  %v2623_v17 = vpop.eup %2622 }
0x1af1   :  { %v1766_v11 = vmul.f32 0.5, %v2623_v17 }
0x1af2   :  { %v1769_v61 = vadd.f32 %v1767_v55, %v3193_v42 }
0x1af3   :  { %v1768_v5 = vadd.f32 0.5, %v1766_v11 }
0x1af4   :  { %1772 = vrot.lane.b32.xlu1 %v1769_v61, %s2816_s27 }
0x1af5   :  { %v1770_v0 = vmul.f32 %v1768_v5, %v1707_v52 }
0x1b66   :  { %v1773_v15 = vpop.permute.xlu1 %1772 }
0x1b67   :  { %v1775_v40 = vmul.f32 %v1773_v15, %v1768_v5 }
0x1b69   :  { %1777 = vrot.lane.b32.xlu0 %v1775_v40, %s2816_s27 }
0x1bdb   :  { %v1778_v9 = vpop.permute.xlu0 %1777 }
0x1bdc   :  { %v1780_v47 = vadd.f32 %v1778_v9, %v1770_v0 }
0x1bde   :  { %2624 = vtanh.f32 %v1780_v47 }
0x1beb   :  { %v2625_v13 = vpop.eup %2624 }
0x1bec   :  { %1783 = vrot.lane.b32.xlu1 %v2625_v13, %s2816_s27 }
0x1c5e   :  { %v1784_v19 = vpop.permute.xlu1 %1783 }
0x1c5f   :  { %v1786_v57 = vmul.f32 %v1784_v19, %v1769_v61 }
0x1c61   :  { %1787 = vst.msk [vmem:[#allocation5 + $0x18] sm:$0xff] %vm609_vm6, %v1786_v57  ;;  %v1788_v18 = vpack.c.bf16 %v1786_v57, %v1786_v57 }
0x1c63   :  { %2454 = vmatmul.mubr.msk.bf16.vlgmr.msra.gmra.mxu0 %vm609_vm6, %v1788_v18 }
0x1c64   :  { %1949 = vmatpush1.bf16.msra.mxu0 %v3523_v34  ;;  %1972 = vmatprep.mubr.bf16.mxu0 %v2814_v62 }
0x1c65   :  { %1950 = vmatprep.subr.bf16.mxu0 %v3528_v36 }
0x1c68   :  { %1951 = vmatpush1.bf16.msra.mxu0 %v3530_v10  ;;  %v2098_v5 = vld [vmem:[#allocation5 + $0x18] sm:$0xff] }
0x1c69   :  { %1952 = vmatprep.subr.bf16.mxu0 %v3534_v28 }
0x1c6c   :  { %1953 = vmatpush1.bf16.msra.mxu0 %v3536_v2 }
0x1c6d   :  { %1954 = vmatprep.subr.bf16.mxu0 %v3540_v38 }
0x1c70   :  { %1955 = vmatpush1.bf16.msra.mxu0 %v3542_v39 }
0x1d23   :  { %v1828_v52 = vpop.f32.mrf.mxu0 }
0x1d24   :  { %v1829_v8 = vadd.f32 %v1828_v52, %v1448_v6 }
0x1d25   :  { %v1830_v4 = vpop.f32.mrf.mxu0 }
0x1d26   :  { %v1831_v22 = vadd.f32 %v1830_v4, %v1449_v37  ;;  %v1835_v58 = vmul.f32 0.5, %v1829_v8 }
0x1d27   :  { %v1832_v45 = vpop.f32.mrf.mxu0 }
0x1d28   :  { %v1836_v43 = vmul.f32 %v1831_v22, %v3188_v35  ;;  %v2092_v22 = vld [vmem:[#allocation5 + $0x10] sm:$0xff] }
0x1d29   :  { %v1833_v29 = vpop.f32.mrf.mxu0 }
0x1d2a   :  { %2626 = vtanh.f32 %v1836_v43 }
0x1d2b   :  { %2628 = vtanh.f32 %v1835_v58 }
0x1d37   :  { %v2627_v12 = vpop.eup %2626 }
0x1d38   :  { %v1840_v27 = vmul.f32 %v2627_v12, %v3188_v35  ;;  %v2629_v3 = vpop.eup %2628 }
0x1d39   :  { %v1839_v6 = vmul.f32 0.5, %v2629_v3 }
0x1d3a   :  { %v1842_v24 = vadd.f32 %v1840_v27, %v3193_v42 }
0x1d3b   :  { %v1841_v53 = vadd.f32 0.5, %v1839_v6 }
0x1d3c   :  { %1845 = vrot.lane.b32.xlu0 %v1842_v24, %s2816_s27 }
0x1d3d   :  { %v1843_v63 = vmul.f32 %v1841_v53, %v1780_v47 }
0x1dae   :  { %v1846_v25 = vpop.permute.xlu0 %1845 }
0x1daf   :  { %v1848_v7 = vmul.f32 %v1846_v25, %v1841_v53 }
0x1db1   :  { %1850 = vrot.lane.b32.xlu1 %v1848_v7, %s2816_s27 }
0x1e23   :  { %v1851_v37 = vpop.permute.xlu1 %1850 }
0x1e24   :  { %v1853_v55 = vadd.f32 %v1851_v37, %v1843_v63 }
0x1e26   :  { %2630 = vtanh.f32 %v1853_v55 }
0x1e33   :  { %v2631_v61 = vpop.eup %2630 }
0x1e34   :  { %1856 = vrot.lane.b32.xlu0 %v2631_v61, %s2816_s27 }
0x1ea6   :  { %v1857_v30 = vpop.permute.xlu0 %1856 }
0x1ea7   :  { %v1859_v17 = vmul.f32 %v1857_v30, %v1842_v24 }
0x1ea9   :  { %1860 = vst.msk [vmem:[#allocation5 + $0x20] sm:$0xff] %vm609_vm6, %v1859_v17  ;;  %v1861_v11 = vpack.c.bf16 %v1859_v17, %v1859_v17 }
0x1eab   :  { %2455 = vmatmul.mubr.msk.bf16.vlgmr.msra.gmra.mxu1 %vm609_vm6, %v1861_v11 }
0x1eac   :  { %2022 = vmatpush1.bf16.msra.mxu1 %v3523_v34  ;;  %2045 = vmatprep.mubr.bf16.mxu1 %v2814_v62 }
0x1ead   :  { %2023 = vmatprep.subr.bf16.mxu1 %v3528_v36 }
0x1eb0   :  { %v2099_v15 = vld [vmem:[#allocation5 + $0x20] sm:$0xff]  ;;  %2024 = vmatpush1.bf16.msra.mxu1 %v3530_v10 }
0x1eb1   :  { %v2100_v40 = vsel %vm143_vm7, %v2098_v5, %v2099_v15  ;;  %v2102_v0 = vsel %vm143_vm7, %v2099_v15, %v2098_v5  ;;  %2025 = vmatprep.subr.bf16.mxu1 %v3534_v28  ;;  %v2086_v15 = vld [vmem:[#allocation5 + $0x8] sm:$0xff] }
0x1eb2   :  { %2101 = vst.msk [vmem:[#allocation5 + $0x18] sm:$0xff] %vm609_vm6, %v2100_v40  ;;  %2103 = vst.msk [vmem:[#allocation5 + $0x20] sm:$0xff] %vm609_vm6, %v2102_v0 }
0x1eb4   :  { %2026 = vmatpush1.bf16.msra.mxu1 %v3536_v2 }
0x1eb5   :  { %2027 = vmatprep.subr.bf16.mxu1 %v3540_v38 }
0x1eb8   :  { %2028 = vmatpush1.bf16.msra.mxu1 %v3542_v39 }
0x1f6b   :  { %v1901_v62 = vpop.f32.mrf.mxu1 }
0x1f6c   :  { %v1902_v34 = vadd.f32 %v1901_v62, %v1436_v60 }
0x1f6d   :  { %v1903_v36 = vpop.f32.mrf.mxu1 }
0x1f6e   :  { %v1904_v10 = vadd.f32 %v1903_v36, %v1437_v44  ;;  %v1908_v31 = vmul.f32 0.5, %v1902_v34 }
0x1f6f   :  { %v1905_v28 = vpop.f32.mrf.mxu1 }
0x1f70   :  { %v1909_v2 = vmul.f32 %v1904_v10, %v3188_v35 }
0x1f71   :  { %v1906_v38 = vpop.f32.mrf.mxu1 }
0x1f72   :  { %2632 = vtanh.f32 %v1909_v2 }
0x1f73   :  { %2634 = vtanh.f32 %v1908_v31 }
0x1f7f   :  { %v2633_v39 = vpop.eup %2632 }
0x1f80   :  { %v1913_v9 = vmul.f32 %v2633_v39, %v3188_v35  ;;  %v2635_v21 = vpop.eup %2634 }
0x1f81   :  { %v1912_v60 = vmul.f32 0.5, %v2635_v21 }
0x1f82   :  { %v1915_v47 = vadd.f32 %v1913_v9, %v3193_v42 }
0x1f83   :  { %v1914_v13 = vadd.f32 0.5, %v1912_v60  ;;  %v2119_v60 = vld [vmem:[#allocation14 + $0x38] sm:$0xff] }
0x1f84   :  { %1918 = vrot.lane.b32.xlu1 %v1915_v47, %s2816_s27  ;;  %2483 = vmatprep.subr.mxu0 %v2119_v60 }
0x1f85   :  { %v1916_v14 = vmul.f32 %v1914_v13, %v1853_v55 }
0x1ff6   :  { %v1919_v19 = vpop.permute.xlu1 %1918 }
0x1ff7   :  { %v1921_v54 = vmul.f32 %v1919_v19, %v1914_v13  ;;  %v2116_v13 = vld [vmem:[#allocation14 + $0x20] sm:$0xff]  ;;  %v2115_v19 = vld [vmem:[#allocation14 + $0x18] sm:$0xff] }
0x1ff9   :  { %1923 = vrot.lane.b32.xlu0 %v1921_v54, %s2816_s27  ;;  %v2114_v54 = vld [vmem:[#allocation14 + $0x10] sm:$0xff] }
0x206b   :  { %v1924_v44 = vpop.permute.xlu0 %1923 }
0x206c   :  { %v1926_v57 = vadd.f32 %v1924_v44, %v1916_v14  ;;  %v2113_v44 = vld [vmem:[#allocation14 + $0x8] sm:$0xff] }
0x206e   :  { %2636 = vtanh.f32 %v1926_v57 }
0x207b   :  { %v2637_v18 = vpop.eup %2636 }
0x207c   :  { %1929 = vrot.lane.b32.xlu1 %v2637_v18, %s2816_s27 }
0x20ee   :  { %v1930_v52 = vpop.permute.xlu1 %1929 }
0x20ef   :  { %v1932_v8 = vmul.f32 %v1930_v52, %v1915_v47 }
0x20f1   :  { %1933 = vst.msk [vmem:[#allocation5 + $0x28] sm:$0xff] %vm609_vm6, %v1932_v8  ;;  %v1934_v4 = vpack.c.bf16 %v1932_v8, %v1932_v8  ;;  %v2080_v8 = vld [vmem:[#allocation5] sm:$0xff] }
0x20f3   :  { %2456 = vmatmul.mubr.msk.bf16.vlgmr.msra.gmra.mxu0 %vm609_vm6, %v1934_v4 }
0x20f4   :  { %2484 = vmatpush3.msra.mxu0 %v2119_v60 }
0x20f8   :  { %v2093_v45 = vld [vmem:[#allocation5 + $0x28] sm:$0xff] }
0x20f9   :  { %v2094_v43 = vsel %vm143_vm7, %v2092_v22, %v2093_v45  ;;  %v2096_v29 = vsel %vm143_vm7, %v2093_v45, %v2092_v22 }
0x20fa   :  { %2095 = vst.msk [vmem:[#allocation5 + $0x10] sm:$0xff] %vm609_vm6, %v2094_v43  ;;  %2097 = vst.msk [vmem:[#allocation5 + $0x28] sm:$0xff] %vm609_vm6, %v2096_v29 }
0x2101   :  { %v2109_v1 = vld [vmem:[#allocation5 + $0x28] sm:$0xff] }
0x21b3   :  { %v1974_v12 = vpop.f32.mrf.mxu0 }
0x21b4   :  { %v1975_v27 = vadd.f32 %v1974_v12, %v1424_v51  ;;  %v2106_v12 = vld [vmem:[#allocation5 + $0x10] sm:$0xff] }
0x21b5   :  { %v1976_v24 = vpop.f32.mrf.mxu0 }
0x21b6   :  { %v1977_v58 = vadd.f32 %v1976_v24, %v1425_v59  ;;  %v1981_v26 = vmul.f32 0.5, %v1975_v27  ;;  %v2107_v27 = vld [vmem:[#allocation5 + $0x18] sm:$0xff]  ;;  %v2108_v24 = vld [vmem:[#allocation5 + $0x20] sm:$0xff] }
0x21b7   :  { %v1978_v3 = vpop.f32.mrf.mxu0 }
0x21b8   :  { %v1982_v6 = vmul.f32 %v1977_v58, %v3188_v35 }
0x21b9   :  { %v1979_v53 = vpop.f32.mrf.mxu0 }
0x21ba   :  { %2638 = vtanh.f32 %v1982_v6  ;;  %v2458_v6 = vld [vmem:[%s3937_s10] ss:$0 sm:$0xff]  ;;  %s2817_s10 = smov [#allocation16]  }
0x21bb   :  { %2640 = vtanh.f32 %v1981_v26 }
0x21c7   :  { %v2639_v25 = vpop.eup %2638 }
0x21c8   :  { %v1986_v7 = vmul.f32 %v2639_v25, %v3188_v35  ;;  %v2641_v41 = vpop.eup %2640 }
0x21c9   :  { %v1985_v51 = vmul.f32 0.5, %v2641_v41 }
0x21ca   :  { %v1988_v63 = vadd.f32 %v1986_v7, %v3193_v42 }
0x21cb   :  { %v1987_v37 = vadd.f32 0.5, %v1985_v51 }
0x21cc   :  { %1991 = vrot.lane.b32.xlu0 %v1988_v63, %s2816_s27 }
0x21cd   :  { %v1989_v46 = vmul.f32 %v1987_v37, %v1926_v57  ;;  %v2112_v57 = vld [vmem:[#allocation14] sm:$0xff] }
0x223e   :  { %v1992_v55 = vpop.permute.xlu0 %1991 }
0x223f   :  { %v1994_v33 = vmul.f32 %v1992_v55, %v1987_v37 }
0x2241   :  { %1996 = vrot.lane.b32.xlu1 %v1994_v33, %s2816_s27 }
0x22b3   :  { %v1997_v59 = vpop.permute.xlu1 %1996 }
0x22b4   :  { %v1999_v61 = vadd.f32 %v1997_v59, %v1989_v46 }
0x22b6   :  { %2642 = vtanh.f32 %v1999_v61 }
0x22c3   :  { %v2643_v30 = vpop.eup %2642 }
0x22c4   :  { %2002 = vrot.lane.b32.xlu0 %v2643_v30, %s2816_s27 }
0x2336   :  { %v2003_v17 = vpop.permute.xlu0 %2002 }
0x2337   :  { %v2005_v11 = vmul.f32 %v2003_v17, %v1988_v63 }
0x2339   :  { %2006 = vst.msk [vmem:[#allocation5 + $0x30] sm:$0xff] %vm609_vm6, %v2005_v11  ;;  %v2007_v5 = vpack.c.bf16 %v2005_v11, %v2005_v11 }
0x233b   :  { %2457 = vmatmul.mubr.msk.bf16.vlgmr.msra.gmra.mxu1 %vm609_vm6, %v2007_v5 }
0x2340   :  { %v2087_v40 = vld [vmem:[#allocation5 + $0x30] sm:$0xff] }
0x2341   :  { %v2088_v0 = vsel %vm143_vm7, %v2086_v15, %v2087_v40  ;;  %v2090_v62 = vsel %vm143_vm7, %v2087_v40, %v2086_v15 }
0x2342   :  { %2089 = vst.msk [vmem:[#allocation5 + $0x8] sm:$0xff] %vm609_vm6, %v2088_v0  ;;  %2091 = vst.msk [vmem:[#allocation5 + $0x30] sm:$0xff] %vm609_vm6, %v2090_v62 }
0x2349   :  { %v2105_v29 = vld [vmem:[#allocation5 + $0x8] sm:$0xff]  ;;  %v2110_v58 = vld [vmem:[#allocation5 + $0x30] sm:$0xff] }
0x23fb   :  { %v2047_v34 = vpop.f32.mrf.mxu1 }
0x23fc   :  { %v2048_v36 = vadd.f32 %v2047_v34, %v1412_v49 }
0x23fd   :  { %v2049_v10 = vpop.f32.mrf.mxu1 }
0x23fe   :  { %v2050_v28 = vadd.f32 %v2049_v10, %v1413_v20  ;;  %v2054_v50 = vmul.f32 0.5, %v2048_v36 }
0x23ff   :  { %v2051_v2 = vpop.f32.mrf.mxu1 }
0x2400   :  { %v2055_v38 = vmul.f32 %v2050_v28, %v3188_v35 }
0x2401   :  { %v2052_v39 = vpop.f32.mrf.mxu1 }
0x2402   :  { %2644 = vtanh.f32 %v2055_v38 }
0x2403   :  { %2646 = vtanh.f32 %v2054_v50 }
0x240f   :  { %v2645_v9 = vpop.eup %2644 }
0x2410   :  { %v2059_v47 = vmul.f32 %v2645_v9, %v3188_v35  ;;  %v2647_v56 = vpop.eup %2646  ;;  %v2118_v35 = vld [vmem:[#allocation14 + $0x30] sm:$0xff] }
0x2411   :  { %v2058_v23 = vmul.f32 0.5, %v2647_v56  ;;  %2485 = vmatprep.subr.mxu0 %v2118_v35 }
0x2412   :  { %v2061_v16 = vadd.f32 %v2059_v47, %v3193_v42  ;;  %2486 = vmatpush3.msra.mxu0 %v2118_v35  ;;  %v2117_v42 = vld [vmem:[#allocation14 + $0x28] sm:$0xff] }
0x2413   :  { %v2060_v49 = vadd.f32 0.5, %v2058_v23  ;;  %2487 = vmatprep.subr.mxu0 %v2117_v42 }
0x2414   :  { %2064 = vrot.lane.b32.xlu1 %v2061_v16, %s2816_s27  ;;  %2488 = vmatpush3.msra.mxu0 %v2117_v42 }
0x2415   :  { %v2062_v48 = vmul.f32 %v2060_v49, %v1999_v61  ;;  %2489 = vmatprep.subr.mxu0 %v2116_v13 }
0x2416   :  { %2490 = vmatpush3.msra.mxu0 %v2116_v13 }
0x2417   :  { %2491 = vmatprep.subr.mxu0 %v2115_v19 }
0x2418   :  { %2492 = vmatpush3.msra.mxu0 %v2115_v19 }
0x2419   :  { %2493 = vmatprep.subr.mxu0 %v2114_v54 }
0x241a   :  { %2494 = vmatpush3.msra.mxu0 %v2114_v54 }
0x241b   :  { %2495 = vmatprep.subr.mxu0 %v2113_v44 }
0x241c   :  { %2496 = vmatpush3.msra.mxu0 %v2113_v44 }
0x241d   :  { %2497 = vmatprep.subr.mxu0 %v2112_v57 }
0x241e   :  { %2498 = vmatpush3.msra.mxu0 %v2112_v57 }
0x2486   :  { %v2065_v31 = vpop.permute.xlu1 %2064 }
0x2487   :  { %v2067_v32 = vmul.f32 %v2065_v31, %v2060_v49 }
0x2489   :  { %2069 = vrot.lane.b32.xlu0 %v2067_v32, %s2816_s27 }
0x24fb   :  { %v2070_v20 = vpop.permute.xlu0 %2069 }
0x24fc   :  { %v2072_v21 = vadd.f32 %v2070_v20, %v2062_v48 }
0x24fe   :  { %2648 = vtanh.f32 %v2072_v21 }
0x250b   :  { %v2649_v14 = vpop.eup %2648 }
0x250c   :  { %2075 = vrot.lane.b32.xlu1 %v2649_v14, %s2816_s27  ;;  %s2358_s27 = sshll.u32 %s2817_s10, 4  ;;  %s2359_s27 = int_to_ptr.vmem [resolvable:$true] %s2358_s27 }
0x250d   :  { %s2774_s14 = scalar_lea.vmem %s2359_s27, 256  ;;  %p2779_p12 = scmp.lt.s32.totalorder %s2359_s27, %s2359_s27 }
0x250e   :  { %p2775_p11 = scmp.ne.s32.totalorder %s2359_s27, %s2774_s14  ;;  %p2780_p13 = scmp.lt.s32.totalorder %s2774_s14, %s2774_s14 }
0x2510   :  { %p2781_p0 = por %p2780_p13, %p2779_p12 }
0x2512   :  { %p2782_p1 = pnand %p2781_p0, %p2775_p11 }
0x257e   :  { %v2076_v18 = vpop.permute.xlu1 %2075 }
0x257f   :  { %v2078_v52 = vmul.f32 %v2076_v18, %v2061_v16 }
0x2581   :  { %2079 = vst.msk [vmem:[#allocation5 + $0x38] sm:$0xff] %vm609_vm6, %v2078_v52 }
0x2588   :  { %v2081_v4 = vld [vmem:[#allocation5 + $0x38] sm:$0xff] }
0x2589   :  { %v2082_v22 = vsel %vm143_vm7, %v2080_v8, %v2081_v4  ;;  %v2084_v45 = vsel %vm143_vm7, %v2081_v4, %v2080_v8 }
0x258a   :  { %2083 = vst.msk [vmem:[#allocation5] sm:$0xff] %vm609_vm6, %v2082_v22  ;;  %2085 = vst.msk [vmem:[#allocation5 + $0x38] sm:$0xff] %vm609_vm6, %v2084_v45 }
0x2591   :  { %v2104_v43 = vld [vmem:[#allocation5] sm:$0xff]  ;;  %v2111_v3 = vld [vmem:[#allocation5 + $0x38] sm:$0xff] }
0x2592   :  { %2499 = vmatprep.mubr.msk.f32.mxu0 %vm609_vm6, %v2104_v43 }
0x2593   :  { %2500 = vmatmul.mubr.msk.f32.vlgmr.msra.gmra.mxu0 %vm609_vm6, %v2105_v29 }
0x2594   :  { %2502 = vmatprep.mubr.msk.f32.mxu0 %vm609_vm6, %v2106_v12 }
0x2597   :  { %2503 = vmatmul.mubr.msk.f32.gmra.mxu0 %vm609_vm6, %v2107_v27 }
0x2598   :  { %2505 = vmatprep.mubr.msk.f32.mxu0 %vm609_vm6, %v2108_v24 }
0x259b   :  { %2506 = vmatmul.mubr.msk.f32.gmra.mxu0 %vm609_vm6, %v2109_v1 }
0x259c   :  { %2508 = vmatprep.mubr.msk.f32.mxu0 %vm609_vm6, %v2110_v58 }
0x259f   :  { %2509 = vmatmul.mubr.msk.f32.gmra.mxu0 %vm609_vm6, %v2111_v3 }
0x2653   :  { %v2501_v53 = vpop.f32.mrf.mxu0 }
0x2654   :  { %v2223_v25 = vadd.f32 %v2501_v53, %v2458_v6 }
0x2655   :  { %v2217_v7 = vpop.f32.mrf.mxu0 }
0x2656   :  { %v2218_v63 = vadd.f32 %v2458_v6, %v2217_v7  ;;  %2258 = vmax.xlane.f32.xlu1 %v2223_v25 }
0x2657   :  { %v2504_v26 = vpop.f32.mrf.mxu0 }
0x2658   :  { %2256 = vmax.xlane.f32.xlu0 %v2218_v63  ;;  %v2233_v51 = vadd.f32 %v2504_v26, %v2458_v6 }
0x2659   :  { %v2227_v41 = vpop.f32.mrf.mxu0 }
0x265a   :  { %v2228_v33 = vadd.f32 %v2458_v6, %v2227_v41 }
0x265b   :  { %v2507_v37 = vpop.f32.mrf.mxu0 }
0x265c   :  { %2262 = vmax.xlane.f32.xlu0 %v2233_v51  ;;  %v2243_v30 = vadd.f32 %v2507_v37, %v2458_v6 }
0x265d   :  { %v2237_v55 = vpop.f32.mrf.mxu0 }
0x265e   :  { %v2238_v46 = vadd.f32 %v2458_v6, %v2237_v55 }
0x265f   :  { %v2510_v59 = vpop.f32.mrf.mxu0 }
0x2660   :  { %2264 = vmax.xlane.f32.xlu1 %v2238_v46  ;;  %2260 = vmax.xlane.f32.xlu0 %v2228_v33  ;;  %v2253_v11 = vadd.f32 %v2510_v59, %v2458_v6 }
0x2661   :  { %v2247_v61 = vpop.f32.mrf.mxu0 }
0x2662   :  { %v2248_v17 = vadd.f32 %v2458_v6, %v2247_v61 }
0x2664   :  { %2268 = vmax.xlane.f32.xlu1 %v2248_v17  ;;  %2266 = vmax.xlane.f32.xlu0 %v2243_v30 }
0x2668   :  { %2270 = vmax.xlane.f32.xlu0 %v2253_v11 }
0x26df   :  { %v2259_v5 = vpop.xlane.xlu1 %2258 }
0x26e0   :  { %v2273_v15 = vsub.f32 %v2223_v25, %v2259_v5 }
0x26e1   :  { %v2257_v40 = vpop.xlane.xlu0 %2256 }
0x26e2   :  { %v2282_v0 = vmul.f32 1.442695, %v2273_v15  ;;  %v3893_v62 = vsub.f32 %v2218_v63, %v2257_v40 }
0x26e4   :  { %2650 = vpow2.f32 %v2282_v0  ;;  %v2280_v34 = vmul.f32 1.442695, %v3893_v62 }
0x26e5   :  { %v2263_v36 = vpop.xlane.xlu0 %2262 }
0x26e6   :  { %2652 = vpow2.f32 %v2280_v34  ;;  %v3896_v10 = vsub.f32 %v2233_v51, %v2263_v36 }
0x26e8   :  { %v2286_v28 = vmul.f32 1.442695, %v3896_v10 }
0x26e9   :  { %v2265_v2 = vpop.xlane.xlu1 %2264  ;;  %v2261_v38 = vpop.xlane.xlu0 %2260 }
0x26ea   :  { %2654 = vpow2.f32 %v2286_v28  ;;  %v3899_v39 = vsub.f32 %v2238_v46, %v2265_v2  ;;  %v3901_v9 = vsub.f32 %v2228_v33, %v2261_v38 }
0x26ec   :  { %v2284_v47 = vmul.f32 1.442695, %v3901_v9  ;;  %v2288_v56 = vmul.f32 1.442695, %v3899_v39 }
0x26ed   :  { %v2269_v16 = vpop.xlane.xlu1 %2268  ;;  %v2267_v50 = vpop.xlane.xlu0 %2266 }
0x26ee   :  { %v3905_v23 = vsub.f32 %v2243_v30, %v2267_v50  ;;  %2656 = vpow2.f32 %v2284_v47  ;;  %v3907_v49 = vsub.f32 %v2248_v17, %v2269_v16 }
0x26ef   :  { %2658 = vpow2.f32 %v2288_v56 }
0x26f0   :  { %v2290_v31 = vmul.f32 1.442695, %v3905_v23  ;;  %v2292_v60 = vmul.f32 1.442695, %v3907_v49 }
0x26f1   :  { %v2651_v32 = vpop.eup %2650  ;;  %v2271_v48 = vpop.xlane.xlu0 %2270 }
0x26f2   :  { %v3910_v20 = vsub.f32 %v2253_v11, %v2271_v48  ;;  %2298 = vadd.xlane.f32.xlu0 %v2651_v32  ;;  %2660 = vpow2.f32 %v2290_v31 }
0x26f3   :  { %v2653_v21 = vpop.eup %2652 }
0x26f4   :  { %v2294_v35 = vmul.f32 1.442695, %v3910_v20  ;;  %2296 = vadd.xlane.f32.xlu1 %v2653_v21 }
0x26f6   :  { %2662 = vpow2.f32 %v2294_v35 }
0x26f7   :  { %v2655_v42 = vpop.eup %2654  ;;  %2664 = vpow2.f32 %v2292_v60 }
0x26f8   :  { %2302 = vadd.xlane.f32.xlu0 %v2655_v42 }
0x26fb   :  { %v2657_v13 = vpop.eup %2656 }
0x26fc   :  { %2300 = vadd.xlane.f32.xlu1 %v2657_v13  ;;  %v2659_v19 = vpop.eup %2658 }
0x26ff   :  { %v2661_v54 = vpop.eup %2660 }
0x2700   :  { %2304 = vadd.xlane.f32.xlu1 %v2659_v19  ;;  %2306 = vadd.xlane.f32.xlu0 %v2661_v54 }
0x2703   :  { %v2663_v14 = vpop.eup %2662 }
0x2704   :  { %v2665_v44 = vpop.eup %2664  ;;  %2310 = vadd.xlane.f32.xlu0 %v2663_v14 }
0x2705   :  { %2308 = vadd.xlane.f32.xlu1 %v2665_v44 }
0x277b   :  { %v2299_v57 = vpop.xlane.xlu0 %2298 }
0x277c   :  { %2666 = vlog2.f32 %v2299_v57 }
0x277d   :  { %v2297_v18 = vpop.xlane.xlu1 %2296 }
0x277e   :  { %2668 = vlog2.f32 %v2297_v18 }
0x2781   :  { %v2303_v52 = vpop.xlane.xlu0 %2302 }
0x2782   :  { %2670 = vlog2.f32 %v2303_v52 }
0x2785   :  { %v2301_v8 = vpop.xlane.xlu1 %2300 }
0x2786   :  { %2672 = vlog2.f32 %v2301_v8 }
0x2789   :  { %v2667_v4 = vpop.eup %2666  ;;  %v2305_v45 = vpop.xlane.xlu1 %2304 }
0x278a   :  { %v2315_v22 = vmul.f32 0.6931472, %v2667_v4  ;;  %v2307_v43 = vpop.xlane.xlu0 %2306  ;;  %2674 = vlog2.f32 %v2305_v45 }
0x278b   :  { %v2669_v29 = vpop.eup %2668  ;;  %2676 = vlog2.f32 %v2307_v43 }
0x278c   :  { %v2329_v12 = vsub.f32 %v2273_v15, %v2315_v22  ;;  %v2313_v27 = vmul.f32 0.6931472, %v2669_v29 }
0x278e   :  { %2339 = vst [vmem:[#allocation16 + $0x1] sm:$0x1] %v2329_v12  ;;  %2340 = vst [vmem:[#allocation16 + $0x8] sm:$0x2] %v2329_v12  ;;  %v2328_v24 = vsub.f32 %v3893_v62, %v2313_v27  ;;  %v2309_v1 = vpop.xlane.xlu1 %2308  ;;  %v2311_v58 = vpop.xlane.xlu0 %2310 }
0x278f   :  { %v2671_v3 = vpop.eup %2670  ;;  %2678 = vlog2.f32 %v2309_v1 }
0x2790   :  { %2336 = vst [vmem:[#allocation16] sm:$0x1] %v2328_v24  ;;  %2338 = vst [vmem:[#allocation16 + $0x7] sm:$0x2] %v2328_v24  ;;  %v2319_v6 = vmul.f32 0.6931472, %v2671_v3  ;;  %2680 = vlog2.f32 %v2311_v58 }
0x2792   :  { %v2331_v53 = vsub.f32 %v3896_v10, %v2319_v6 }
0x2793   :  { %v2673_v25 = vpop.eup %2672 }
0x2794   :  { %2343 = vst [vmem:[#allocation16 + $0x3] sm:$0x1] %v2331_v53  ;;  %2344 = vst [vmem:[#allocation16 + $0xa] sm:$0x2] %v2331_v53  ;;  %v2317_v7 = vmul.f32 0.6931472, %v2673_v25 }
0x2796   :  { %v2330_v63 = vsub.f32 %v3901_v9, %v2317_v7 }
0x2797   :  { %v2675_v26 = vpop.eup %2674 }
0x2798   :  { %v2677_v41 = vpop.eup %2676  ;;  %2341 = vst [vmem:[#allocation16 + $0x2] sm:$0x1] %v2330_v63  ;;  %2342 = vst [vmem:[#allocation16 + $0x9] sm:$0x2] %v2330_v63  ;;  %v2321_v51 = vmul.f32 0.6931472, %v2675_v26 }
0x2799   :  { %v2323_v37 = vmul.f32 0.6931472, %v2677_v41 }
0x279a   :  { %v2332_v55 = vsub.f32 %v3899_v39, %v2321_v51 }
0x279b   :  { %v2333_v46 = vsub.f32 %v3905_v23, %v2323_v37 }
0x279c   :  { %v2679_v33 = vpop.eup %2678  ;;  %2345 = vst [vmem:[#allocation16 + $0x4] sm:$0x1] %v2332_v55  ;;  %2346 = vst [vmem:[#allocation16 + $0xb] sm:$0x2] %v2332_v55 }
0x279d   :  { %v2681_v59 = vpop.eup %2680  ;;  %v2325_v61 = vmul.f32 0.6931472, %v2679_v33  ;;  %2347 = vst [vmem:[#allocation16 + $0x5] sm:$0x1] %v2333_v46  ;;  %2348 = vst [vmem:[#allocation16 + $0xc] sm:$0x2] %v2333_v46 }
0x279e   :  { %v2327_v30 = vmul.f32 0.6931472, %v2681_v59 }
0x279f   :  { %v2334_v17 = vsub.f32 %v3907_v49, %v2325_v61 }
0x27a0   :  { %v2335_v11 = vsub.f32 %v3910_v20, %v2327_v30 }
0x27a1   :  { %2349 = vst [vmem:[#allocation16 + $0x6] sm:$0x1] %v2334_v17  ;;  %2350 = vst [vmem:[#allocation16 + $0xd] sm:$0x2] %v2334_v17 }
0x27a2   :  { %2351 = vst [vmem:[#allocation16 + $0x7] sm:$0x1] %v2335_v11  ;;  %2352 = vst [vmem:[#allocation16 + $0xe] sm:$0x2] %v2335_v11 }
0x27a3   :  { %2785 = shalt.err (!%p2782_p1)
}
0x27a4   :  { %2364 = dma.vmem_to_hbm [thread:$0]  %s2359_s27, 256, %s3938_s11, [#allocation8], %s2810_s16, %s2810_s16, %s2811_s17  }
0x27a5   :  { %2802 = dma.done.wait [#allocation8], 256  }
0x27a6   :  { %2803 = vsyncadd [#allocation8], 4294967040 }
0x27a7   :  { %2368 = vsyncpa [#allocation7], 1 }
0x27a8   :  { %2369 = vsyncpa [#allocation12], 1 }
0x27a9   :  { %2370 = vsyncpa [#allocation15], 1 }
0x27aa   :  { %2371 = vsyncpa [#allocation8], 1 }
0x27ab   :  { %2372 = vsyncpa [#allocation9], 1 }

</bundles_post_ra>
